<compile_context>
chip_gen: v7x
topology: tpu7x:2x2x1
jax: 0.10.0
libtpu: 0.0.40
codegen_flags: <defaults>
</compile_context>

<pallas_src>
import jax
import jax.numpy as jnp
from jax.experimental import pallas as pl
from jax.experimental.pallas import tpu as pltpu


def _bilstm_kernel(x_ref, len_ref, w_x_ref, b_x_ref, w_hh_fw_ref, w_hh_bw_ref,
                   out_ref):
    T, B, E = x_ref.shape
    H4 = w_hh_fw_ref.shape[1]
    H = H4 // 4

    lengths = len_ref[...]                                  # (B, 1) int32

    # --- one big matmul: input projections for all timesteps, both directions,
    #     with both fused biases folded in.  (T*B, E) @ (E, 8H) + (1, 8H)
    x_flat = x_ref[...].reshape(T * B, E)                   # major-dim merge, layout-free
    xg = jnp.dot(x_flat, w_x_ref[...],
                 preferred_element_type=jnp.float32)
    xg = xg + jnp.broadcast_to(b_x_ref[...], (T * B, 2 * H4))

    # Hidden-state weights loaded once (resident for the whole recurrence).
    w_hh_fw = w_hh_fw_ref[...]                              # (H, 4H)
    w_hh_bw = w_hh_bw_ref[...]                              # (H, 4H)

    def cell(x_gates, h, c, w_hh):
        # PyTorch LSTMCell with the x @ W_ih.T + b part precomputed in x_gates.
        gates = x_gates + jnp.dot(h, w_hh, preferred_element_type=jnp.float32)
        i_g = jax.nn.sigmoid(gates[:, 0 * H:1 * H])
        f_g = jax.nn.sigmoid(gates[:, 1 * H:2 * H])
        g_g = jnp.tanh(gates[:, 2 * H:3 * H])
        o_g = jax.nn.sigmoid(gates[:, 3 * H:4 * H])
        c_new = f_g * c + i_g * g_g
        h_new = o_g * jnp.tanh(c_new)
        return h_new, c_new

    h_fw = jnp.zeros((B, H), jnp.float32)
    c_fw = jnp.zeros((B, H), jnp.float32)
    h_bw = jnp.zeros((B, H), jnp.float32)
    c_bw = jnp.zeros((B, H), jnp.float32)

    # Fully unrolled static time loop; fw/bw cells are independent per
    # iteration so their MXU / EUP work interleaves.
    for t in range(T):
        tb = T - 1 - t

        # forward direction: timestep t (gate slice = cols [0, 4H))
        m_fw = (lengths > t).astype(jnp.float32)            # (B, 1), free VPU cmp
        h_fw, c_fw = cell(xg[t * B:(t + 1) * B, 0:H4], h_fw, c_fw, w_hh_fw)
        h_fw = h_fw * m_fw                                   # mask h AND c (as in torch code)
        c_fw = c_fw * m_fw
        out_ref[t, :, 0:H] = h_fw

        # backward direction: timestep T-1-t (gate slice = cols [4H, 8H)),
        # written to row T-1-t so output already equals lstm_bw_outputs[::-1]
        m_bw = (lengths > tb).astype(jnp.float32)
        h_bw, c_bw = cell(xg[tb * B:(tb + 1) * B, H4:2 * H4], h_bw, c_bw, w_hh_bw)
        h_bw = h_bw * m_bw
        c_bw = c_bw * m_bw
        out_ref[tb, :, H:2 * H] = h_bw


def bilstm_forward(x_tokens, lengths, params):
    """Pallas-backed forward pass. Returns (B, T, 2H) float32."""
    emb = params["embedding"]                               # (V, E)
    x_embd = jnp.take(emb, x_tokens, axis=0)                # (B, T, E) -- gather stays in JAX glue
    x_embd = jnp.transpose(x_embd, (1, 0, 2))               # (T, B, E)
    T, B, E = x_embd.shape
    H = params["whh_fw"].shape[0]

    # Fuse both directions' input-projection weights / biases:
    #   W_x = [W_ih_fw.T | W_ih_bw.T] : (E, 8H),  b_x = [b_fw | b_bw] : (1, 8H)
    w_x = jnp.concatenate([params["wih_fw"], params["wih_bw"]], axis=1)
    b_x = jnp.concatenate([params["b_fw"], params["b_bw"]], axis=1)
    w_hh_fw = params["whh_fw"]                               # (H, 4H)
    w_hh_bw = params["whh_bw"]                               # (H, 4H)
    lengths2d = lengths.astype(jnp.int32).reshape(B, 1)      # (B, 1)

    def full_spec(shape):
        nd = len(shape)
        return pl.BlockSpec(shape, lambda *_, _nd=nd: (0,) * _nd)

    out = pl.pallas_call(
        _bilstm_kernel,
        out_shape=jax.ShapeDtypeStruct((T, B, 2 * H), jnp.float32),
        grid=(1,),                                           # single invocation; all data VMEM-resident
        in_specs=[full_spec((T, B, E)),
                  full_spec((B, 1)),
                  full_spec((E, 8 * H)),
                  full_spec((1, 8 * H)),
                  full_spec((H, 4 * H)),
                  full_spec((H, 4 * H))],
        out_specs=full_spec((T, B, 2 * H)),
        compiler_params=pltpu.CompilerParams(
            dimension_semantics=("arbitrary",)),
    )(x_embd, lengths2d, w_x, b_x, w_hh_fw, w_hh_bw)

    return jnp.transpose(out, (1, 0, 2))                     # (B, T, 2H)


# ------------------------- pure-JAX reference ---------------------------------
def _lstm_cell_ref(x, h, c, wih, whh, b):
    gates = x @ wih + h @ whh + b
    i, f, g, o = jnp.split(gates, 4, axis=-1)
    c = jax.nn.sigmoid(f) * c + jax.nn.sigmoid(i) * jnp.tanh(g)
    h = jax.nn.sigmoid(o) * jnp.tanh(c)
    return h, c


def bilstm_ref(x_tokens, lengths, params):
    emb = params["embedding"]
    x_embd = jnp.transpose(jnp.take(emb, x_tokens, axis=0), (1, 0, 2))  # (T, B, E)
    T, B, E = x_embd.shape
    H = params["whh_fw"].shape[0]
    mask = (jnp.arange(T)[None, :] < lengths[:, None]).astype(jnp.float32)
    h_fw = c_fw = h_bw = c_bw = jnp.zeros((B, H), jnp.float32)
    fw_outs, bw_outs = [], []
    for i in range(T):
        h_fw, c_fw = _lstm_cell_ref(x_embd[i], h_fw, c_fw,
                                    params["wih_fw"], params["whh_fw"], params["b_fw"])
        h_fw = h_fw * mask[:, i][:, None]
        c_fw = c_fw * mask[:, i][:, None]
        h_bw, c_bw = _lstm_cell_ref(x_embd[-i - 1], h_bw, c_bw,
                                    params["wih_bw"], params["whh_bw"], params["b_bw"])
        h_bw = h_bw * mask[:, -i - 1][:, None]
        c_bw = c_bw * mask[:, -i - 1][:, None]
        fw_outs.append(h_fw)
        bw_outs.append(h_bw)
    bw_outs = bw_outs[::-1]
    return jnp.stack([jnp.concatenate([f, b], axis=1)
                      for f, b in zip(fw_outs, bw_outs)], axis=1)  # (B, T, 2H)


# ------------------------------- main ------------------------------------------
if __name__ == "__main__":
    B, T, V, E, H = 8, 8, 64, 128, 128   # batch, max_length, num_tokens, emb_dim, hidden_dim

    key = jax.random.PRNGKey(0)
    k_tok, k_len, k_emb, k_fw, k_bw = jax.random.split(key, 5)

    x_tokens = jax.random.randint(k_tok, (B, T), 0, V, dtype=jnp.int32)
    lengths = jax.random.randint(k_len, (B,), 1, T + 1, dtype=jnp.int32)

    scale = 1.0 / jnp.sqrt(jnp.float32(H))
    kf1, kf2, kf3 = jax.random.split(k_fw, 3)
    kb1, kb2, kb3 = jax.random.split(k_bw, 3)
    params = {
        "embedding": jax.random.normal(k_emb, (V, E), jnp.float32) * 0.1,
        # W_ih / W_hh stored pre-transposed: (E, 4H), (H, 4H); bias = b_ih + b_hh -> (1, 4H)
        "wih_fw": jax.random.uniform(kf1, (E, 4 * H), jnp.float32, -scale, scale),
        "whh_fw": jax.random.uniform(kf2, (H, 4 * H), jnp.float32, -scale, scale),
        "b_fw": jax.random.uniform(kf3, (1, 4 * H), jnp.float32, -scale, scale),
        "wih_bw": jax.random.uniform(kb1, (E, 4 * H), jnp.float32, -scale, scale),
        "whh_bw": jax.random.uniform(kb2, (H, 4 * H), jnp.float32, -scale, scale),
        "b_bw": jax.random.uniform(kb3, (1, 4 * H), jnp.float32, -scale, scale),
    }

    out = bilstm_forward(x_tokens, lengths, params)
    out = jax.block_until_ready(out)
    assert out.shape == (B, T, 2 * H), out.shape

    ref = jax.block_until_ready(bilstm_ref(x_tokens, lengths, params))
    assert jnp.allclose(out, ref, atol=1e-4, rtol=1e-4), \
        f"max abs diff = {jnp.max(jnp.abs(out - ref))}"

    print("KERNEL_OK")
</pallas_src>

<mosaic_0001>
module attributes {stable_mosaic.version = 11 : i64} {
  func.func @_bilstm_kernel(%arg0: i32, %arg1: memref<8x8x128xf32, #tpu.memory_space<vmem>>, %arg2: memref<8x1xi32, #tpu.memory_space<vmem>>, %arg3: memref<128x1024xf32, #tpu.memory_space<vmem>>, %arg4: memref<1x1024xf32, #tpu.memory_space<vmem>>, %arg5: memref<128x512xf32, #tpu.memory_space<vmem>>, %arg6: memref<128x512xf32, #tpu.memory_space<vmem>>, %arg7: memref<8x8x256xf32, #tpu.memory_space<vmem>>) attributes {dimension_semantics = [#tpu.dimension_semantics<arbitrary>], iteration_bounds = array<i64: 1>, scalar_prefetch = 0 : i64, scratch_operands = 0 : i64, tpu.core_type = #tpu.core_type<tc>, window_params = [{pipeline_mode = #tpu.pipeline_mode<synchronous>, transform_indices = @transform_0, window_bounds = array<i64: 8, 8, 128>}, {pipeline_mode = #tpu.pipeline_mode<synchronous>, transform_indices = @transform_1, window_bounds = array<i64: 8, 1>}, {pipeline_mode = #tpu.pipeline_mode<synchronous>, transform_indices = @transform_2, window_bounds = array<i64: 128, 1024>}, {pipeline_mode = #tpu.pipeline_mode<synchronous>, transform_indices = @transform_3, window_bounds = array<i64: 1, 1024>}, {pipeline_mode = #tpu.pipeline_mode<synchronous>, transform_indices = @transform_4, window_bounds = array<i64: 128, 512>}, {pipeline_mode = #tpu.pipeline_mode<synchronous>, transform_indices = @transform_5, window_bounds = array<i64: 128, 512>}, {pipeline_mode = #tpu.pipeline_mode<synchronous>, transform_indices = @transform_6, window_bounds = array<i64: 8, 8, 256>}]} {
    %c0 = arith.constant 0 : index
    %c0_0 = arith.constant 0 : index
    %0 = vector.load %arg2[%c0, %c0_0] : memref<8x1xi32, #tpu.memory_space<vmem>>, vector<8x1xi32>
    %c0_1 = arith.constant 0 : index
    %c0_2 = arith.constant 0 : index
    %c0_3 = arith.constant 0 : index
    %1 = vector.load %arg1[%c0_1, %c0_2, %c0_3] : memref<8x8x128xf32, #tpu.memory_space<vmem>>, vector<8x8x128xf32>
    %2 = vector.shape_cast %1 : vector<8x8x128xf32> to vector<64x128xf32>
    %c0_4 = arith.constant 0 : index
    %c0_5 = arith.constant 0 : index
    %3 = vector.load %arg3[%c0_4, %c0_5] : memref<128x1024xf32, #tpu.memory_space<vmem>>, vector<128x1024xf32>
    %cst = arith.constant dense<0.000000e+00> : vector<64x1024xf32>
    %4 = tpu.matmul %2, %3, %cst {dimension_numbers = #tpu.dot_dimension_numbers<[1], [0], [0], [1], [0, 0, 1, 1], [], []>} : vector<64x128xf32>, vector<128x1024xf32>, vector<64x1024xf32> -> vector<64x1024xf32>
    %c0_6 = arith.constant 0 : index
    %c0_7 = arith.constant 0 : index
    %5 = vector.load %arg4[%c0_6, %c0_7] : memref<1x1024xf32, #tpu.memory_space<vmem>>, vector<1x1024xf32>
    %6 = vector.shape_cast %5 : vector<1x1024xf32> to vector<1x1024xf32>
    %7 = vector.broadcast %6 : vector<1x1024xf32> to vector<64x1024xf32>
    %8 = arith.addf %4, %7 : vector<64x1024xf32>
    %c0_8 = arith.constant 0 : index
    %c0_9 = arith.constant 0 : index
    %9 = vector.load %arg5[%c0_8, %c0_9] : memref<128x512xf32, #tpu.memory_space<vmem>>, vector<128x512xf32>
    %c0_10 = arith.constant 0 : index
    %c0_11 = arith.constant 0 : index
    %10 = vector.load %arg6[%c0_10, %c0_11] : memref<128x512xf32, #tpu.memory_space<vmem>>, vector<128x512xf32>
    %cst_12 = arith.constant 0.000000e+00 : f32
    %11 = vector.broadcast %cst_12 : f32 to vector<8x128xf32>
    %cst_13 = arith.constant 0.000000e+00 : f32
    %12 = vector.broadcast %cst_13 : f32 to vector<8x128xf32>
    %cst_14 = arith.constant 0.000000e+00 : f32
    %13 = vector.broadcast %cst_14 : f32 to vector<8x128xf32>
    %cst_15 = arith.constant 0.000000e+00 : f32
    %14 = vector.broadcast %cst_15 : f32 to vector<8x128xf32>
    %c0_i32 = arith.constant 0 : i32
    %15 = vector.broadcast %c0_i32 : i32 to vector<8x1xi32>
    %16 = arith.cmpi sgt, %0, %15 : vector<8x1xi32>
    %17 = arith.extui %16 : vector<8x1xi1> to vector<8x1xi32>
    %18 = arith.sitofp %17 : vector<8x1xi32> to vector<8x1xf32>
    %19 = vector.extract_strided_slice %8 {offsets = [0, 0], sizes = [8, 512], strides = [1, 1]} : vector<64x1024xf32> to vector<8x512xf32>
    %cst_16 = arith.constant dense<0.000000e+00> : vector<8x512xf32>
    %20 = tpu.matmul %11, %9, %cst_16 {dimension_numbers = #tpu.dot_dimension_numbers<[1], [0], [0], [1], [0, 0, 1, 1], [], []>} : vector<8x128xf32>, vector<128x512xf32>, vector<8x512xf32> -> vector<8x512xf32>
    %21 = arith.addf %19, %20 : vector<8x512xf32>
    %22 = vector.extract_strided_slice %21 {offsets = [0, 0], sizes = [8, 128], strides = [1, 1]} : vector<8x512xf32> to vector<8x128xf32>
    %23 = arith.negf %22 : vector<8x128xf32>
    %24 = math.exp %23 : vector<8x128xf32>
    %cst_17 = arith.constant 1.000000e+00 : f32
    %25 = vector.broadcast %cst_17 : f32 to vector<8x128xf32>
    %26 = arith.addf %25, %24 : vector<8x128xf32>
    %27 = arith.divf %25, %26 : vector<8x128xf32>
    %28 = vector.extract_strided_slice %21 {offsets = [0, 128], sizes = [8, 128], strides = [1, 1]} : vector<8x512xf32> to vector<8x128xf32>
    %29 = arith.negf %28 : vector<8x128xf32>
    %30 = math.exp %29 : vector<8x128xf32>
    %cst_18 = arith.constant 1.000000e+00 : f32
    %31 = vector.broadcast %cst_18 : f32 to vector<8x128xf32>
    %32 = arith.addf %31, %30 : vector<8x128xf32>
    %33 = arith.divf %31, %32 : vector<8x128xf32>
    %34 = vector.extract_strided_slice %21 {offsets = [0, 256], sizes = [8, 128], strides = [1, 1]} : vector<8x512xf32> to vector<8x128xf32>
    %35 = math.tanh %34 : vector<8x128xf32>
    %36 = vector.extract_strided_slice %21 {offsets = [0, 384], sizes = [8, 128], strides = [1, 1]} : vector<8x512xf32> to vector<8x128xf32>
    %37 = arith.negf %36 : vector<8x128xf32>
    %38 = math.exp %37 : vector<8x128xf32>
    %cst_19 = arith.constant 1.000000e+00 : f32
    %39 = vector.broadcast %cst_19 : f32 to vector<8x128xf32>
    %40 = arith.addf %39, %38 : vector<8x128xf32>
    %41 = arith.divf %39, %40 : vector<8x128xf32>
    %42 = arith.mulf %33, %12 : vector<8x128xf32>
    %43 = arith.mulf %27, %35 : vector<8x128xf32>
    %44 = arith.addf %42, %43 : vector<8x128xf32>
    %45 = math.tanh %44 : vector<8x128xf32>
    %46 = arith.mulf %41, %45 : vector<8x128xf32>
    %47 = vector.broadcast %18 : vector<8x1xf32> to vector<8x128xf32>
    %48 = arith.mulf %46, %47 : vector<8x128xf32>
    %49 = vector.broadcast %18 : vector<8x1xf32> to vector<8x128xf32>
    %50 = arith.mulf %44, %49 : vector<8x128xf32>
    %c0_20 = arith.constant 0 : index
    %c0_21 = arith.constant 0 : index
    %c0_22 = arith.constant 0 : index
    %51 = vector.load %arg7[%c0_20, %c0_21, %c0_22] : memref<8x8x256xf32, #tpu.memory_space<vmem>>, vector<1x8x128xf32>
    %52 = vector.shape_cast %51 : vector<1x8x128xf32> to vector<8x128xf32>
    %53 = vector.shape_cast %48 : vector<8x128xf32> to vector<1x8x128xf32>
    tpu.vector_store %arg7[%c0_20, %c0_21, %c0_22], %53 {strides = array<i32>} : memref<8x8x256xf32, #tpu.memory_space<vmem>>, vector<1x8x128xf32>,
    %c7_i32 = arith.constant 7 : i32
    %54 = vector.broadcast %c7_i32 : i32 to vector<8x1xi32>
    %55 = arith.cmpi sgt, %0, %54 : vector<8x1xi32>
    %56 = arith.extui %55 : vector<8x1xi1> to vector<8x1xi32>
    %57 = arith.sitofp %56 : vector<8x1xi32> to vector<8x1xf32>
    %58 = vector.extract_strided_slice %8 {offsets = [56, 512], sizes = [8, 512], strides = [1, 1]} : vector<64x1024xf32> to vector<8x512xf32>
    %cst_23 = arith.constant dense<0.000000e+00> : vector<8x512xf32>
    %59 = tpu.matmul %13, %10, %cst_23 {dimension_numbers = #tpu.dot_dimension_numbers<[1], [0], [0], [1], [0, 0, 1, 1], [], []>} : vector<8x128xf32>, vector<128x512xf32>, vector<8x512xf32> -> vector<8x512xf32>
    %60 = arith.addf %58, %59 : vector<8x512xf32>
    %61 = vector.extract_strided_slice %60 {offsets = [0, 0], sizes = [8, 128], strides = [1, 1]} : vector<8x512xf32> to vector<8x128xf32>
    %62 = arith.negf %61 : vector<8x128xf32>
    %63 = math.exp %62 : vector<8x128xf32>
    %cst_24 = arith.constant 1.000000e+00 : f32
    %64 = vector.broadcast %cst_24 : f32 to vector<8x128xf32>
    %65 = arith.addf %64, %63 : vector<8x128xf32>
    %66 = arith.divf %64, %65 : vector<8x128xf32>
    %67 = vector.extract_strided_slice %60 {offsets = [0, 128], sizes = [8, 128], strides = [1, 1]} : vector<8x512xf32> to vector<8x128xf32>
    %68 = arith.negf %67 : vector<8x128xf32>
    %69 = math.exp %68 : vector<8x128xf32>
    %cst_25 = arith.constant 1.000000e+00 : f32
    %70 = vector.broadcast %cst_25 : f32 to vector<8x128xf32>
    %71 = arith.addf %70, %69 : vector<8x128xf32>
    %72 = arith.divf %70, %71 : vector<8x128xf32>
    %73 = vector.extract_strided_slice %60 {offsets = [0, 256], sizes = [8, 128], strides = [1, 1]} : vector<8x512xf32> to vector<8x128xf32>
    %74 = math.tanh %73 : vector<8x128xf32>
    %75 = vector.extract_strided_slice %60 {offsets = [0, 384], sizes = [8, 128], strides = [1, 1]} : vector<8x512xf32> to vector<8x128xf32>
    %76 = arith.negf %75 : vector<8x128xf32>
    %77 = math.exp %76 : vector<8x128xf32>
    %cst_26 = arith.constant 1.000000e+00 : f32
    %78 = vector.broadcast %cst_26 : f32 to vector<8x128xf32>
    %79 = arith.addf %78, %77 : vector<8x128xf32>
    %80 = arith.divf %78, %79 : vector<8x128xf32>
    %81 = arith.mulf %72, %14 : vector<8x128xf32>
    %82 = arith.mulf %66, %74 : vector<8x128xf32>
    %83 = arith.addf %81, %82 : vector<8x128xf32>
    %84 = math.tanh %83 : vector<8x128xf32>
    %85 = arith.mulf %80, %84 : vector<8x128xf32>
    %86 = vector.broadcast %57 : vector<8x1xf32> to vector<8x128xf32>
    %87 = arith.mulf %85, %86 : vector<8x128xf32>
    %88 = vector.broadcast %57 : vector<8x1xf32> to vector<8x128xf32>
    %89 = arith.mulf %83, %88 : vector<8x128xf32>
    %c7 = arith.constant 7 : index
    %c0_27 = arith.constant 0 : index
    %c128 = arith.constant 128 : index
    %90 = vector.load %arg7[%c7, %c0_27, %c128] : memref<8x8x256xf32, #tpu.memory_space<vmem>>, vector<1x8x128xf32>
    %91 = vector.shape_cast %90 : vector<1x8x128xf32> to vector<8x128xf32>
    %92 = vector.shape_cast %87 : vector<8x128xf32> to vector<1x8x128xf32>
    tpu.vector_store %arg7[%c7, %c0_27, %c128], %92 {strides = array<i32>} : memref<8x8x256xf32, #tpu.memory_space<vmem>>, vector<1x8x128xf32>,
    %c1_i32 = arith.constant 1 : i32
    %93 = vector.broadcast %c1_i32 : i32 to vector<8x1xi32>
    %94 = arith.cmpi sgt, %0, %93 : vector<8x1xi32>
    %95 = arith.extui %94 : vector<8x1xi1> to vector<8x1xi32>
    %96 = arith.sitofp %95 : vector<8x1xi32> to vector<8x1xf32>
    %97 = vector.extract_strided_slice %8 {offsets = [8, 0], sizes = [8, 512], strides = [1, 1]} : vector<64x1024xf32> to vector<8x512xf32>
    %cst_28 = arith.constant dense<0.000000e+00> : vector<8x512xf32>
    %98 = tpu.matmul %48, %9, %cst_28 {dimension_numbers = #tpu.dot_dimension_numbers<[1], [0], [0], [1], [0, 0, 1, 1], [], []>} : vector<8x128xf32>, vector<128x512xf32>, vector<8x512xf32> -> vector<8x512xf32>
    %99 = arith.addf %97, %98 : vector<8x512xf32>
    %100 = vector.extract_strided_slice %99 {offsets = [0, 0], sizes = [8, 128], strides = [1, 1]} : vector<8x512xf32> to vector<8x128xf32>
    %101 = arith.negf %100 : vector<8x128xf32>
    %102 = math.exp %101 : vector<8x128xf32>
    %cst_29 = arith.constant 1.000000e+00 : f32
    %103 = vector.broadcast %cst_29 : f32 to vector<8x128xf32>
    %104 = arith.addf %103, %102 : vector<8x128xf32>
    %105 = arith.divf %103, %104 : vector<8x128xf32>
    %106 = vector.extract_strided_slice %99 {offsets = [0, 128], sizes = [8, 128], strides = [1, 1]} : vector<8x512xf32> to vector<8x128xf32>
    %107 = arith.negf %106 : vector<8x128xf32>
    %108 = math.exp %107 : vector<8x128xf32>
    %cst_30 = arith.constant 1.000000e+00 : f32
    %109 = vector.broadcast %cst_30 : f32 to vector<8x128xf32>
    %110 = arith.addf %109, %108 : vector<8x128xf32>
    %111 = arith.divf %109, %110 : vector<8x128xf32>
    %112 = vector.extract_strided_slice %99 {offsets = [0, 256], sizes = [8, 128], strides = [1, 1]} : vector<8x512xf32> to vector<8x128xf32>
    %113 = math.tanh %112 : vector<8x128xf32>
    %114 = vector.extract_strided_slice %99 {offsets = [0, 384], sizes = [8, 128], strides = [1, 1]} : vector<8x512xf32> to vector<8x128xf32>
    %115 = arith.negf %114 : vector<8x128xf32>
    %116 = math.exp %115 : vector<8x128xf32>
    %cst_31 = arith.constant 1.000000e+00 : f32
    %117 = vector.broadcast %cst_31 : f32 to vector<8x128xf32>
    %118 = arith.addf %117, %116 : vector<8x128xf32>
    %119 = arith.divf %117, %118 : vector<8x128xf32>
    %120 = arith.mulf %111, %50 : vector<8x128xf32>
    %121 = arith.mulf %105, %113 : vector<8x128xf32>
    %122 = arith.addf %120, %121 : vector<8x128xf32>
    %123 = math.tanh %122 : vector<8x128xf32>
    %124 = arith.mulf %119, %123 : vector<8x128xf32>
    %125 = vector.broadcast %96 : vector<8x1xf32> to vector<8x128xf32>
    %126 = arith.mulf %124, %125 : vector<8x128xf32>
    %127 = vector.broadcast %96 : vector<8x1xf32> to vector<8x128xf32>
    %128 = arith.mulf %122, %127 : vector<8x128xf32>
    %c1 = arith.constant 1 : index
    %c0_32 = arith.constant 0 : index
    %c0_33 = arith.constant 0 : index
    %129 = vector.load %arg7[%c1, %c0_32, %c0_33] : memref<8x8x256xf32, #tpu.memory_space<vmem>>, vector<1x8x128xf32>
    %130 = vector.shape_cast %129 : vector<1x8x128xf32> to vector<8x128xf32>
    %131 = vector.shape_cast %126 : vector<8x128xf32> to vector<1x8x128xf32>
    tpu.vector_store %arg7[%c1, %c0_32, %c0_33], %131 {strides = array<i32>} : memref<8x8x256xf32, #tpu.memory_space<vmem>>, vector<1x8x128xf32>,
    %c6_i32 = arith.constant 6 : i32
    %132 = vector.broadcast %c6_i32 : i32 to vector<8x1xi32>
    %133 = arith.cmpi sgt, %0, %132 : vector<8x1xi32>
    %134 = arith.extui %133 : vector<8x1xi1> to vector<8x1xi32>
    %135 = arith.sitofp %134 : vector<8x1xi32> to vector<8x1xf32>
    %136 = vector.extract_strided_slice %8 {offsets = [48, 512], sizes = [8, 512], strides = [1, 1]} : vector<64x1024xf32> to vector<8x512xf32>
    %cst_34 = arith.constant dense<0.000000e+00> : vector<8x512xf32>
    %137 = tpu.matmul %87, %10, %cst_34 {dimension_numbers = #tpu.dot_dimension_numbers<[1], [0], [0], [1], [0, 0, 1, 1], [], []>} : vector<8x128xf32>, vector<128x512xf32>, vector<8x512xf32> -> vector<8x512xf32>
    %138 = arith.addf %136, %137 : vector<8x512xf32>
    %139 = vector.extract_strided_slice %138 {offsets = [0, 0], sizes = [8, 128], strides = [1, 1]} : vector<8x512xf32> to vector<8x128xf32>
    %140 = arith.negf %139 : vector<8x128xf32>
    %141 = math.exp %140 : vector<8x128xf32>
    %cst_35 = arith.constant 1.000000e+00 : f32
    %142 = vector.broadcast %cst_35 : f32 to vector<8x128xf32>
    %143 = arith.addf %142, %141 : vector<8x128xf32>
    %144 = arith.divf %142, %143 : vector<8x128xf32>
    %145 = vector.extract_strided_slice %138 {offsets = [0, 128], sizes = [8, 128], strides = [1, 1]} : vector<8x512xf32> to vector<8x128xf32>
    %146 = arith.negf %145 : vector<8x128xf32>
    %147 = math.exp %146 : vector<8x128xf32>
    %cst_36 = arith.constant 1.000000e+00 : f32
    %148 = vector.broadcast %cst_36 : f32 to vector<8x128xf32>
    %149 = arith.addf %148, %147 : vector<8x128xf32>
    %150 = arith.divf %148, %149 : vector<8x128xf32>
    %151 = vector.extract_strided_slice %138 {offsets = [0, 256], sizes = [8, 128], strides = [1, 1]} : vector<8x512xf32> to vector<8x128xf32>
    %152 = math.tanh %151 : vector<8x128xf32>
    %153 = vector.extract_strided_slice %138 {offsets = [0, 384], sizes = [8, 128], strides = [1, 1]} : vector<8x512xf32> to vector<8x128xf32>
    %154 = arith.negf %153 : vector<8x128xf32>
    %155 = math.exp %154 : vector<8x128xf32>
    %cst_37 = arith.constant 1.000000e+00 : f32
    %156 = vector.broadcast %cst_37 : f32 to vector<8x128xf32>
    %157 = arith.addf %156, %155 : vector<8x128xf32>
    %158 = arith.divf %156, %157 : vector<8x128xf32>
    %159 = arith.mulf %150, %89 : vector<8x128xf32>
    %160 = arith.mulf %144, %152 : vector<8x128xf32>
    %161 = arith.addf %159, %160 : vector<8x128xf32>
    %162 = math.tanh %161 : vector<8x128xf32>
    %163 = arith.mulf %158, %162 : vector<8x128xf32>
    %164 = vector.broadcast %135 : vector<8x1xf32> to vector<8x128xf32>
    %165 = arith.mulf %163, %164 : vector<8x128xf32>
    %166 = vector.broadcast %135 : vector<8x1xf32> to vector<8x128xf32>
    %167 = arith.mulf %161, %166 : vector<8x128xf32>
    %c6 = arith.constant 6 : index
    %c0_38 = arith.constant 0 : index
    %c128_39 = arith.constant 128 : index
    %168 = vector.load %arg7[%c6, %c0_38, %c128_39] : memref<8x8x256xf32, #tpu.memory_space<vmem>>, vector<1x8x128xf32>
    %169 = vector.shape_cast %168 : vector<1x8x128xf32> to vector<8x128xf32>
    %170 = vector.shape_cast %165 : vector<8x128xf32> to vector<1x8x128xf32>
    tpu.vector_store %arg7[%c6, %c0_38, %c128_39], %170 {strides = array<i32>} : memref<8x8x256xf32, #tpu.memory_space<vmem>>, vector<1x8x128xf32>,
    %c2_i32 = arith.constant 2 : i32
    %171 = vector.broadcast %c2_i32 : i32 to vector<8x1xi32>
    %172 = arith.cmpi sgt, %0, %171 : vector<8x1xi32>
    %173 = arith.extui %172 : vector<8x1xi1> to vector<8x1xi32>
    %174 = arith.sitofp %173 : vector<8x1xi32> to vector<8x1xf32>
    %175 = vector.extract_strided_slice %8 {offsets = [16, 0], sizes = [8, 512], strides = [1, 1]} : vector<64x1024xf32> to vector<8x512xf32>
    %cst_40 = arith.constant dense<0.000000e+00> : vector<8x512xf32>
    %176 = tpu.matmul %126, %9, %cst_40 {dimension_numbers = #tpu.dot_dimension_numbers<[1], [0], [0], [1], [0, 0, 1, 1], [], []>} : vector<8x128xf32>, vector<128x512xf32>, vector<8x512xf32> -> vector<8x512xf32>
    %177 = arith.addf %175, %176 : vector<8x512xf32>
    %178 = vector.extract_strided_slice %177 {offsets = [0, 0], sizes = [8, 128], strides = [1, 1]} : vector<8x512xf32> to vector<8x128xf32>
    %179 = arith.negf %178 : vector<8x128xf32>
    %180 = math.exp %179 : vector<8x128xf32>
    %cst_41 = arith.constant 1.000000e+00 : f32
    %181 = vector.broadcast %cst_41 : f32 to vector<8x128xf32>
    %182 = arith.addf %181, %180 : vector<8x128xf32>
    %183 = arith.divf %181, %182 : vector<8x128xf32>
    %184 = vector.extract_strided_slice %177 {offsets = [0, 128], sizes = [8, 128], strides = [1, 1]} : vector<8x512xf32> to vector<8x128xf32>
    %185 = arith.negf %184 : vector<8x128xf32>
    %186 = math.exp %185 : vector<8x128xf32>
    %cst_42 = arith.constant 1.000000e+00 : f32
    %187 = vector.broadcast %cst_42 : f32 to vector<8x128xf32>
    %188 = arith.addf %187, %186 : vector<8x128xf32>
    %189 = arith.divf %187, %188 : vector<8x128xf32>
    %190 = vector.extract_strided_slice %177 {offsets = [0, 256], sizes = [8, 128], strides = [1, 1]} : vector<8x512xf32> to vector<8x128xf32>
    %191 = math.tanh %190 : vector<8x128xf32>
    %192 = vector.extract_strided_slice %177 {offsets = [0, 384], sizes = [8, 128], strides = [1, 1]} : vector<8x512xf32> to vector<8x128xf32>
    %193 = arith.negf %192 : vector<8x128xf32>
    %194 = math.exp %193 : vector<8x128xf32>
    %cst_43 = arith.constant 1.000000e+00 : f32
    %195 = vector.broadcast %cst_43 : f32 to vector<8x128xf32>
    %196 = arith.addf %195, %194 : vector<8x128xf32>
    %197 = arith.divf %195, %196 : vector<8x128xf32>
    %198 = arith.mulf %189, %128 : vector<8x128xf32>
    %199 = arith.mulf %183, %191 : vector<8x128xf32>
    %200 = arith.addf %198, %199 : vector<8x128xf32>
    %201 = math.tanh %200 : vector<8x128xf32>
    %202 = arith.mulf %197, %201 : vector<8x128xf32>
    %203 = vector.broadcast %174 : vector<8x1xf32> to vector<8x128xf32>
    %204 = arith.mulf %202, %203 : vector<8x128xf32>
    %205 = vector.broadcast %174 : vector<8x1xf32> to vector<8x128xf32>
    %206 = arith.mulf %200, %205 : vector<8x128xf32>
    %c2 = arith.constant 2 : index
    %c0_44 = arith.constant 0 : index
    %c0_45 = arith.constant 0 : index
    %207 = vector.load %arg7[%c2, %c0_44, %c0_45] : memref<8x8x256xf32, #tpu.memory_space<vmem>>, vector<1x8x128xf32>
    %208 = vector.shape_cast %207 : vector<1x8x128xf32> to vector<8x128xf32>
    %209 = vector.shape_cast %204 : vector<8x128xf32> to vector<1x8x128xf32>
    tpu.vector_store %arg7[%c2, %c0_44, %c0_45], %209 {strides = array<i32>} : memref<8x8x256xf32, #tpu.memory_space<vmem>>, vector<1x8x128xf32>,
    %c5_i32 = arith.constant 5 : i32
    %210 = vector.broadcast %c5_i32 : i32 to vector<8x1xi32>
    %211 = arith.cmpi sgt, %0, %210 : vector<8x1xi32>
    %212 = arith.extui %211 : vector<8x1xi1> to vector<8x1xi32>
    %213 = arith.sitofp %212 : vector<8x1xi32> to vector<8x1xf32>
    %214 = vector.extract_strided_slice %8 {offsets = [40, 512], sizes = [8, 512], strides = [1, 1]} : vector<64x1024xf32> to vector<8x512xf32>
    %cst_46 = arith.constant dense<0.000000e+00> : vector<8x512xf32>
    %215 = tpu.matmul %165, %10, %cst_46 {dimension_numbers = #tpu.dot_dimension_numbers<[1], [0], [0], [1], [0, 0, 1, 1], [], []>} : vector<8x128xf32>, vector<128x512xf32>, vector<8x512xf32> -> vector<8x512xf32>
    %216 = arith.addf %214, %215 : vector<8x512xf32>
    %217 = vector.extract_strided_slice %216 {offsets = [0, 0], sizes = [8, 128], strides = [1, 1]} : vector<8x512xf32> to vector<8x128xf32>
    %218 = arith.negf %217 : vector<8x128xf32>
    %219 = math.exp %218 : vector<8x128xf32>
    %cst_47 = arith.constant 1.000000e+00 : f32
    %220 = vector.broadcast %cst_47 : f32 to vector<8x128xf32>
    %221 = arith.addf %220, %219 : vector<8x128xf32>
    %222 = arith.divf %220, %221 : vector<8x128xf32>
    %223 = vector.extract_strided_slice %216 {offsets = [0, 128], sizes = [8, 128], strides = [1, 1]} : vector<8x512xf32> to vector<8x128xf32>
    %224 = arith.negf %223 : vector<8x128xf32>
    %225 = math.exp %224 : vector<8x128xf32>
    %cst_48 = arith.constant 1.000000e+00 : f32
    %226 = vector.broadcast %cst_48 : f32 to vector<8x128xf32>
    %227 = arith.addf %226, %225 : vector<8x128xf32>
    %228 = arith.divf %226, %227 : vector<8x128xf32>
    %229 = vector.extract_strided_slice %216 {offsets = [0, 256], sizes = [8, 128], strides = [1, 1]} : vector<8x512xf32> to vector<8x128xf32>
    %230 = math.tanh %229 : vector<8x128xf32>
    %231 = vector.extract_strided_slice %216 {offsets = [0, 384], sizes = [8, 128], strides = [1, 1]} : vector<8x512xf32> to vector<8x128xf32>
    %232 = arith.negf %231 : vector<8x128xf32>
    %233 = math.exp %232 : vector<8x128xf32>
    %cst_49 = arith.constant 1.000000e+00 : f32
    %234 = vector.broadcast %cst_49 : f32 to vector<8x128xf32>
    %235 = arith.addf %234, %233 : vector<8x128xf32>
    %236 = arith.divf %234, %235 : vector<8x128xf32>
    %237 = arith.mulf %228, %167 : vector<8x128xf32>
    %238 = arith.mulf %222, %230 : vector<8x128xf32>
    %239 = arith.addf %237, %238 : vector<8x128xf32>
    %240 = math.tanh %239 : vector<8x128xf32>
    %241 = arith.mulf %236, %240 : vector<8x128xf32>
    %242 = vector.broadcast %213 : vector<8x1xf32> to vector<8x128xf32>
    %243 = arith.mulf %241, %242 : vector<8x128xf32>
    %244 = vector.broadcast %213 : vector<8x1xf32> to vector<8x128xf32>
    %245 = arith.mulf %239, %244 : vector<8x128xf32>
    %c5 = arith.constant 5 : index
    %c0_50 = arith.constant 0 : index
    %c128_51 = arith.constant 128 : index
    %246 = vector.load %arg7[%c5, %c0_50, %c128_51] : memref<8x8x256xf32, #tpu.memory_space<vmem>>, vector<1x8x128xf32>
    %247 = vector.shape_cast %246 : vector<1x8x128xf32> to vector<8x128xf32>
    %248 = vector.shape_cast %243 : vector<8x128xf32> to vector<1x8x128xf32>
    tpu.vector_store %arg7[%c5, %c0_50, %c128_51], %248 {strides = array<i32>} : memref<8x8x256xf32, #tpu.memory_space<vmem>>, vector<1x8x128xf32>,
    %c3_i32 = arith.constant 3 : i32
    %249 = vector.broadcast %c3_i32 : i32 to vector<8x1xi32>
    %250 = arith.cmpi sgt, %0, %249 : vector<8x1xi32>
    %251 = arith.extui %250 : vector<8x1xi1> to vector<8x1xi32>
    %252 = arith.sitofp %251 : vector<8x1xi32> to vector<8x1xf32>
    %253 = vector.extract_strided_slice %8 {offsets = [24, 0], sizes = [8, 512], strides = [1, 1]} : vector<64x1024xf32> to vector<8x512xf32>
    %cst_52 = arith.constant dense<0.000000e+00> : vector<8x512xf32>
    %254 = tpu.matmul %204, %9, %cst_52 {dimension_numbers = #tpu.dot_dimension_numbers<[1], [0], [0], [1], [0, 0, 1, 1], [], []>} : vector<8x128xf32>, vector<128x512xf32>, vector<8x512xf32> -> vector<8x512xf32>
    %255 = arith.addf %253, %254 : vector<8x512xf32>
    %256 = vector.extract_strided_slice %255 {offsets = [0, 0], sizes = [8, 128], strides = [1, 1]} : vector<8x512xf32> to vector<8x128xf32>
    %257 = arith.negf %256 : vector<8x128xf32>
    %258 = math.exp %257 : vector<8x128xf32>
    %cst_53 = arith.constant 1.000000e+00 : f32
    %259 = vector.broadcast %cst_53 : f32 to vector<8x128xf32>
    %260 = arith.addf %259, %258 : vector<8x128xf32>
    %261 = arith.divf %259, %260 : vector<8x128xf32>
    %262 = vector.extract_strided_slice %255 {offsets = [0, 128], sizes = [8, 128], strides = [1, 1]} : vector<8x512xf32> to vector<8x128xf32>
    %263 = arith.negf %262 : vector<8x128xf32>
    %264 = math.exp %263 : vector<8x128xf32>
    %cst_54 = arith.constant 1.000000e+00 : f32
    %265 = vector.broadcast %cst_54 : f32 to vector<8x128xf32>
    %266 = arith.addf %265, %264 : vector<8x128xf32>
    %267 = arith.divf %265, %266 : vector<8x128xf32>
    %268 = vector.extract_strided_slice %255 {offsets = [0, 256], sizes = [8, 128], strides = [1, 1]} : vector<8x512xf32> to vector<8x128xf32>
    %269 = math.tanh %268 : vector<8x128xf32>
    %270 = vector.extract_strided_slice %255 {offsets = [0, 384], sizes = [8, 128], strides = [1, 1]} : vector<8x512xf32> to vector<8x128xf32>
    %271 = arith.negf %270 : vector<8x128xf32>
    %272 = math.exp %271 : vector<8x128xf32>
    %cst_55 = arith.constant 1.000000e+00 : f32
    %273 = vector.broadcast %cst_55 : f32 to vector<8x128xf32>
    %274 = arith.addf %273, %272 : vector<8x128xf32>
    %275 = arith.divf %273, %274 : vector<8x128xf32>
    %276 = arith.mulf %267, %206 : vector<8x128xf32>
    %277 = arith.mulf %261, %269 : vector<8x128xf32>
    %278 = arith.addf %276, %277 : vector<8x128xf32>
    %279 = math.tanh %278 : vector<8x128xf32>
    %280 = arith.mulf %275, %279 : vector<8x128xf32>
    %281 = vector.broadcast %252 : vector<8x1xf32> to vector<8x128xf32>
    %282 = arith.mulf %280, %281 : vector<8x128xf32>
    %283 = vector.broadcast %252 : vector<8x1xf32> to vector<8x128xf32>
    %284 = arith.mulf %278, %283 : vector<8x128xf32>
    %c3 = arith.constant 3 : index
    %c0_56 = arith.constant 0 : index
    %c0_57 = arith.constant 0 : index
    %285 = vector.load %arg7[%c3, %c0_56, %c0_57] : memref<8x8x256xf32, #tpu.memory_space<vmem>>, vector<1x8x128xf32>
    %286 = vector.shape_cast %285 : vector<1x8x128xf32> to vector<8x128xf32>
    %287 = vector.shape_cast %282 : vector<8x128xf32> to vector<1x8x128xf32>
    tpu.vector_store %arg7[%c3, %c0_56, %c0_57], %287 {strides = array<i32>} : memref<8x8x256xf32, #tpu.memory_space<vmem>>, vector<1x8x128xf32>,
    %c4_i32 = arith.constant 4 : i32
    %288 = vector.broadcast %c4_i32 : i32 to vector<8x1xi32>
    %289 = arith.cmpi sgt, %0, %288 : vector<8x1xi32>
    %290 = arith.extui %289 : vector<8x1xi1> to vector<8x1xi32>
    %291 = arith.sitofp %290 : vector<8x1xi32> to vector<8x1xf32>
    %292 = vector.extract_strided_slice %8 {offsets = [32, 512], sizes = [8, 512], strides = [1, 1]} : vector<64x1024xf32> to vector<8x512xf32>
    %cst_58 = arith.constant dense<0.000000e+00> : vector<8x512xf32>
    %293 = tpu.matmul %243, %10, %cst_58 {dimension_numbers = #tpu.dot_dimension_numbers<[1], [0], [0], [1], [0, 0, 1, 1], [], []>} : vector<8x128xf32>, vector<128x512xf32>, vector<8x512xf32> -> vector<8x512xf32>
    %294 = arith.addf %292, %293 : vector<8x512xf32>
    %295 = vector.extract_strided_slice %294 {offsets = [0, 0], sizes = [8, 128], strides = [1, 1]} : vector<8x512xf32> to vector<8x128xf32>
    %296 = arith.negf %295 : vector<8x128xf32>
    %297 = math.exp %296 : vector<8x128xf32>
    %cst_59 = arith.constant 1.000000e+00 : f32
    %298 = vector.broadcast %cst_59 : f32 to vector<8x128xf32>
    %299 = arith.addf %298, %297 : vector<8x128xf32>
    %300 = arith.divf %298, %299 : vector<8x128xf32>
    %301 = vector.extract_strided_slice %294 {offsets = [0, 128], sizes = [8, 128], strides = [1, 1]} : vector<8x512xf32> to vector<8x128xf32>
    %302 = arith.negf %301 : vector<8x128xf32>
    %303 = math.exp %302 : vector<8x128xf32>
    %cst_60 = arith.constant 1.000000e+00 : f32
    %304 = vector.broadcast %cst_60 : f32 to vector<8x128xf32>
    %305 = arith.addf %304, %303 : vector<8x128xf32>
    %306 = arith.divf %304, %305 : vector<8x128xf32>
    %307 = vector.extract_strided_slice %294 {offsets = [0, 256], sizes = [8, 128], strides = [1, 1]} : vector<8x512xf32> to vector<8x128xf32>
    %308 = math.tanh %307 : vector<8x128xf32>
    %309 = vector.extract_strided_slice %294 {offsets = [0, 384], sizes = [8, 128], strides = [1, 1]} : vector<8x512xf32> to vector<8x128xf32>
    %310 = arith.negf %309 : vector<8x128xf32>
    %311 = math.exp %310 : vector<8x128xf32>
    %cst_61 = arith.constant 1.000000e+00 : f32
    %312 = vector.broadcast %cst_61 : f32 to vector<8x128xf32>
    %313 = arith.addf %312, %311 : vector<8x128xf32>
    %314 = arith.divf %312, %313 : vector<8x128xf32>
    %315 = arith.mulf %306, %245 : vector<8x128xf32>
    %316 = arith.mulf %300, %308 : vector<8x128xf32>
    %317 = arith.addf %315, %316 : vector<8x128xf32>
    %318 = math.tanh %317 : vector<8x128xf32>
    %319 = arith.mulf %314, %318 : vector<8x128xf32>
    %320 = vector.broadcast %291 : vector<8x1xf32> to vector<8x128xf32>
    %321 = arith.mulf %319, %320 : vector<8x128xf32>
    %322 = vector.broadcast %291 : vector<8x1xf32> to vector<8x128xf32>
    %323 = arith.mulf %317, %322 : vector<8x128xf32>
    %c4 = arith.constant 4 : index
    %c0_62 = arith.constant 0 : index
    %c128_63 = arith.constant 128 : index
    %324 = vector.load %arg7[%c4, %c0_62, %c128_63] : memref<8x8x256xf32, #tpu.memory_space<vmem>>, vector<1x8x128xf32>
    %325 = vector.shape_cast %324 : vector<1x8x128xf32> to vector<8x128xf32>
    %326 = vector.shape_cast %321 : vector<8x128xf32> to vector<1x8x128xf32>
    tpu.vector_store %arg7[%c4, %c0_62, %c128_63], %326 {strides = array<i32>} : memref<8x8x256xf32, #tpu.memory_space<vmem>>, vector<1x8x128xf32>,
    %c4_i32_64 = arith.constant 4 : i32
    %327 = vector.broadcast %c4_i32_64 : i32 to vector<8x1xi32>
    %328 = arith.cmpi sgt, %0, %327 : vector<8x1xi32>
    %329 = arith.extui %328 : vector<8x1xi1> to vector<8x1xi32>
    %330 = arith.sitofp %329 : vector<8x1xi32> to vector<8x1xf32>
    %331 = vector.extract_strided_slice %8 {offsets = [32, 0], sizes = [8, 512], strides = [1, 1]} : vector<64x1024xf32> to vector<8x512xf32>
    %cst_65 = arith.constant dense<0.000000e+00> : vector<8x512xf32>
    %332 = tpu.matmul %282, %9, %cst_65 {dimension_numbers = #tpu.dot_dimension_numbers<[1], [0], [0], [1], [0, 0, 1, 1], [], []>} : vector<8x128xf32>, vector<128x512xf32>, vector<8x512xf32> -> vector<8x512xf32>
    %333 = arith.addf %331, %332 : vector<8x512xf32>
    %334 = vector.extract_strided_slice %333 {offsets = [0, 0], sizes = [8, 128], strides = [1, 1]} : vector<8x512xf32> to vector<8x128xf32>
    %335 = arith.negf %334 : vector<8x128xf32>
    %336 = math.exp %335 : vector<8x128xf32>
    %cst_66 = arith.constant 1.000000e+00 : f32
    %337 = vector.broadcast %cst_66 : f32 to vector<8x128xf32>
    %338 = arith.addf %337, %336 : vector<8x128xf32>
    %339 = arith.divf %337, %338 : vector<8x128xf32>
    %340 = vector.extract_strided_slice %333 {offsets = [0, 128], sizes = [8, 128], strides = [1, 1]} : vector<8x512xf32> to vector<8x128xf32>
    %341 = arith.negf %340 : vector<8x128xf32>
    %342 = math.exp %341 : vector<8x128xf32>
    %cst_67 = arith.constant 1.000000e+00 : f32
    %343 = vector.broadcast %cst_67 : f32 to vector<8x128xf32>
    %344 = arith.addf %343, %342 : vector<8x128xf32>
    %345 = arith.divf %343, %344 : vector<8x128xf32>
    %346 = vector.extract_strided_slice %333 {offsets = [0, 256], sizes = [8, 128], strides = [1, 1]} : vector<8x512xf32> to vector<8x128xf32>
    %347 = math.tanh %346 : vector<8x128xf32>
    %348 = vector.extract_strided_slice %333 {offsets = [0, 384], sizes = [8, 128], strides = [1, 1]} : vector<8x512xf32> to vector<8x128xf32>
    %349 = arith.negf %348 : vector<8x128xf32>
    %350 = math.exp %349 : vector<8x128xf32>
    %cst_68 = arith.constant 1.000000e+00 : f32
    %351 = vector.broadcast %cst_68 : f32 to vector<8x128xf32>
    %352 = arith.addf %351, %350 : vector<8x128xf32>
    %353 = arith.divf %351, %352 : vector<8x128xf32>
    %354 = arith.mulf %345, %284 : vector<8x128xf32>
    %355 = arith.mulf %339, %347 : vector<8x128xf32>
    %356 = arith.addf %354, %355 : vector<8x128xf32>
    %357 = math.tanh %356 : vector<8x128xf32>
    %358 = arith.mulf %353, %357 : vector<8x128xf32>
    %359 = vector.broadcast %330 : vector<8x1xf32> to vector<8x128xf32>
    %360 = arith.mulf %358, %359 : vector<8x128xf32>
    %361 = vector.broadcast %330 : vector<8x1xf32> to vector<8x128xf32>
    %362 = arith.mulf %356, %361 : vector<8x128xf32>
    %c4_69 = arith.constant 4 : index
    %c0_70 = arith.constant 0 : index
    %c0_71 = arith.constant 0 : index
    %363 = vector.load %arg7[%c4_69, %c0_70, %c0_71] : memref<8x8x256xf32, #tpu.memory_space<vmem>>, vector<1x8x128xf32>
    %364 = vector.shape_cast %363 : vector<1x8x128xf32> to vector<8x128xf32>
    %365 = vector.shape_cast %360 : vector<8x128xf32> to vector<1x8x128xf32>
    tpu.vector_store %arg7[%c4_69, %c0_70, %c0_71], %365 {strides = array<i32>} : memref<8x8x256xf32, #tpu.memory_space<vmem>>, vector<1x8x128xf32>,
    %c3_i32_72 = arith.constant 3 : i32
    %366 = vector.broadcast %c3_i32_72 : i32 to vector<8x1xi32>
    %367 = arith.cmpi sgt, %0, %366 : vector<8x1xi32>
    %368 = arith.extui %367 : vector<8x1xi1> to vector<8x1xi32>
    %369 = arith.sitofp %368 : vector<8x1xi32> to vector<8x1xf32>
    %370 = vector.extract_strided_slice %8 {offsets = [24, 512], sizes = [8, 512], strides = [1, 1]} : vector<64x1024xf32> to vector<8x512xf32>
    %cst_73 = arith.constant dense<0.000000e+00> : vector<8x512xf32>
    %371 = tpu.matmul %321, %10, %cst_73 {dimension_numbers = #tpu.dot_dimension_numbers<[1], [0], [0], [1], [0, 0, 1, 1], [], []>} : vector<8x128xf32>, vector<128x512xf32>, vector<8x512xf32> -> vector<8x512xf32>
    %372 = arith.addf %370, %371 : vector<8x512xf32>
    %373 = vector.extract_strided_slice %372 {offsets = [0, 0], sizes = [8, 128], strides = [1, 1]} : vector<8x512xf32> to vector<8x128xf32>
    %374 = arith.negf %373 : vector<8x128xf32>
    %375 = math.exp %374 : vector<8x128xf32>
    %cst_74 = arith.constant 1.000000e+00 : f32
    %376 = vector.broadcast %cst_74 : f32 to vector<8x128xf32>
    %377 = arith.addf %376, %375 : vector<8x128xf32>
    %378 = arith.divf %376, %377 : vector<8x128xf32>
    %379 = vector.extract_strided_slice %372 {offsets = [0, 128], sizes = [8, 128], strides = [1, 1]} : vector<8x512xf32> to vector<8x128xf32>
    %380 = arith.negf %379 : vector<8x128xf32>
    %381 = math.exp %380 : vector<8x128xf32>
    %cst_75 = arith.constant 1.000000e+00 : f32
    %382 = vector.broadcast %cst_75 : f32 to vector<8x128xf32>
    %383 = arith.addf %382, %381 : vector<8x128xf32>
    %384 = arith.divf %382, %383 : vector<8x128xf32>
    %385 = vector.extract_strided_slice %372 {offsets = [0, 256], sizes = [8, 128], strides = [1, 1]} : vector<8x512xf32> to vector<8x128xf32>
    %386 = math.tanh %385 : vector<8x128xf32>
    %387 = vector.extract_strided_slice %372 {offsets = [0, 384], sizes = [8, 128], strides = [1, 1]} : vector<8x512xf32> to vector<8x128xf32>
    %388 = arith.negf %387 : vector<8x128xf32>
    %389 = math.exp %388 : vector<8x128xf32>
    %cst_76 = arith.constant 1.000000e+00 : f32
    %390 = vector.broadcast %cst_76 : f32 to vector<8x128xf32>
    %391 = arith.addf %390, %389 : vector<8x128xf32>
    %392 = arith.divf %390, %391 : vector<8x128xf32>
    %393 = arith.mulf %384, %323 : vector<8x128xf32>
    %394 = arith.mulf %378, %386 : vector<8x128xf32>
    %395 = arith.addf %393, %394 : vector<8x128xf32>
    %396 = math.tanh %395 : vector<8x128xf32>
    %397 = arith.mulf %392, %396 : vector<8x128xf32>
    %398 = vector.broadcast %369 : vector<8x1xf32> to vector<8x128xf32>
    %399 = arith.mulf %397, %398 : vector<8x128xf32>
    %400 = vector.broadcast %369 : vector<8x1xf32> to vector<8x128xf32>
    %401 = arith.mulf %395, %400 : vector<8x128xf32>
    %c3_77 = arith.constant 3 : index
    %c0_78 = arith.constant 0 : index
    %c128_79 = arith.constant 128 : index
    %402 = vector.load %arg7[%c3_77, %c0_78, %c128_79] : memref<8x8x256xf32, #tpu.memory_space<vmem>>, vector<1x8x128xf32>
    %403 = vector.shape_cast %402 : vector<1x8x128xf32> to vector<8x128xf32>
    %404 = vector.shape_cast %399 : vector<8x128xf32> to vector<1x8x128xf32>
    tpu.vector_store %arg7[%c3_77, %c0_78, %c128_79], %404 {strides = array<i32>} : memref<8x8x256xf32, #tpu.memory_space<vmem>>, vector<1x8x128xf32>,
    %c5_i32_80 = arith.constant 5 : i32
    %405 = vector.broadcast %c5_i32_80 : i32 to vector<8x1xi32>
    %406 = arith.cmpi sgt, %0, %405 : vector<8x1xi32>
    %407 = arith.extui %406 : vector<8x1xi1> to vector<8x1xi32>
    %408 = arith.sitofp %407 : vector<8x1xi32> to vector<8x1xf32>
    %409 = vector.extract_strided_slice %8 {offsets = [40, 0], sizes = [8, 512], strides = [1, 1]} : vector<64x1024xf32> to vector<8x512xf32>
    %cst_81 = arith.constant dense<0.000000e+00> : vector<8x512xf32>
    %410 = tpu.matmul %360, %9, %cst_81 {dimension_numbers = #tpu.dot_dimension_numbers<[1], [0], [0], [1], [0, 0, 1, 1], [], []>} : vector<8x128xf32>, vector<128x512xf32>, vector<8x512xf32> -> vector<8x512xf32>
    %411 = arith.addf %409, %410 : vector<8x512xf32>
    %412 = vector.extract_strided_slice %411 {offsets = [0, 0], sizes = [8, 128], strides = [1, 1]} : vector<8x512xf32> to vector<8x128xf32>
    %413 = arith.negf %412 : vector<8x128xf32>
    %414 = math.exp %413 : vector<8x128xf32>
    %cst_82 = arith.constant 1.000000e+00 : f32
    %415 = vector.broadcast %cst_82 : f32 to vector<8x128xf32>
    %416 = arith.addf %415, %414 : vector<8x128xf32>
    %417 = arith.divf %415, %416 : vector<8x128xf32>
    %418 = vector.extract_strided_slice %411 {offsets = [0, 128], sizes = [8, 128], strides = [1, 1]} : vector<8x512xf32> to vector<8x128xf32>
    %419 = arith.negf %418 : vector<8x128xf32>
    %420 = math.exp %419 : vector<8x128xf32>
    %cst_83 = arith.constant 1.000000e+00 : f32
    %421 = vector.broadcast %cst_83 : f32 to vector<8x128xf32>
    %422 = arith.addf %421, %420 : vector<8x128xf32>
    %423 = arith.divf %421, %422 : vector<8x128xf32>
    %424 = vector.extract_strided_slice %411 {offsets = [0, 256], sizes = [8, 128], strides = [1, 1]} : vector<8x512xf32> to vector<8x128xf32>
    %425 = math.tanh %424 : vector<8x128xf32>
    %426 = vector.extract_strided_slice %411 {offsets = [0, 384], sizes = [8, 128], strides = [1, 1]} : vector<8x512xf32> to vector<8x128xf32>
    %427 = arith.negf %426 : vector<8x128xf32>
    %428 = math.exp %427 : vector<8x128xf32>
    %cst_84 = arith.constant 1.000000e+00 : f32
    %429 = vector.broadcast %cst_84 : f32 to vector<8x128xf32>
    %430 = arith.addf %429, %428 : vector<8x128xf32>
    %431 = arith.divf %429, %430 : vector<8x128xf32>
    %432 = arith.mulf %423, %362 : vector<8x128xf32>
    %433 = arith.mulf %417, %425 : vector<8x128xf32>
    %434 = arith.addf %432, %433 : vector<8x128xf32>
    %435 = math.tanh %434 : vector<8x128xf32>
    %436 = arith.mulf %431, %435 : vector<8x128xf32>
    %437 = vector.broadcast %408 : vector<8x1xf32> to vector<8x128xf32>
    %438 = arith.mulf %436, %437 : vector<8x128xf32>
    %439 = vector.broadcast %408 : vector<8x1xf32> to vector<8x128xf32>
    %440 = arith.mulf %434, %439 : vector<8x128xf32>
    %c5_85 = arith.constant 5 : index
    %c0_86 = arith.constant 0 : index
    %c0_87 = arith.constant 0 : index
    %441 = vector.load %arg7[%c5_85, %c0_86, %c0_87] : memref<8x8x256xf32, #tpu.memory_space<vmem>>, vector<1x8x128xf32>
    %442 = vector.shape_cast %441 : vector<1x8x128xf32> to vector<8x128xf32>
    %443 = vector.shape_cast %438 : vector<8x128xf32> to vector<1x8x128xf32>
    tpu.vector_store %arg7[%c5_85, %c0_86, %c0_87], %443 {strides = array<i32>} : memref<8x8x256xf32, #tpu.memory_space<vmem>>, vector<1x8x128xf32>,
    %c2_i32_88 = arith.constant 2 : i32
    %444 = vector.broadcast %c2_i32_88 : i32 to vector<8x1xi32>
    %445 = arith.cmpi sgt, %0, %444 : vector<8x1xi32>
    %446 = arith.extui %445 : vector<8x1xi1> to vector<8x1xi32>
    %447 = arith.sitofp %446 : vector<8x1xi32> to vector<8x1xf32>
    %448 = vector.extract_strided_slice %8 {offsets = [16, 512], sizes = [8, 512], strides = [1, 1]} : vector<64x1024xf32> to vector<8x512xf32>
    %cst_89 = arith.constant dense<0.000000e+00> : vector<8x512xf32>
    %449 = tpu.matmul %399, %10, %cst_89 {dimension_numbers = #tpu.dot_dimension_numbers<[1], [0], [0], [1], [0, 0, 1, 1], [], []>} : vector<8x128xf32>, vector<128x512xf32>, vector<8x512xf32> -> vector<8x512xf32>
    %450 = arith.addf %448, %449 : vector<8x512xf32>
    %451 = vector.extract_strided_slice %450 {offsets = [0, 0], sizes = [8, 128], strides = [1, 1]} : vector<8x512xf32> to vector<8x128xf32>
    %452 = arith.negf %451 : vector<8x128xf32>
    %453 = math.exp %452 : vector<8x128xf32>
    %cst_90 = arith.constant 1.000000e+00 : f32
    %454 = vector.broadcast %cst_90 : f32 to vector<8x128xf32>
    %455 = arith.addf %454, %453 : vector<8x128xf32>
    %456 = arith.divf %454, %455 : vector<8x128xf32>
    %457 = vector.extract_strided_slice %450 {offsets = [0, 128], sizes = [8, 128], strides = [1, 1]} : vector<8x512xf32> to vector<8x128xf32>
    %458 = arith.negf %457 : vector<8x128xf32>
    %459 = math.exp %458 : vector<8x128xf32>
    %cst_91 = arith.constant 1.000000e+00 : f32
    %460 = vector.broadcast %cst_91 : f32 to vector<8x128xf32>
    %461 = arith.addf %460, %459 : vector<8x128xf32>
    %462 = arith.divf %460, %461 : vector<8x128xf32>
    %463 = vector.extract_strided_slice %450 {offsets = [0, 256], sizes = [8, 128], strides = [1, 1]} : vector<8x512xf32> to vector<8x128xf32>
    %464 = math.tanh %463 : vector<8x128xf32>
    %465 = vector.extract_strided_slice %450 {offsets = [0, 384], sizes = [8, 128], strides = [1, 1]} : vector<8x512xf32> to vector<8x128xf32>
    %466 = arith.negf %465 : vector<8x128xf32>
    %467 = math.exp %466 : vector<8x128xf32>
    %cst_92 = arith.constant 1.000000e+00 : f32
    %468 = vector.broadcast %cst_92 : f32 to vector<8x128xf32>
    %469 = arith.addf %468, %467 : vector<8x128xf32>
    %470 = arith.divf %468, %469 : vector<8x128xf32>
    %471 = arith.mulf %462, %401 : vector<8x128xf32>
    %472 = arith.mulf %456, %464 : vector<8x128xf32>
    %473 = arith.addf %471, %472 : vector<8x128xf32>
    %474 = math.tanh %473 : vector<8x128xf32>
    %475 = arith.mulf %470, %474 : vector<8x128xf32>
    %476 = vector.broadcast %447 : vector<8x1xf32> to vector<8x128xf32>
    %477 = arith.mulf %475, %476 : vector<8x128xf32>
    %478 = vector.broadcast %447 : vector<8x1xf32> to vector<8x128xf32>
    %479 = arith.mulf %473, %478 : vector<8x128xf32>
    %c2_93 = arith.constant 2 : index
    %c0_94 = arith.constant 0 : index
    %c128_95 = arith.constant 128 : index
    %480 = vector.load %arg7[%c2_93, %c0_94, %c128_95] : memref<8x8x256xf32, #tpu.memory_space<vmem>>, vector<1x8x128xf32>
    %481 = vector.shape_cast %480 : vector<1x8x128xf32> to vector<8x128xf32>
    %482 = vector.shape_cast %477 : vector<8x128xf32> to vector<1x8x128xf32>
    tpu.vector_store %arg7[%c2_93, %c0_94, %c128_95], %482 {strides = array<i32>} : memref<8x8x256xf32, #tpu.memory_space<vmem>>, vector<1x8x128xf32>,
    %c6_i32_96 = arith.constant 6 : i32
    %483 = vector.broadcast %c6_i32_96 : i32 to vector<8x1xi32>
    %484 = arith.cmpi sgt, %0, %483 : vector<8x1xi32>
    %485 = arith.extui %484 : vector<8x1xi1> to vector<8x1xi32>
    %486 = arith.sitofp %485 : vector<8x1xi32> to vector<8x1xf32>
    %487 = vector.extract_strided_slice %8 {offsets = [48, 0], sizes = [8, 512], strides = [1, 1]} : vector<64x1024xf32> to vector<8x512xf32>
    %cst_97 = arith.constant dense<0.000000e+00> : vector<8x512xf32>
    %488 = tpu.matmul %438, %9, %cst_97 {dimension_numbers = #tpu.dot_dimension_numbers<[1], [0], [0], [1], [0, 0, 1, 1], [], []>} : vector<8x128xf32>, vector<128x512xf32>, vector<8x512xf32> -> vector<8x512xf32>
    %489 = arith.addf %487, %488 : vector<8x512xf32>
    %490 = vector.extract_strided_slice %489 {offsets = [0, 0], sizes = [8, 128], strides = [1, 1]} : vector<8x512xf32> to vector<8x128xf32>
    %491 = arith.negf %490 : vector<8x128xf32>
    %492 = math.exp %491 : vector<8x128xf32>
    %cst_98 = arith.constant 1.000000e+00 : f32
    %493 = vector.broadcast %cst_98 : f32 to vector<8x128xf32>
    %494 = arith.addf %493, %492 : vector<8x128xf32>
    %495 = arith.divf %493, %494 : vector<8x128xf32>
    %496 = vector.extract_strided_slice %489 {offsets = [0, 128], sizes = [8, 128], strides = [1, 1]} : vector<8x512xf32> to vector<8x128xf32>
    %497 = arith.negf %496 : vector<8x128xf32>
    %498 = math.exp %497 : vector<8x128xf32>
    %cst_99 = arith.constant 1.000000e+00 : f32
    %499 = vector.broadcast %cst_99 : f32 to vector<8x128xf32>
    %500 = arith.addf %499, %498 : vector<8x128xf32>
    %501 = arith.divf %499, %500 : vector<8x128xf32>
    %502 = vector.extract_strided_slice %489 {offsets = [0, 256], sizes = [8, 128], strides = [1, 1]} : vector<8x512xf32> to vector<8x128xf32>
    %503 = math.tanh %502 : vector<8x128xf32>
    %504 = vector.extract_strided_slice %489 {offsets = [0, 384], sizes = [8, 128], strides = [1, 1]} : vector<8x512xf32> to vector<8x128xf32>
    %505 = arith.negf %504 : vector<8x128xf32>
    %506 = math.exp %505 : vector<8x128xf32>
    %cst_100 = arith.constant 1.000000e+00 : f32
    %507 = vector.broadcast %cst_100 : f32 to vector<8x128xf32>
    %508 = arith.addf %507, %506 : vector<8x128xf32>
    %509 = arith.divf %507, %508 : vector<8x128xf32>
    %510 = arith.mulf %501, %440 : vector<8x128xf32>
    %511 = arith.mulf %495, %503 : vector<8x128xf32>
    %512 = arith.addf %510, %511 : vector<8x128xf32>
    %513 = math.tanh %512 : vector<8x128xf32>
    %514 = arith.mulf %509, %513 : vector<8x128xf32>
    %515 = vector.broadcast %486 : vector<8x1xf32> to vector<8x128xf32>
    %516 = arith.mulf %514, %515 : vector<8x128xf32>
    %517 = vector.broadcast %486 : vector<8x1xf32> to vector<8x128xf32>
    %518 = arith.mulf %512, %517 : vector<8x128xf32>
    %c6_101 = arith.constant 6 : index
    %c0_102 = arith.constant 0 : index
    %c0_103 = arith.constant 0 : index
    %519 = vector.load %arg7[%c6_101, %c0_102, %c0_103] : memref<8x8x256xf32, #tpu.memory_space<vmem>>, vector<1x8x128xf32>
    %520 = vector.shape_cast %519 : vector<1x8x128xf32> to vector<8x128xf32>
    %521 = vector.shape_cast %516 : vector<8x128xf32> to vector<1x8x128xf32>
    tpu.vector_store %arg7[%c6_101, %c0_102, %c0_103], %521 {strides = array<i32>} : memref<8x8x256xf32, #tpu.memory_space<vmem>>, vector<1x8x128xf32>,
    %c1_i32_104 = arith.constant 1 : i32
    %522 = vector.broadcast %c1_i32_104 : i32 to vector<8x1xi32>
    %523 = arith.cmpi sgt, %0, %522 : vector<8x1xi32>
    %524 = arith.extui %523 : vector<8x1xi1> to vector<8x1xi32>
    %525 = arith.sitofp %524 : vector<8x1xi32> to vector<8x1xf32>
    %526 = vector.extract_strided_slice %8 {offsets = [8, 512], sizes = [8, 512], strides = [1, 1]} : vector<64x1024xf32> to vector<8x512xf32>
    %cst_105 = arith.constant dense<0.000000e+00> : vector<8x512xf32>
    %527 = tpu.matmul %477, %10, %cst_105 {dimension_numbers = #tpu.dot_dimension_numbers<[1], [0], [0], [1], [0, 0, 1, 1], [], []>} : vector<8x128xf32>, vector<128x512xf32>, vector<8x512xf32> -> vector<8x512xf32>
    %528 = arith.addf %526, %527 : vector<8x512xf32>
    %529 = vector.extract_strided_slice %528 {offsets = [0, 0], sizes = [8, 128], strides = [1, 1]} : vector<8x512xf32> to vector<8x128xf32>
    %530 = arith.negf %529 : vector<8x128xf32>
    %531 = math.exp %530 : vector<8x128xf32>
    %cst_106 = arith.constant 1.000000e+00 : f32
    %532 = vector.broadcast %cst_106 : f32 to vector<8x128xf32>
    %533 = arith.addf %532, %531 : vector<8x128xf32>
    %534 = arith.divf %532, %533 : vector<8x128xf32>
    %535 = vector.extract_strided_slice %528 {offsets = [0, 128], sizes = [8, 128], strides = [1, 1]} : vector<8x512xf32> to vector<8x128xf32>
    %536 = arith.negf %535 : vector<8x128xf32>
    %537 = math.exp %536 : vector<8x128xf32>
    %cst_107 = arith.constant 1.000000e+00 : f32
    %538 = vector.broadcast %cst_107 : f32 to vector<8x128xf32>
    %539 = arith.addf %538, %537 : vector<8x128xf32>
    %540 = arith.divf %538, %539 : vector<8x128xf32>
    %541 = vector.extract_strided_slice %528 {offsets = [0, 256], sizes = [8, 128], strides = [1, 1]} : vector<8x512xf32> to vector<8x128xf32>
    %542 = math.tanh %541 : vector<8x128xf32>
    %543 = vector.extract_strided_slice %528 {offsets = [0, 384], sizes = [8, 128], strides = [1, 1]} : vector<8x512xf32> to vector<8x128xf32>
    %544 = arith.negf %543 : vector<8x128xf32>
    %545 = math.exp %544 : vector<8x128xf32>
    %cst_108 = arith.constant 1.000000e+00 : f32
    %546 = vector.broadcast %cst_108 : f32 to vector<8x128xf32>
    %547 = arith.addf %546, %545 : vector<8x128xf32>
    %548 = arith.divf %546, %547 : vector<8x128xf32>
    %549 = arith.mulf %540, %479 : vector<8x128xf32>
    %550 = arith.mulf %534, %542 : vector<8x128xf32>
    %551 = arith.addf %549, %550 : vector<8x128xf32>
    %552 = math.tanh %551 : vector<8x128xf32>
    %553 = arith.mulf %548, %552 : vector<8x128xf32>
    %554 = vector.broadcast %525 : vector<8x1xf32> to vector<8x128xf32>
    %555 = arith.mulf %553, %554 : vector<8x128xf32>
    %556 = vector.broadcast %525 : vector<8x1xf32> to vector<8x128xf32>
    %557 = arith.mulf %551, %556 : vector<8x128xf32>
    %c1_109 = arith.constant 1 : index
    %c0_110 = arith.constant 0 : index
    %c128_111 = arith.constant 128 : index
    %558 = vector.load %arg7[%c1_109, %c0_110, %c128_111] : memref<8x8x256xf32, #tpu.memory_space<vmem>>, vector<1x8x128xf32>
    %559 = vector.shape_cast %558 : vector<1x8x128xf32> to vector<8x128xf32>
    %560 = vector.shape_cast %555 : vector<8x128xf32> to vector<1x8x128xf32>
    tpu.vector_store %arg7[%c1_109, %c0_110, %c128_111], %560 {strides = array<i32>} : memref<8x8x256xf32, #tpu.memory_space<vmem>>, vector<1x8x128xf32>,
    %c7_i32_112 = arith.constant 7 : i32
    %561 = vector.broadcast %c7_i32_112 : i32 to vector<8x1xi32>
    %562 = arith.cmpi sgt, %0, %561 : vector<8x1xi32>
    %563 = arith.extui %562 : vector<8x1xi1> to vector<8x1xi32>
    %564 = arith.sitofp %563 : vector<8x1xi32> to vector<8x1xf32>
    %565 = vector.extract_strided_slice %8 {offsets = [56, 0], sizes = [8, 512], strides = [1, 1]} : vector<64x1024xf32> to vector<8x512xf32>
    %cst_113 = arith.constant dense<0.000000e+00> : vector<8x512xf32>
    %566 = tpu.matmul %516, %9, %cst_113 {dimension_numbers = #tpu.dot_dimension_numbers<[1], [0], [0], [1], [0, 0, 1, 1], [], []>} : vector<8x128xf32>, vector<128x512xf32>, vector<8x512xf32> -> vector<8x512xf32>
    %567 = arith.addf %565, %566 : vector<8x512xf32>
    %568 = vector.extract_strided_slice %567 {offsets = [0, 0], sizes = [8, 128], strides = [1, 1]} : vector<8x512xf32> to vector<8x128xf32>
    %569 = arith.negf %568 : vector<8x128xf32>
    %570 = math.exp %569 : vector<8x128xf32>
    %cst_114 = arith.constant 1.000000e+00 : f32
    %571 = vector.broadcast %cst_114 : f32 to vector<8x128xf32>
    %572 = arith.addf %571, %570 : vector<8x128xf32>
    %573 = arith.divf %571, %572 : vector<8x128xf32>
    %574 = vector.extract_strided_slice %567 {offsets = [0, 128], sizes = [8, 128], strides = [1, 1]} : vector<8x512xf32> to vector<8x128xf32>
    %575 = arith.negf %574 : vector<8x128xf32>
    %576 = math.exp %575 : vector<8x128xf32>
    %cst_115 = arith.constant 1.000000e+00 : f32
    %577 = vector.broadcast %cst_115 : f32 to vector<8x128xf32>
    %578 = arith.addf %577, %576 : vector<8x128xf32>
    %579 = arith.divf %577, %578 : vector<8x128xf32>
    %580 = vector.extract_strided_slice %567 {offsets = [0, 256], sizes = [8, 128], strides = [1, 1]} : vector<8x512xf32> to vector<8x128xf32>
    %581 = math.tanh %580 : vector<8x128xf32>
    %582 = vector.extract_strided_slice %567 {offsets = [0, 384], sizes = [8, 128], strides = [1, 1]} : vector<8x512xf32> to vector<8x128xf32>
    %583 = arith.negf %582 : vector<8x128xf32>
    %584 = math.exp %583 : vector<8x128xf32>
    %cst_116 = arith.constant 1.000000e+00 : f32
    %585 = vector.broadcast %cst_116 : f32 to vector<8x128xf32>
    %586 = arith.addf %585, %584 : vector<8x128xf32>
    %587 = arith.divf %585, %586 : vector<8x128xf32>
    %588 = arith.mulf %579, %518 : vector<8x128xf32>
    %589 = arith.mulf %573, %581 : vector<8x128xf32>
    %590 = arith.addf %588, %589 : vector<8x128xf32>
    %591 = math.tanh %590 : vector<8x128xf32>
    %592 = arith.mulf %587, %591 : vector<8x128xf32>
    %593 = vector.broadcast %564 : vector<8x1xf32> to vector<8x128xf32>
    %594 = arith.mulf %592, %593 : vector<8x128xf32>
    %c7_117 = arith.constant 7 : index
    %c0_118 = arith.constant 0 : index
    %c0_119 = arith.constant 0 : index
    %595 = vector.load %arg7[%c7_117, %c0_118, %c0_119] : memref<8x8x256xf32, #tpu.memory_space<vmem>>, vector<1x8x128xf32>
    %596 = vector.shape_cast %595 : vector<1x8x128xf32> to vector<8x128xf32>
    %597 = vector.shape_cast %594 : vector<8x128xf32> to vector<1x8x128xf32>
    tpu.vector_store %arg7[%c7_117, %c0_118, %c0_119], %597 {strides = array<i32>} : memref<8x8x256xf32, #tpu.memory_space<vmem>>, vector<1x8x128xf32>,
    %c0_i32_120 = arith.constant 0 : i32
    %598 = vector.broadcast %c0_i32_120 : i32 to vector<8x1xi32>
    %599 = arith.cmpi sgt, %0, %598 : vector<8x1xi32>
    %600 = arith.extui %599 : vector<8x1xi1> to vector<8x1xi32>
    %601 = arith.sitofp %600 : vector<8x1xi32> to vector<8x1xf32>
    %602 = vector.extract_strided_slice %8 {offsets = [0, 512], sizes = [8, 512], strides = [1, 1]} : vector<64x1024xf32> to vector<8x512xf32>
    %cst_121 = arith.constant dense<0.000000e+00> : vector<8x512xf32>
    %603 = tpu.matmul %555, %10, %cst_121 {dimension_numbers = #tpu.dot_dimension_numbers<[1], [0], [0], [1], [0, 0, 1, 1], [], []>} : vector<8x128xf32>, vector<128x512xf32>, vector<8x512xf32> -> vector<8x512xf32>
    %604 = arith.addf %602, %603 : vector<8x512xf32>
    %605 = vector.extract_strided_slice %604 {offsets = [0, 0], sizes = [8, 128], strides = [1, 1]} : vector<8x512xf32> to vector<8x128xf32>
    %606 = arith.negf %605 : vector<8x128xf32>
    %607 = math.exp %606 : vector<8x128xf32>
    %cst_122 = arith.constant 1.000000e+00 : f32
    %608 = vector.broadcast %cst_122 : f32 to vector<8x128xf32>
    %609 = arith.addf %608, %607 : vector<8x128xf32>
    %610 = arith.divf %608, %609 : vector<8x128xf32>
    %611 = vector.extract_strided_slice %604 {offsets = [0, 128], sizes = [8, 128], strides = [1, 1]} : vector<8x512xf32> to vector<8x128xf32>
    %612 = arith.negf %611 : vector<8x128xf32>
    %613 = math.exp %612 : vector<8x128xf32>
    %cst_123 = arith.constant 1.000000e+00 : f32
    %614 = vector.broadcast %cst_123 : f32 to vector<8x128xf32>
    %615 = arith.addf %614, %613 : vector<8x128xf32>
    %616 = arith.divf %614, %615 : vector<8x128xf32>
    %617 = vector.extract_strided_slice %604 {offsets = [0, 256], sizes = [8, 128], strides = [1, 1]} : vector<8x512xf32> to vector<8x128xf32>
    %618 = math.tanh %617 : vector<8x128xf32>
    %619 = vector.extract_strided_slice %604 {offsets = [0, 384], sizes = [8, 128], strides = [1, 1]} : vector<8x512xf32> to vector<8x128xf32>
    %620 = arith.negf %619 : vector<8x128xf32>
    %621 = math.exp %620 : vector<8x128xf32>
    %cst_124 = arith.constant 1.000000e+00 : f32
    %622 = vector.broadcast %cst_124 : f32 to vector<8x128xf32>
    %623 = arith.addf %622, %621 : vector<8x128xf32>
    %624 = arith.divf %622, %623 : vector<8x128xf32>
    %625 = arith.mulf %616, %557 : vector<8x128xf32>
    %626 = arith.mulf %610, %618 : vector<8x128xf32>
    %627 = arith.addf %625, %626 : vector<8x128xf32>
    %628 = math.tanh %627 : vector<8x128xf32>
    %629 = arith.mulf %624, %628 : vector<8x128xf32>
    %630 = vector.broadcast %601 : vector<8x1xf32> to vector<8x128xf32>
    %631 = arith.mulf %629, %630 : vector<8x128xf32>
    %c0_125 = arith.constant 0 : index
    %c0_126 = arith.constant 0 : index
    %c128_127 = arith.constant 128 : index
    %632 = vector.load %arg7[%c0_125, %c0_126, %c128_127] : memref<8x8x256xf32, #tpu.memory_space<vmem>>, vector<1x8x128xf32>
    %633 = vector.shape_cast %632 : vector<1x8x128xf32> to vector<8x128xf32>
    %634 = vector.shape_cast %631 : vector<8x128xf32> to vector<1x8x128xf32>
    tpu.vector_store %arg7[%c0_125, %c0_126, %c128_127], %634 {strides = array<i32>} : memref<8x8x256xf32, #tpu.memory_space<vmem>>, vector<1x8x128xf32>,
    return
  }
  func.func @transform_0(%arg0: i32) -> (i32, i32, i32) {
    %c0_i32 = arith.constant 0 : i32
    %c0_i32_0 = arith.constant 0 : i32
    %c0_i32_1 = arith.constant 0 : i32
    %c0_i32_2 = arith.constant 0 : i32
    return %c0_i32, %c0_i32_0, %c0_i32_1 : i32, i32, i32
  }
  func.func @transform_1(%arg0: i32) -> (i32, i32) {
    %c0_i32 = arith.constant 0 : i32
    %c0_i32_0 = arith.constant 0 : i32
    %c0_i32_1 = arith.constant 0 : i32
    return %c0_i32, %c0_i32_0 : i32, i32
  }
  func.func @transform_2(%arg0: i32) -> (i32, i32) {
    %c0_i32 = arith.constant 0 : i32
    %c0_i32_0 = arith.constant 0 : i32
    %c0_i32_1 = arith.constant 0 : i32
    return %c0_i32, %c0_i32_0 : i32, i32
  }
  func.func @transform_3(%arg0: i32) -> (i32, i32) {
    %c0_i32 = arith.constant 0 : i32
    %c0_i32_0 = arith.constant 0 : i32
    %c0_i32_1 = arith.constant 0 : i32
    return %c0_i32, %c0_i32_0 : i32, i32
  }
  func.func @transform_4(%arg0: i32) -> (i32, i32) {
    %c0_i32 = arith.constant 0 : i32
    %c0_i32_0 = arith.constant 0 : i32
    %c0_i32_1 = arith.constant 0 : i32
    return %c0_i32, %c0_i32_0 : i32, i32
  }
  func.func @transform_5(%arg0: i32) -> (i32, i32) {
    %c0_i32 = arith.constant 0 : i32
    %c0_i32_0 = arith.constant 0 : i32
    %c0_i32_1 = arith.constant 0 : i32
    return %c0_i32, %c0_i32_0 : i32, i32
  }
  func.func @transform_6(%arg0: i32) -> (i32, i32, i32) {
    %c0_i32 = arith.constant 0 : i32
    %c0_i32_0 = arith.constant 0 : i32
    %c0_i32_1 = arith.constant 0 : i32
    %c0_i32_2 = arith.constant 0 : i32
    return %c0_i32, %c0_i32_0, %c0_i32_1 : i32, i32, i32
  }
}

</mosaic_0001>

<bundles_post_ra>
// kernel: tpu_custom_call.1
= control target key start
LH: loop header
LB: loop body
LE: loop exit
PB: predicated region body
PF: predicated region fallthrough
CT: control target
= control target key end

     0   :  { %11 = vsyncpa [#allocation3], 0  ;;  %s6493_s0 = inlined_call_operand.hbm [shape: f32[8,8,128], index: 0, kind: input, shape index: {}]   ;;  %s6494_s1 = inlined_call_operand.vmem [shape: s32[8,1], index: 1, kind: input, shape index: {}]   ;;  %s6495_s2 = inlined_call_operand.hbm [shape: f32[128,1024], index: 2, kind: input, shape index: {}]   ;;  %s6496_s3 = inlined_call_operand.vmem [shape: f32[1,1024], index: 3, kind: input, shape index: {}]   ;;  %s6497_s4 = inlined_call_operand.hbm [shape: f32[128,512], index: 4, kind: input, shape index: {}]   ;;  %s6498_s5 = inlined_call_operand.hbm [shape: f32[128,512], index: 5, kind: input, shape index: {}]   ;;  %s6499_s6 = inlined_call_operand.hbm [shape: f32[8,8,256], index: 6, kind: output, shape index: {}]  }
   0x1   :  { %12 = vsyncpa [#allocation6], 0 }
   0x2   :  { %13 = vsyncpa [#allocation9], 0 }
   0x3   :  { %14 = vsyncpa [#allocation4], 0  ;;  %s5421_s21 = smov [#allocation5]   ;;  %s5303_s25 = scalar_lea.hbm %s6495_s2, 16384 }
   0x4   :  { %s34_s22 = sshll.u32 %s5421_s21, 4  ;;  %p5304_p0 = scmp.ne.s32.totalorder %s6495_s2, %s5303_s25  ;;  %s35_s22 = int_to_ptr.vmem [resolvable:$true] %s34_s22 }
   0x5   :  { %p5307_p1 = scmp.lt.u32.totalorder %s5303_s25, %s6495_s2 }
   0x7   :  { %p5309_p2 = pnand %p5307_p1, %p5304_p0 }
   0x9   :  { %5312 = shalt.err (!%p5309_p2)
}
   0xa   :  { %s5313_s30 = scalar_lea.vmem %s35_s22, 16384  ;;  %p5318_p4 = scmp.lt.s32.totalorder %s35_s22, %s35_s22 }
   0xb   :  { %p5314_p3 = scmp.ne.s32.totalorder %s35_s22, %s5313_s30  ;;  %p5319_p5 = scmp.lt.s32.totalorder %s5313_s30, %s5313_s30 }
   0xd   :  { %p5320_p6 = por %p5319_p5, %p5318_p4 }
   0xf   :  { %p5321_p7 = pnand %p5320_p6, %p5314_p3 }
  0x11   :  { %5324 = shalt.err (!%p5321_p7)
}
  0x12   :  { %s5422_s7 = smov 1024   ;;  %s5423_s8 = smov 64  }
  0x13   :  { %40 = dma.hbm_to_vmem [thread:$0]  %s6495_s2, 16384, %s35_s22, [#allocation6], %s5422_s7, %s5422_s7, %s5423_s8  }
  0x14   :  { %s5424_s11 = smov [#allocation2]   ;;  %s5325_s15 = scalar_lea.hbm %s6493_s0, 1024 }
  0x15   :  { %s20_s12 = sshll.u32 %s5424_s11, 4  ;;  %p5326_p8 = scmp.ne.s32.totalorder %s6493_s0, %s5325_s15  ;;  %s21_s12 = int_to_ptr.vmem [resolvable:$true] %s20_s12 }
  0x16   :  { %p5329_p9 = scmp.lt.u32.totalorder %s5325_s15, %s6493_s0 }
  0x18   :  { %p5331_p10 = pnand %p5329_p9, %p5326_p8 }
  0x1a   :  { %5334 = shalt.err (!%p5331_p10)
}
  0x1b   :  { %s5335_s20 = scalar_lea.vmem %s21_s12, 1024  ;;  %p5340_p12 = scmp.lt.s32.totalorder %s21_s12, %s21_s12 }
  0x1c   :  { %p5336_p11 = scmp.ne.s32.totalorder %s21_s12, %s5335_s20  ;;  %p5341_p13 = scmp.lt.s32.totalorder %s5335_s20, %s5335_s20 }
  0x1e   :  { %p5342_p0 = por %p5341_p13, %p5340_p12 }
  0x20   :  { %p5343_p1 = pnand %p5342_p0, %p5336_p11 }
  0x22   :  { %5346 = shalt.err (!%p5343_p1)
}
  0x23   :  { %s5425_s2 = smov 128   ;;  %s5426_s21 = smov 8  }
  0x24   :  { %26 = dma.hbm_to_vmem [thread:$0]  %s6493_s0, 1024, %s21_s12, [#allocation3], %s5425_s2, %s5425_s2, %s5426_s21  }
  0x25   :  { %s5427_s24 = smov [#allocation7]   ;;  %s5347_s28 = scalar_lea.hbm %s6497_s4, 8192 }
  0x26   :  { %s48_s25 = sshll.u32 %s5427_s24, 4  ;;  %p5348_p2 = scmp.ne.s32.totalorder %s6497_s4, %s5347_s28  ;;  %s49_s25 = int_to_ptr.vmem [resolvable:$true] %s48_s25 }
  0x27   :  { %p5351_p3 = scmp.lt.u32.totalorder %s5347_s28, %s6497_s4 }
  0x29   :  { %p5353_p4 = pnand %p5351_p3, %p5348_p2 }
  0x2b   :  { %5356 = shalt.err (!%p5353_p4)
}
  0x2c   :  { %s5357_s9 = scalar_lea.vmem %s49_s25, 8192  ;;  %p5362_p6 = scmp.lt.s32.totalorder %s49_s25, %s49_s25 }
  0x2d   :  { %p5358_p5 = scmp.ne.s32.totalorder %s49_s25, %s5357_s9  ;;  %p5363_p7 = scmp.lt.s32.totalorder %s5357_s9, %s5357_s9 }
  0x2f   :  { %p5364_p8 = por %p5363_p7, %p5362_p6 }
  0x31   :  { %p5365_p9 = pnand %p5364_p8, %p5358_p5 }
  0x33   :  { %5368 = shalt.err (!%p5365_p9)
}
  0x34   :  { %s5428_s0 = smov 512   ;;  %s5429_s10 = smov 32  }
  0x35   :  { %54 = dma.hbm_to_vmem [thread:$0]  %s6497_s4, 8192, %s49_s25, [#allocation6], %s5428_s0, %s5428_s0, %s5429_s10  }
  0x36   :  { %s5430_s13 = smov [#allocation8]   ;;  %s5369_s17 = scalar_lea.hbm %s6498_s5, 8192 }
  0x37   :  { %s60_s14 = sshll.u32 %s5430_s13, 4  ;;  %p5370_p10 = scmp.ne.s32.totalorder %s6498_s5, %s5369_s17  ;;  %s61_s14 = int_to_ptr.vmem [resolvable:$true] %s60_s14 }
  0x38   :  { %p5373_p11 = scmp.lt.u32.totalorder %s5369_s17, %s6498_s5 }
  0x3a   :  { %p5375_p12 = pnand %p5373_p11, %p5370_p10 }
  0x3c   :  { %5378 = shalt.err (!%p5375_p12)
}
  0x3d   :  { %s5379_s21 = scalar_lea.vmem %s61_s14, 8192  ;;  %p5384_p0 = scmp.lt.s32.totalorder %s61_s14, %s61_s14 }
  0x3e   :  { %p5380_p13 = scmp.ne.s32.totalorder %s61_s14, %s5379_s21  ;;  %p5385_p1 = scmp.lt.s32.totalorder %s5379_s21, %s5379_s21 }
  0x40   :  { %p5386_p2 = por %p5385_p1, %p5384_p0 }
  0x42   :  { %p5387_p3 = pnand %p5386_p2, %p5380_p13 }
  0x44   :  { %5390 = shalt.err (!%p5387_p3)
}
  0x45   :  { %66 = dma.hbm_to_vmem [thread:$0]  %s6498_s5, 8192, %s61_s14, [#allocation9], %s5428_s0, %s5428_s0, %s5429_s10  }
  0x46   :  { %5413 = dma.done.wait [#allocation3], 1024  }
  0x47   :  { %5414 = vsyncadd [#allocation3], 4294966272 }
  0x48   :  { %5415 = dma.done.wait [#allocation6], 24576  }
  0x49   :  { %5416 = vsyncadd [#allocation6], 4294942720 }
  0x4a   :  { %5417 = dma.done.wait [#allocation9], 8192  }
  0x4b   :  { %5418 = vsyncadd [#allocation9], 4294959104  ;;  %v6500_v0 = vmov 0.0   ;;  %v89_v1 = vld [vmem:[#allocation5 + $0x8] sm:$0xff]  ;;  %v91_v3 = vld [vmem:[#allocation5 + $0x18] sm:$0xff]  ;;  %v5432_v26 = vmov 0  }
  0x4c   :  { %322 = vmatprep.mubr.f32.mxu0 %v6500_v0  ;;  %435 = vmatprep.mubr.f32.mxu1 %v6500_v0  ;;  %v97_v2 = vld [vmem:[#allocation5 + $0x48] sm:$0xff]  ;;  %v99_v5 = vld [vmem:[#allocation5 + $0x58] sm:$0xff]  ;;  %v88_v6 = vld [vmem:[#allocation5] sm:$0xff] }
  0x4d   :  { %v3750_v4 = vpack.c.bf16 %v97_v2, %v89_v1  ;;  %v96_v7 = vld [vmem:[#allocation5 + $0x40] sm:$0xff]  ;;  %v3782_v8 = vpack.c.bf16 %v99_v5, %v91_v3  ;;  %v90_v10 = vld [vmem:[#allocation5 + $0x10] sm:$0xff]  ;;  %v105_v12 = vld [vmem:[#allocation5 + $0x88] sm:$0xff]  ;;  %5045 = vset.pattern.permute.xlu0 %v5432_v26  ;;  %5046 = vset.pattern.permute.xlu1 %v5432_v26 }
  0x4e   :  { %v3752_v9 = vpack.c.bf16 %v96_v7, %v88_v6  ;;  %v98_v11 = vld [vmem:[#allocation5 + $0x50] sm:$0xff]  ;;  %v113_v14 = vld [vmem:[#allocation5 + $0xc8] sm:$0xff]  ;;  %v107_v15 = vld [vmem:[#allocation5 + $0x98] sm:$0xff] }
  0x4f   :  { %3751 = vmatprep.subr.bf16.mxu0 %v3750_v4  ;;  %v3784_v13 = vpack.c.bf16 %v98_v11, %v90_v10  ;;  %v115_v16 = vld [vmem:[#allocation5 + $0xd8] sm:$0xff]  ;;  %3783 = vmatprep.subr.bf16.mxu1 %v3782_v8  ;;  %v3754_v17 = vpack.c.bf16 %v113_v14, %v105_v12  ;;  %v104_v19 = vld [vmem:[#allocation5 + $0x80] sm:$0xff]  ;;  %v106_v21 = vld [vmem:[#allocation5 + $0x90] sm:$0xff] }
  0x50   :  { %3753 = vmatpush1.bf16.msra.mxu0 %v3752_v9  ;;  %v3786_v18 = vpack.c.bf16 %v115_v16, %v107_v15  ;;  %v112_v20 = vld [vmem:[#allocation5 + $0xc0] sm:$0xff]  ;;  %v114_v23 = vld [vmem:[#allocation5 + $0xd0] sm:$0xff]  ;;  %v121_v24 = vld [vmem:[#allocation5 + $0x108] sm:$0xff] }
  0x51   :  { %3785 = vmatpush1.bf16.msra.mxu1 %v3784_v13  ;;  %v3756_v22 = vpack.c.bf16 %v112_v20, %v104_v19  ;;  %v129_v25 = vld [vmem:[#allocation5 + $0x148] sm:$0xff]  ;;  %3755 = vmatprep.subr.bf16.mxu0 %v3754_v17  ;;  %v3788_v27 = vpack.c.bf16 %v114_v23, %v106_v21  ;;  %v123_v29 = vld [vmem:[#allocation5 + $0x118] sm:$0xff]  ;;  %v120_v31 = vld [vmem:[#allocation5 + $0x100] sm:$0xff] }
  0x52   :  { %3787 = vmatprep.subr.bf16.mxu1 %v3786_v18  ;;  %v3758_v28 = vpack.c.bf16 %v129_v25, %v121_v24  ;;  %v131_v30 = vld [vmem:[#allocation5 + $0x158] sm:$0xff]  ;;  %v128_v33 = vld [vmem:[#allocation5 + $0x140] sm:$0xff]  ;;  %v122_v34 = vld [vmem:[#allocation5 + $0x110] sm:$0xff] }
  0x53   :  { %v3790_v32 = vpack.c.bf16 %v131_v30, %v123_v29  ;;  %v130_v35 = vld [vmem:[#allocation5 + $0x150] sm:$0xff]  ;;  %v3760_v36 = vpack.c.bf16 %v128_v33, %v120_v31  ;;  %v137_v37 = vld [vmem:[#allocation5 + $0x188] sm:$0xff]  ;;  %v139_v39 = vld [vmem:[#allocation5 + $0x198] sm:$0xff] }
  0x54   :  { %3757 = vmatpush1.bf16.msra.mxu0 %v3756_v22  ;;  %v145_v38 = vld [vmem:[#allocation5 + $0x1c8] sm:$0xff]  ;;  %v3792_v40 = vpack.c.bf16 %v130_v35, %v122_v34  ;;  %v147_v42 = vld [vmem:[#allocation5 + $0x1d8] sm:$0xff]  ;;  %v136_v43 = vld [vmem:[#allocation5 + $0x180] sm:$0xff] }
  0x55   :  { %3789 = vmatpush1.bf16.msra.mxu1 %v3788_v27  ;;  %3759 = vmatprep.subr.bf16.mxu0 %v3758_v28  ;;  %v3762_v41 = vpack.c.bf16 %v145_v38, %v137_v37  ;;  %v144_v44 = vld [vmem:[#allocation5 + $0x1c0] sm:$0xff]  ;;  %v3794_v45 = vpack.c.bf16 %v147_v42, %v139_v39  ;;  %v138_v46 = vld [vmem:[#allocation5 + $0x190] sm:$0xff]  ;;  %v153_v48 = vld [vmem:[#allocation5 + $0x208] sm:$0xff] }
  0x56   :  { %3791 = vmatprep.subr.bf16.mxu1 %v3790_v32  ;;  %v146_v47 = vld [vmem:[#allocation5 + $0x1d0] sm:$0xff]  ;;  %v161_v49 = vld [vmem:[#allocation5 + $0x248] sm:$0xff]  ;;  %v155_v50 = vld [vmem:[#allocation5 + $0x218] sm:$0xff]  ;;  %v3764_v52 = vpack.c.bf16 %v144_v44, %v136_v43 }
  0x57   :  { %v163_v51 = vld [vmem:[#allocation5 + $0x258] sm:$0xff]  ;;  %v3796_v53 = vpack.c.bf16 %v146_v47, %v138_v46  ;;  %v3766_v54 = vpack.c.bf16 %v161_v49, %v153_v48  ;;  %v152_v55 = vld [vmem:[#allocation5 + $0x200] sm:$0xff]  ;;  %v154_v57 = vld [vmem:[#allocation5 + $0x210] sm:$0xff] }
  0x58   :  { %3761 = vmatpush1.bf16.msra.mxu0 %v3760_v36  ;;  %v160_v56 = vld [vmem:[#allocation5 + $0x240] sm:$0xff]  ;;  %v3798_v58 = vpack.c.bf16 %v163_v51, %v155_v50  ;;  %v162_v59 = vld [vmem:[#allocation5 + $0x250] sm:$0xff]  ;;  %v169_v60 = vld [vmem:[#allocation5 + $0x288] sm:$0xff] }
  0x59   :  { %3793 = vmatpush1.bf16.msra.mxu1 %v3792_v40  ;;  %3763 = vmatprep.subr.bf16.mxu0 %v3762_v41  ;;  %v177_v61 = vld [vmem:[#allocation5 + $0x2c8] sm:$0xff]  ;;  %v171_v62 = vld [vmem:[#allocation5 + $0x298] sm:$0xff]  ;;  %v3768_v1 = vpack.c.bf16 %v160_v56, %v152_v55  ;;  %v3800_v2 = vpack.c.bf16 %v162_v59, %v154_v57  ;;  %v168_v4 = vld [vmem:[#allocation5 + $0x280] sm:$0xff] }
  0x5a   :  { %3795 = vmatprep.subr.bf16.mxu1 %v3794_v45  ;;  %v179_v63 = vld [vmem:[#allocation5 + $0x2d8] sm:$0xff]  ;;  %v3770_v3 = vpack.c.bf16 %v177_v61, %v169_v60  ;;  %v176_v5 = vld [vmem:[#allocation5 + $0x2c0] sm:$0xff]  ;;  %v170_v6 = vld [vmem:[#allocation5 + $0x290] sm:$0xff] }
  0x5b   :  { %v3802_v7 = vpack.c.bf16 %v179_v63, %v171_v62  ;;  %v178_v8 = vld [vmem:[#allocation5 + $0x2d0] sm:$0xff]  ;;  %v185_v9 = vld [vmem:[#allocation5 + $0x308] sm:$0xff]  ;;  %v187_v11 = vld [vmem:[#allocation5 + $0x318] sm:$0xff]  ;;  %v3772_v13 = vpack.c.bf16 %v176_v5, %v168_v4 }
  0x5c   :  { %3765 = vmatpush1.bf16.msra.mxu0 %v3764_v52  ;;  %v193_v10 = vld [vmem:[#allocation5 + $0x348] sm:$0xff]  ;;  %v195_v12 = vld [vmem:[#allocation5 + $0x358] sm:$0xff]  ;;  %v3804_v14 = vpack.c.bf16 %v178_v8, %v170_v6  ;;  %v184_v16 = vld [vmem:[#allocation5 + $0x300] sm:$0xff] }
  0x5d   :  { %3797 = vmatpush1.bf16.msra.mxu1 %v3796_v53  ;;  %3767 = vmatprep.subr.bf16.mxu0 %v3766_v54  ;;  %v3774_v15 = vpack.c.bf16 %v193_v10, %v185_v9  ;;  %v192_v17 = vld [vmem:[#allocation5 + $0x340] sm:$0xff]  ;;  %v186_v18 = vld [vmem:[#allocation5 + $0x310] sm:$0xff]  ;;  %v3806_v19 = vpack.c.bf16 %v195_v12, %v187_v11  ;;  %v201_v21 = vld [vmem:[#allocation5 + $0x388] sm:$0xff] }
  0x5e   :  { %3799 = vmatprep.subr.bf16.mxu1 %v3798_v58  ;;  %v194_v20 = vld [vmem:[#allocation5 + $0x350] sm:$0xff]  ;;  %v209_v22 = vld [vmem:[#allocation5 + $0x3c8] sm:$0xff]  ;;  %v203_v23 = vld [vmem:[#allocation5 + $0x398] sm:$0xff]  ;;  %v3776_v25 = vpack.c.bf16 %v192_v17, %v184_v16 }
  0x5f   :  { %v211_v24 = vld [vmem:[#allocation5 + $0x3d8] sm:$0xff]  ;;  %v3808_v26 = vpack.c.bf16 %v194_v20, %v186_v18  ;;  %v3778_v27 = vpack.c.bf16 %v209_v22, %v201_v21  ;;  %v200_v28 = vld [vmem:[#allocation5 + $0x380] sm:$0xff]  ;;  %v202_v30 = vld [vmem:[#allocation5 + $0x390] sm:$0xff] }
  0x60   :  { %3769 = vmatpush1.bf16.msra.mxu0 %v3768_v1  ;;  %v208_v29 = vld [vmem:[#allocation5 + $0x3c0] sm:$0xff]  ;;  %v3810_v31 = vpack.c.bf16 %v211_v24, %v203_v23  ;;  %v210_v32 = vld [vmem:[#allocation5 + $0x3d0] sm:$0xff]  ;;  %v93_v33 = vld [vmem:[#allocation5 + $0x28] sm:$0xff] }
  0x61   :  { %3801 = vmatpush1.bf16.msra.mxu1 %v3800_v2  ;;  %3771 = vmatprep.subr.bf16.mxu0 %v3770_v3  ;;  %v101_v34 = vld [vmem:[#allocation5 + $0x68] sm:$0xff]  ;;  %v95_v35 = vld [vmem:[#allocation5 + $0x38] sm:$0xff]  ;;  %v3780_v37 = vpack.c.bf16 %v208_v29, %v200_v28  ;;  %v3812_v38 = vpack.c.bf16 %v210_v32, %v202_v30  ;;  %v92_v40 = vld [vmem:[#allocation5 + $0x20] sm:$0xff] }
  0x62   :  { %3803 = vmatprep.subr.bf16.mxu1 %v3802_v7  ;;  %v103_v36 = vld [vmem:[#allocation5 + $0x78] sm:$0xff]  ;;  %v3814_v39 = vpack.c.bf16 %v101_v34, %v93_v33  ;;  %v100_v41 = vld [vmem:[#allocation5 + $0x60] sm:$0xff]  ;;  %v94_v43 = vld [vmem:[#allocation5 + $0x30] sm:$0xff] }
  0x63   :  { %v3846_v42 = vpack.c.bf16 %v103_v36, %v95_v35  ;;  %v102_v44 = vld [vmem:[#allocation5 + $0x70] sm:$0xff]  ;;  %v109_v45 = vld [vmem:[#allocation5 + $0xa8] sm:$0xff]  ;;  %v5521_v47 = vld [vmem:[#allocation2] sm:$0xff]  ;;  %v3816_v48 = vpack.c.bf16 %v100_v41, %v92_v40 }
  0x64   :  { %3773 = vmatpush1.bf16.msra.mxu0 %v3772_v13  ;;  %v117_v46 = vld [vmem:[#allocation5 + $0xe8] sm:$0xff]  ;;  %v111_v49 = vld [vmem:[#allocation5 + $0xb8] sm:$0xff]  ;;  %v3848_v51 = vpack.c.bf16 %v102_v44, %v94_v43  ;;  %v108_v52 = vld [vmem:[#allocation5 + $0xa0] sm:$0xff] }
  0x65   :  { %3805 = vmatpush1.bf16.msra.mxu1 %v3804_v14  ;;  %3775 = vmatprep.subr.bf16.mxu0 %v3774_v15  ;;  %v119_v50 = vld [vmem:[#allocation5 + $0xf8] sm:$0xff]  ;;  %v116_v53 = vld [vmem:[#allocation5 + $0xe0] sm:$0xff]  ;;  %v3818_v54 = vpack.c.bf16 %v117_v46, %v109_v45  ;;  %v110_v55 = vld [vmem:[#allocation5 + $0xb0] sm:$0xff] }
  0x66   :  { %3807 = vmatprep.subr.bf16.mxu1 %v3806_v19  ;;  %v118_v56 = vld [vmem:[#allocation5 + $0xf0] sm:$0xff]  ;;  %v3850_v57 = vpack.c.bf16 %v119_v50, %v111_v49  ;;  %v125_v58 = vld [vmem:[#allocation5 + $0x128] sm:$0xff]  ;;  %v3820_v61 = vpack.c.bf16 %v116_v53, %v108_v52  ;;  %v127_v62 = vld [vmem:[#allocation5 + $0x138] sm:$0xff] }
  0x67   :  { %v133_v59 = vld [vmem:[#allocation5 + $0x168] sm:$0xff]  ;;  %v135_v63 = vld [vmem:[#allocation5 + $0x178] sm:$0xff]  ;;  %v3852_v1 = vpack.c.bf16 %v118_v56, %v110_v55  ;;  %v124_v2 = vld [vmem:[#allocation5 + $0x120] sm:$0xff] }
  0x68   :  { %3777 = vmatpush1.bf16.msra.mxu0 %v3776_v25  ;;  %v5525_v60 = vld [vmem:[#allocation2 + $0x8] sm:$0xff]  ;;  %v132_v3 = vld [vmem:[#allocation5 + $0x160] sm:$0xff]  ;;  %v3822_v4 = vpack.c.bf16 %v133_v59, %v125_v58  ;;  %v126_v5 = vld [vmem:[#allocation5 + $0x130] sm:$0xff]  ;;  %v3854_v7 = vpack.c.bf16 %v135_v63, %v127_v62 }
  0x69   :  { %3809 = vmatpush1.bf16.msra.mxu1 %v3808_v26  ;;  %3779 = vmatprep.subr.bf16.mxu0 %v3778_v27  ;;  %v134_v6 = vld [vmem:[#allocation5 + $0x170] sm:$0xff]  ;;  %v141_v8 = vld [vmem:[#allocation5 + $0x1a8] sm:$0xff]  ;;  %v3824_v11 = vpack.c.bf16 %v132_v3, %v124_v2  ;;  %v143_v12 = vld [vmem:[#allocation5 + $0x1b8] sm:$0xff] }
  0x6a   :  { %3811 = vmatprep.subr.bf16.mxu1 %v3810_v31  ;;  %v149_v9 = vld [vmem:[#allocation5 + $0x1e8] sm:$0xff]  ;;  %v5531_v10 = vld [vmem:[#allocation2 + $0x10] sm:$0xff]  ;;  %v151_v13 = vld [vmem:[#allocation5 + $0x1f8] sm:$0xff]  ;;  %v3856_v14 = vpack.c.bf16 %v134_v6, %v126_v5 }
  0x6b   :  { %v140_v15 = vld [vmem:[#allocation5 + $0x1a0] sm:$0xff]  ;;  %v3826_v17 = vpack.c.bf16 %v149_v9, %v141_v8  ;;  %v142_v18 = vld [vmem:[#allocation5 + $0x1b0] sm:$0xff]  ;;  %v3858_v20 = vpack.c.bf16 %v151_v13, %v143_v12  ;;  %v157_v21 = vld [vmem:[#allocation5 + $0x228] sm:$0xff] }
  0x6c   :  { %3781 = vmatpush1.bf16.msra.mxu0 %v3780_v37  ;;  %v148_v16 = vld [vmem:[#allocation5 + $0x1e0] sm:$0xff]  ;;  %v150_v19 = vld [vmem:[#allocation5 + $0x1f0] sm:$0xff]  ;;  %v165_v22 = vld [vmem:[#allocation5 + $0x268] sm:$0xff] }
  0x6d   :  { %3813 = vmatpush1.bf16.msra.mxu1 %v3812_v38  ;;  %3815 = vmatprep.subr.bf16.mxu0 %v3814_v39  ;;  %v5537_v23 = vld [vmem:[#allocation2 + $0x18] sm:$0xff]  ;;  %v3828_v24 = vpack.c.bf16 %v148_v16, %v140_v15  ;;  %v3860_v27 = vpack.c.bf16 %v150_v19, %v142_v18  ;;  %v156_v28 = vld [vmem:[#allocation5 + $0x220] sm:$0xff]  ;;  %v3830_v30 = vpack.c.bf16 %v165_v22, %v157_v21  ;;  %v158_v31 = vld [vmem:[#allocation5 + $0x230] sm:$0xff] }
  0x6e   :  { %3847 = vmatprep.subr.bf16.mxu1 %v3846_v42  ;;  %v159_v25 = vld [vmem:[#allocation5 + $0x238] sm:$0xff]  ;;  %v164_v29 = vld [vmem:[#allocation5 + $0x260] sm:$0xff]  ;;  %v166_v32 = vld [vmem:[#allocation5 + $0x270] sm:$0xff] }
  0x6f   :  { %323 = vmatmul.mubr.f32.vlgmr.msra.gmra.mrb[0].mxu0 %v5521_v47  ;;  %v167_v26 = vld [vmem:[#allocation5 + $0x278] sm:$0xff]  ;;  %v173_v34 = vld [vmem:[#allocation5 + $0x2a8] sm:$0xff]  ;;  %v5543_v36 = vld [vmem:[#allocation2 + $0x20] sm:$0xff]  ;;  %v3832_v37 = vpack.c.bf16 %v164_v29, %v156_v28  ;;  %v3864_v40 = vpack.c.bf16 %v166_v32, %v158_v31 }
  0x70   :  { %436 = vmatmul.mubr.f32.vlgmr.msra.gmra.mrb[0].mxu1 %v5521_v47  ;;  %3817 = vmatpush1.bf16.msra.mxu0 %v3816_v48  ;;  %v3862_v33 = vpack.c.bf16 %v167_v26, %v159_v25  ;;  %v181_v35 = vld [vmem:[#allocation5 + $0x2e8] sm:$0xff]  ;;  %v175_v38 = vld [vmem:[#allocation5 + $0x2b8] sm:$0xff]  ;;  %v172_v41 = vld [vmem:[#allocation5 + $0x2a0] sm:$0xff] }
  0x71   :  { %3849 = vmatpush1.bf16.msra.mxu1 %v3848_v51  ;;  %328 = vmatprep.mubr.f32.mxu0 %v6500_v0  ;;  %v183_v39 = vld [vmem:[#allocation5 + $0x2f8] sm:$0xff]  ;;  %v180_v42 = vld [vmem:[#allocation5 + $0x2e0] sm:$0xff]  ;;  %v3834_v43 = vpack.c.bf16 %v181_v35, %v173_v34  ;;  %v174_v44 = vld [vmem:[#allocation5 + $0x2b0] sm:$0xff] }
  0x72   :  { %441 = vmatprep.mubr.f32.mxu1 %v6500_v0  ;;  %3819 = vmatprep.subr.bf16.mxu0 %v3818_v54  ;;  %v182_v45 = vld [vmem:[#allocation5 + $0x2f0] sm:$0xff]  ;;  %v3866_v46 = vpack.c.bf16 %v183_v39, %v175_v38  ;;  %v189_v48 = vld [vmem:[#allocation5 + $0x328] sm:$0xff]  ;;  %v3836_v51 = vpack.c.bf16 %v180_v42, %v172_v41  ;;  %v191_v52 = vld [vmem:[#allocation5 + $0x338] sm:$0xff] }
  0x73   :  { %329 = vmatmul.mubr.f32.gmra.mrb[2].mxu0 %v5525_v60  ;;  %3851 = vmatprep.subr.bf16.mxu1 %v3850_v57  ;;  %v197_v49 = vld [vmem:[#allocation5 + $0x368] sm:$0xff]  ;;  %v199_v53 = vld [vmem:[#allocation5 + $0x378] sm:$0xff]  ;;  %v3868_v54 = vpack.c.bf16 %v182_v45, %v174_v44  ;;  %v188_v55 = vld [vmem:[#allocation5 + $0x320] sm:$0xff] }
  0x74   :  { %442 = vmatmul.mubr.f32.gmra.mrb[2].mxu1 %v5525_v60  ;;  %3821 = vmatpush1.bf16.msra.mxu0 %v3820_v61  ;;  %v5549_v50 = vld [vmem:[#allocation2 + $0x28] sm:$0xff]  ;;  %v196_v56 = vld [vmem:[#allocation5 + $0x360] sm:$0xff]  ;;  %v3838_v57 = vpack.c.bf16 %v197_v49, %v189_v48  ;;  %v190_v58 = vld [vmem:[#allocation5 + $0x330] sm:$0xff]  ;;  %v3870_v61 = vpack.c.bf16 %v199_v53, %v191_v52 }
  0x75   :  { %3853 = vmatpush1.bf16.msra.mxu1 %v3852_v1  ;;  %334 = vmatprep.mubr.f32.mxu0 %v6500_v0  ;;  %v198_v59 = vld [vmem:[#allocation5 + $0x370] sm:$0xff]  ;;  %v205_v62 = vld [vmem:[#allocation5 + $0x3a8] sm:$0xff]  ;;  %v3840_v2 = vpack.c.bf16 %v196_v56, %v188_v55  ;;  %v207_v3 = vld [vmem:[#allocation5 + $0x3b8] sm:$0xff] }
  0x76   :  { %447 = vmatprep.mubr.f32.mxu1 %v6500_v0  ;;  %3823 = vmatprep.subr.bf16.mxu0 %v3822_v4  ;;  %v213_v63 = vld [vmem:[#allocation5 + $0x3e8] sm:$0xff]  ;;  %v5555_v1 = vld [vmem:[#allocation2 + $0x30] sm:$0xff]  ;;  %v215_v4 = vld [vmem:[#allocation5 + $0x3f8] sm:$0xff]  ;;  %v3872_v5 = vpack.c.bf16 %v198_v59, %v190_v58 }
  0x77   :  { %335 = vmatmul.mubr.f32.gmra.mrb[4].mxu0 %v5531_v10  ;;  %3855 = vmatprep.subr.bf16.mxu1 %v3854_v7  ;;  %v204_v6 = vld [vmem:[#allocation5 + $0x3a0] sm:$0xff]  ;;  %v3842_v8 = vpack.c.bf16 %v213_v63, %v205_v62  ;;  %v206_v9 = vld [vmem:[#allocation5 + $0x3b0] sm:$0xff]  ;;  %v3874_v12 = vpack.c.bf16 %v215_v4, %v207_v3  ;;  %v711_v13 = vld [vmem:[#allocation7 + $0x8] sm:$0xff] }
  0x78   :  { %448 = vmatmul.mubr.f32.gmra.mrb[4].mxu1 %v5531_v10  ;;  %3825 = vmatpush1.bf16.msra.mxu0 %v3824_v11  ;;  %v212_v7 = vld [vmem:[#allocation5 + $0x3e0] sm:$0xff]  ;;  %v214_v11 = vld [vmem:[#allocation5 + $0x3f0] sm:$0xff]  ;;  %v5561_v15 = vld [vmem:[#allocation2 + $0x38] sm:$0xff] }
  0x79   :  { %3857 = vmatpush1.bf16.msra.mxu1 %v3856_v14  ;;  %340 = vmatprep.mubr.f32.mxu0 %v6500_v0  ;;  %v715_v14 = vld [vmem:[#allocation7 + $0x28] sm:$0xff]  ;;  %v3844_v16 = vpack.c.bf16 %v212_v7, %v204_v6  ;;  %v717_v18 = vld [vmem:[#allocation7 + $0x38] sm:$0xff]  ;;  %v3876_v19 = vpack.c.bf16 %v214_v11, %v206_v9  ;;  %v714_v21 = vld [vmem:[#allocation7 + $0x20] sm:$0xff] }
  0x7a   :  { %453 = vmatprep.mubr.f32.mxu1 %v6500_v0  ;;  %3827 = vmatprep.subr.bf16.mxu0 %v3826_v17  ;;  %v713_v17 = vld [vmem:[#allocation7 + $0x18] sm:$0xff]  ;;  %v5565_v22 = vpack.c.bf16 %v715_v14, %v711_v13  ;;  %v716_v25 = vld [vmem:[#allocation7 + $0x30] sm:$0xff]  ;;  %v723_v28 = vld [vmem:[#allocation7 + $0x68] sm:$0xff] }
  0x7b   :  { %341 = vmatmul.mubr.f32.gmra.mrb[6].mxu0 %v5537_v23  ;;  %3859 = vmatprep.subr.bf16.mxu1 %v3858_v20  ;;  %v710_v20 = vld [vmem:[#allocation7] sm:$0xff]  ;;  %v5568_v26 = vpack.c.bf16 %v717_v18, %v713_v17  ;;  %v725_v31 = vld [vmem:[#allocation7 + $0x78] sm:$0xff]  ;;  %v724_v38 = vld [vmem:[#allocation7 + $0x70] sm:$0xff] }
  0x7c   :  { %454 = vmatmul.mubr.f32.gmra.mrb[6].mxu1 %v5537_v23  ;;  %3829 = vmatpush1.bf16.msra.mxu0 %v3828_v24  ;;  %v712_v24 = vld [vmem:[#allocation7 + $0x10] sm:$0xff]  ;;  %v5571_v29 = vpack.c.bf16 %v714_v21, %v710_v20  ;;  %v722_v34 = vld [vmem:[#allocation7 + $0x60] sm:$0xff]  ;;  %v731_v41 = vld [vmem:[#allocation7 + $0xa8] sm:$0xff] }
  0x7d   :  { %3861 = vmatpush1.bf16.msra.mxu1 %v3860_v27  ;;  %346 = vmatprep.mubr.f32.mxu0 %v6500_v0  ;;  %v719_v27 = vld [vmem:[#allocation7 + $0x48] sm:$0xff]  ;;  %v5574_v32 = vpack.c.bf16 %v716_v25, %v712_v24  ;;  %v733_v44 = vld [vmem:[#allocation7 + $0xb8] sm:$0xff]  ;;  %v730_v48 = vld [vmem:[#allocation7 + $0xa0] sm:$0xff] }
  0x7e   :  { %459 = vmatprep.mubr.f32.mxu1 %v6500_v0  ;;  %3831 = vmatprep.subr.bf16.mxu0 %v3830_v30  ;;  %v721_v30 = vld [vmem:[#allocation7 + $0x58] sm:$0xff]  ;;  %v5578_v35 = vpack.c.bf16 %v723_v28, %v719_v27  ;;  %v735_v53 = vld [vmem:[#allocation7 + $0xc8] sm:$0xff]  ;;  %v734_v59 = vld [vmem:[#allocation7 + $0xc0] sm:$0xff] }
  0x7f   :  { %347 = vmatmul.mubr.f32.gmra.mrb[8].mxu0 %v5543_v36  ;;  %3863 = vmatprep.subr.bf16.mxu1 %v3862_v33  ;;  %v718_v33 = vld [vmem:[#allocation7 + $0x40] sm:$0xff]  ;;  %v5582_v39 = vpack.c.bf16 %v725_v31, %v721_v30  ;;  %v737_v56 = vld [vmem:[#allocation7 + $0xd8] sm:$0xff]  ;;  %v740_v63 = vld [vmem:[#allocation7 + $0xf0] sm:$0xff] }
  0x80   :  { %460 = vmatmul.mubr.f32.gmra.mrb[8].mxu1 %v5543_v36  ;;  %3833 = vmatpush1.bf16.msra.mxu0 %v3832_v37  ;;  %v720_v37 = vld [vmem:[#allocation7 + $0x50] sm:$0xff]  ;;  %v5586_v42 = vpack.c.bf16 %v722_v34, %v718_v33  ;;  %v743_v3 = vld [vmem:[#allocation7 + $0x108] sm:$0xff]  ;;  %v745_v6 = vld [vmem:[#allocation7 + $0x118] sm:$0xff] }
  0x81   :  { %3865 = vmatpush1.bf16.msra.mxu1 %v3864_v40  ;;  %352 = vmatprep.mubr.f32.mxu0 %v6500_v0  ;;  %v727_v40 = vld [vmem:[#allocation7 + $0x88] sm:$0xff]  ;;  %v5590_v45 = vpack.c.bf16 %v724_v38, %v720_v37  ;;  %v749_v7 = vld [vmem:[#allocation7 + $0x138] sm:$0xff]  ;;  %v742_v9 = vld [vmem:[#allocation7 + $0x100] sm:$0xff] }
  0x82   :  { %465 = vmatprep.mubr.f32.mxu1 %v6500_v0  ;;  %3835 = vmatprep.subr.bf16.mxu0 %v3834_v43  ;;  %6604 = vst [vmem:[#allocation15_spill] sm:$0xff] %v5586_v42  ;;  %v729_v43 = vld [vmem:[#allocation7 + $0x98] sm:$0xff]  ;;  %v5594_v49 = vpack.c.bf16 %v731_v41, %v727_v40  ;;  %v747_v4 = vld [vmem:[#allocation7 + $0x128] sm:$0xff]  ;;  %v746_v11 = vld [vmem:[#allocation7 + $0x120] sm:$0xff]  ;;  %v5630_v14 = vpack.c.bf16 %v749_v7, %v745_v6 }
  0x83   :  { %353 = vmatmul.mubr.f32.gmra.mrb[10].mxu0 %v5549_v50  ;;  %3867 = vmatprep.subr.bf16.mxu1 %v3866_v46  ;;  %6605 = vst [vmem:[#allocation16_spill] sm:$0xff] %v5590_v45  ;;  %v726_v46 = vld [vmem:[#allocation7 + $0x80] sm:$0xff]  ;;  %v5598_v52 = vpack.c.bf16 %v733_v44, %v729_v43  ;;  %v748_v13 = vld [vmem:[#allocation7 + $0x130] sm:$0xff]  ;;  %v755_v17 = vld [vmem:[#allocation7 + $0x168] sm:$0xff]  ;;  %v5634_v18 = vpack.c.bf16 %v746_v11, %v742_v9 }
  0x84   :  { %466 = vmatmul.mubr.f32.gmra.mrb[10].mxu1 %v5549_v50  ;;  %3837 = vmatpush1.bf16.msra.mxu0 %v3836_v51  ;;  %6606 = vst [vmem:[#allocation17_spill] sm:$0xff] %v5594_v49  ;;  %v732_v51 = vld [vmem:[#allocation7 + $0xb0] sm:$0xff]  ;;  %v5602_v55 = vpack.c.bf16 %v730_v48, %v726_v46  ;;  %6615 = vst [vmem:[#allocation26_spill] sm:$0xff] %v5630_v14  ;;  %v757_v20 = vld [vmem:[#allocation7 + $0x178] sm:$0xff] }
  0x85   :  { %3869 = vmatpush1.bf16.msra.mxu1 %v3868_v54  ;;  %358 = vmatprep.mubr.f32.mxu0 %v6500_v0  ;;  %6607 = vst [vmem:[#allocation18_spill] sm:$0xff] %v5598_v52  ;;  %v739_v54 = vld [vmem:[#allocation7 + $0xe8] sm:$0xff]  ;;  %6616 = vst [vmem:[#allocation27_spill] sm:$0xff] %v5634_v18  ;;  %v750_v24 = vld [vmem:[#allocation7 + $0x140] sm:$0xff] }
  0x86   :  { %471 = vmatprep.mubr.f32.mxu1 %v6500_v0  ;;  %3839 = vmatprep.subr.bf16.mxu0 %v3838_v57  ;;  %6608 = vst [vmem:[#allocation19_spill] sm:$0xff] %v5602_v55  ;;  %v741_v57 = vld [vmem:[#allocation7 + $0xf8] sm:$0xff]  ;;  %v5610_v62 = vpack.c.bf16 %v739_v54, %v735_v53  ;;  %v754_v25 = vld [vmem:[#allocation7 + $0x160] sm:$0xff]  ;;  %v756_v28 = vld [vmem:[#allocation7 + $0x170] sm:$0xff] }
  0x87   :  { %359 = vmatmul.mubr.f32.gmra.mrb[12].mxu0 %v5555_v1  ;;  %3871 = vmatprep.subr.bf16.mxu1 %v3870_v61  ;;  %v738_v61 = vld [vmem:[#allocation7 + $0xe0] sm:$0xff]  ;;  %v759_v31 = vld [vmem:[#allocation7 + $0x188] sm:$0xff]  ;;  %v5650_v34 = vpack.c.bf16 %v754_v25, %v750_v24  ;;  %v761_v37 = vld [vmem:[#allocation7 + $0x198] sm:$0xff] }
  0x88   :  { %472 = vmatmul.mubr.f32.gmra.mrb[12].mxu1 %v5555_v1  ;;  %3841 = vmatpush1.bf16.msra.mxu0 %v3840_v2  ;;  %6610 = vst [vmem:[#allocation21_spill] sm:$0xff] %v5610_v62  ;;  %v5614_v2 = vpack.c.bf16 %v741_v57, %v737_v56  ;;  %v763_v33 = vld [vmem:[#allocation7 + $0x1a8] sm:$0xff]  ;;  %v765_v38 = vld [vmem:[#allocation7 + $0x1b8] sm:$0xff]  ;;  %v758_v41 = vld [vmem:[#allocation7 + $0x180] sm:$0xff] }
  0x89   :  { %3873 = vmatpush1.bf16.msra.mxu1 %v3872_v5  ;;  %364 = vmatprep.mubr.f32.mxu0 %v6500_v0  ;;  %v5618_v5 = vpack.c.bf16 %v738_v61, %v734_v59  ;;  %6620 = vst [vmem:[#allocation31_spill] sm:$0xff] %v5650_v34  ;;  %v762_v43 = vld [vmem:[#allocation7 + $0x1a0] sm:$0xff]  ;;  %v5658_v44 = vpack.c.bf16 %v763_v33, %v759_v31  ;;  %v764_v46 = vld [vmem:[#allocation7 + $0x1b0] sm:$0xff]  ;;  %v769_v54 = vld [vmem:[#allocation7 + $0x1d8] sm:$0xff] }
  0x8a   :  { %477 = vmatprep.mubr.f32.mxu1 %v6500_v0  ;;  %3843 = vmatprep.subr.bf16.mxu0 %v3842_v8  ;;  %6611 = vst [vmem:[#allocation22_spill] sm:$0xff] %v5614_v2  ;;  %v5662_v48 = vpack.c.bf16 %v765_v38, %v761_v37  ;;  %v5666_v53 = vpack.c.bf16 %v762_v43, %v758_v41  ;;  %v773_v56 = vld [vmem:[#allocation7 + $0x1f8] sm:$0xff]  ;;  %v766_v59 = vld [vmem:[#allocation7 + $0x1c0] sm:$0xff]  ;;  %v779_v6 = vld [vmem:[#allocation8 + $0x28] sm:$0xff] }
  0x8b   :  { %365 = vmatmul.mubr.f32.gmra.mrb[14].mxu0 %v5561_v15  ;;  %3875 = vmatprep.subr.bf16.mxu1 %v3874_v12  ;;  %6612 = vst [vmem:[#allocation23_spill] sm:$0xff] %v5618_v5  ;;  %v5626_v12 = vpack.c.bf16 %v747_v4, %v743_v3  ;;  %6622 = vst [vmem:[#allocation33_spill] sm:$0xff] %v5658_v44  ;;  %v770_v61 = vld [vmem:[#allocation7 + $0x1e0] sm:$0xff]  ;;  %v5678_v3 = vpack.c.bf16 %v773_v56, %v769_v54  ;;  %v775_v4 = vld [vmem:[#allocation8 + $0x8] sm:$0xff] }
  0x8c   :  { %478 = vmatmul.mubr.f32.gmra.mrb[14].mxu1 %v5561_v15  ;;  %3845 = vmatpush1.bf16.msra.mxu0 %v3844_v16  ;;  %v751_v16 = vld [vmem:[#allocation7 + $0x148] sm:$0xff]  ;;  %6623 = vst [vmem:[#allocation34_spill] sm:$0xff] %v5662_v48  ;;  %6624 = vst [vmem:[#allocation35_spill] sm:$0xff] %v5666_v53  ;;  %v5682_v7 = vpack.c.bf16 %v770_v61, %v766_v59  ;;  %v777_v9 = vld [vmem:[#allocation8 + $0x18] sm:$0xff] }
  0x8d   :  { %3877 = vmatpush1.bf16.msra.mxu1 %v3876_v19  ;;  %548 = vmatprep.mubr.f32.mxu0 %v6500_v0  ;;  %6614 = vst [vmem:[#allocation25_spill] sm:$0xff] %v5626_v12  ;;  %v753_v19 = vld [vmem:[#allocation7 + $0x158] sm:$0xff]  ;;  %v5642_v27 = vpack.c.bf16 %v755_v17, %v751_v16  ;;  %6627 = vst [vmem:[#allocation38_spill] sm:$0xff] %v5678_v3  ;;  %v778_v16 = vld [vmem:[#allocation8 + $0x20] sm:$0xff] }
  0x8e   :  { %661 = vmatprep.mubr.f32.mxu1 %v6500_v0  ;;  %3879 = vmatprep.subr.bf16.mxu0 %v5565_v22  ;;  %v5646_v30 = vpack.c.bf16 %v757_v20, %v753_v19  ;;  %6628 = vst [vmem:[#allocation39_spill] sm:$0xff] %v5682_v7  ;;  %v781_v11 = vld [vmem:[#allocation8 + $0x38] sm:$0xff]  ;;  %v776_v17 = vld [vmem:[#allocation8 + $0x10] sm:$0xff]  ;;  %v783_v20 = vld [vmem:[#allocation8 + $0x48] sm:$0xff] }
  0x8f   :  { %549 = vmatmul.mubr.f32.vlgmr.msra.gmra.mrb[16].mxu0 %v5521_v47  ;;  %3911 = vmatprep.subr.bf16.mxu1 %v5568_v26  ;;  %6618 = vst [vmem:[#allocation29_spill] sm:$0xff] %v5642_v27  ;;  %v780_v19 = vld [vmem:[#allocation8 + $0x30] sm:$0xff]  ;;  %v787_v24 = vld [vmem:[#allocation8 + $0x68] sm:$0xff]  ;;  %v5695_v25 = vld [vmem:[%s6494_s1] sm:$0xff] }
  0x90   :  { %662 = vmatmul.mubr.f32.vlgmr.msra.gmra.mrb[16].mxu1 %v5521_v47  ;;  %3881 = vmatpush1.bf16.msra.mxu0 %v5571_v29  ;;  %v728_v47 = vld [vmem:[#allocation7 + $0x90] sm:$0xff]  ;;  %6619 = vst [vmem:[#allocation30_spill] sm:$0xff] %v5646_v30  ;;  %v789_v31 = vld [vmem:[#allocation8 + $0x78] sm:$0xff]  ;;  %v5707_v37 = vpack.c.bf16 %v780_v19, %v776_v17  ;;  %v5709_v38 = vpack.c.bf16 %v787_v24, %v783_v20  ;;  %v782_v41 = vld [vmem:[#allocation8 + $0x40] sm:$0xff]  ;;  %vm838_vm0 = vcmp.gt.s32.totalorder %v5695_v25, 0  ;;  %vm1019_vm1 = vcmp.gt.s32.totalorder %v5695_v25, 7 }
  0x91   :  { %3913 = vmatpush1.bf16.msra.mxu1 %v5574_v32  ;;  %554 = vmatprep.mubr.f32.mxu0 %v6500_v0  ;;  %v5606_v58 = vpack.c.bf16 %v732_v51, %v728_v47  ;;  %v767_v47 = vld [vmem:[#allocation7 + $0x1c8] sm:$0xff]  ;;  %v786_v43 = vld [vmem:[#allocation8 + $0x60] sm:$0xff]  ;;  %v793_v54 = vld [vmem:[#allocation8 + $0x98] sm:$0xff]  ;;  %v3694_v61 = vsel %vm838_vm0, 1.0, %v6500_v0  ;;  %vm1565_vm2 = vcmp.gt.s32.totalorder %v5695_v25, 2  ;;  %vm1929_vm3 = vcmp.gt.s32.totalorder %v5695_v25, 3 }
  0x92   :  { %667 = vmatprep.mubr.f32.mxu1 %v6500_v0  ;;  %3883 = vmatprep.subr.bf16.mxu0 %v5578_v35  ;;  %v771_v51 = vld [vmem:[#allocation7 + $0x1e8] sm:$0xff]  ;;  %v797_v56 = vld [vmem:[#allocation8 + $0xb8] sm:$0xff]  ;;  %v5720_v59 = vpack.c.bf16 %v786_v43, %v782_v41  ;;  %v798_v43 = vld [vmem:[#allocation8 + $0xc0] sm:$0xff]  ;;  %vm1201_vm4 = vcmp.gt.s32.totalorder %v5695_v25, 1  ;;  %vm1383_vm5 = vcmp.gt.s32.totalorder %v5695_v25, 6  ;;  %vm1747_vm6 = vcmp.gt.s32.totalorder %v5695_v25, 5 }
  0x93   :  { %555 = vmatmul.mubr.f32.gmra.mrb[18].mxu0 %v5525_v60  ;;  %3915 = vmatprep.subr.bf16.mxu1 %v5582_v39  ;;  %6609 = vst [vmem:[#allocation20_spill] sm:$0xff] %v5606_v58  ;;  %v803_v17 = vld [vmem:[#allocation8 + $0xe8] sm:$0xff]  ;;  %v801_v19 = vld [vmem:[#allocation8 + $0xd8] sm:$0xff]  ;;  %vm2111_vm7 = vcmp.gt.s32.totalorder %v5695_v25, 4 }
  0x94   :  { %668 = vmatmul.mubr.f32.gmra.mrb[18].mxu1 %v5525_v60  ;;  %3885 = vmatpush1.bf16.msra.mxu0 %v5586_v42  ;;  %v736_v60 = vld [vmem:[#allocation7 + $0xd0] sm:$0xff]  ;;  %v805_v20 = vld [vmem:[#allocation8 + $0xf8] sm:$0xff] }
  0x95   :  { %3917 = vmatpush1.bf16.msra.mxu1 %v5590_v45  ;;  %560 = vmatprep.mubr.f32.mxu0 %v6500_v0  ;;  %v5622_v8 = vpack.c.bf16 %v740_v63, %v736_v60  ;;  %v5674_v60 = vpack.c.bf16 %v771_v51, %v767_v47  ;;  %v772_v63 = vld [vmem:[#allocation7 + $0x1f0] sm:$0xff]  ;;  %v791_v47 = vld [vmem:[#allocation8 + $0x88] sm:$0xff] }
  0x96   :  { %673 = vmatprep.mubr.f32.mxu1 %v6500_v0  ;;  %3887 = vmatprep.subr.bf16.mxu0 %v5594_v49  ;;  %v795_v51 = vld [vmem:[#allocation8 + $0xa8] sm:$0xff] }
  0x97   :  { %561 = vmatmul.mubr.f32.gmra.mrb[20].mxu0 %v5531_v10  ;;  %3919 = vmatprep.subr.bf16.mxu1 %v5598_v52  ;;  %6613 = vst [vmem:[#allocation24_spill] sm:$0xff] %v5622_v8  ;;  %6626 = vst [vmem:[#allocation37_spill] sm:$0xff] %v5674_v60 }
  0x98   :  { %674 = vmatmul.mubr.f32.gmra.mrb[20].mxu1 %v5531_v10  ;;  %3889 = vmatpush1.bf16.msra.mxu0 %v5602_v55  ;;  %v744_v10 = vld [vmem:[#allocation7 + $0x110] sm:$0xff] }
  0x99   :  { %3921 = vmatpush1.bf16.msra.mxu1 %v5606_v58  ;;  %566 = vmatprep.mubr.f32.mxu0 %v6500_v0  ;;  %v5638_v21 = vpack.c.bf16 %v748_v13, %v744_v10  ;;  %v774_v10 = vld [vmem:[#allocation8] sm:$0xff] }
  0x9a   :  { %679 = vmatprep.mubr.f32.mxu1 %v6500_v0  ;;  %3891 = vmatprep.subr.bf16.mxu0 %v5610_v62  ;;  %v5703_v33 = vpack.c.bf16 %v778_v16, %v774_v10  ;;  %v796_v10 = vld [vmem:[#allocation8 + $0xb0] sm:$0xff]  ;;  %v799_v16 = vld [vmem:[#allocation8 + $0xc8] sm:$0xff] }
  0x9b   :  { %567 = vmatmul.mubr.f32.gmra.mrb[22].mxu0 %v5537_v23  ;;  %3923 = vmatprep.subr.bf16.mxu1 %v5614_v2  ;;  %6617 = vst [vmem:[#allocation28_spill] sm:$0xff] %v5638_v21  ;;  %v5743_v41 = vpack.c.bf16 %v803_v17, %v799_v16  ;;  %v806_v17 = vld [vmem:[#allocation8 + $0x100] sm:$0xff] }
  0x9c   :  { %680 = vmatmul.mubr.f32.gmra.mrb[22].mxu1 %v5537_v23  ;;  %3893 = vmatpush1.bf16.msra.mxu0 %v5618_v5  ;;  %v752_v23 = vld [vmem:[#allocation7 + $0x150] sm:$0xff] }
  0x9d   :  { %3925 = vmatpush1.bf16.msra.mxu1 %v5622_v8  ;;  %572 = vmatprep.mubr.f32.mxu0 %v6500_v0  ;;  %v5654_v40 = vpack.c.bf16 %v756_v28, %v752_v23  ;;  %v5699_v23 = vpack.c.bf16 %v781_v11, %v777_v9  ;;  %v785_v28 = vld [vmem:[#allocation8 + $0x58] sm:$0xff]  ;;  %v792_v9 = vld [vmem:[#allocation8 + $0x90] sm:$0xff]  ;;  %v5731_v11 = vpack.c.bf16 %v797_v56, %v793_v54  ;;  %v807_v54 = vld [vmem:[#allocation8 + $0x108] sm:$0xff] }
  0x9e   :  { %685 = vmatprep.mubr.f32.mxu1 %v6500_v0  ;;  %3895 = vmatprep.subr.bf16.mxu0 %v5626_v12  ;;  %6636 = vst [vmem:[#allocation47_spill] sm:$0xff] %v5743_v41  ;;  %v811_v56 = vld [vmem:[#allocation8 + $0x128] sm:$0xff] }
  0x9f   :  { %573 = vmatmul.mubr.f32.gmra.mrb[24].mxu0 %v5543_v36  ;;  %3927 = vmatprep.subr.bf16.mxu1 %v5630_v14  ;;  %6621 = vst [vmem:[#allocation32_spill] sm:$0xff] %v5654_v40  ;;  %6631 = vst [vmem:[#allocation42_spill] sm:$0xff] %v5699_v23  ;;  %v5757_v16 = vpack.c.bf16 %v811_v56, %v807_v54 }
  0xa0   :  { %686 = vmatmul.mubr.f32.gmra.mrb[24].mxu1 %v5543_v36  ;;  %3897 = vmatpush1.bf16.msra.mxu0 %v5634_v18  ;;  %v760_v36 = vld [vmem:[#allocation7 + $0x190] sm:$0xff]  ;;  %6633 = vst [vmem:[#allocation44_spill] sm:$0xff] %v5731_v11 }
  0xa1   :  { %3929 = vmatpush1.bf16.msra.mxu1 %v5638_v21  ;;  %578 = vmatprep.mubr.f32.mxu0 %v6500_v0  ;;  %v5670_v57 = vpack.c.bf16 %v764_v46, %v760_v36  ;;  %v784_v36 = vld [vmem:[#allocation8 + $0x50] sm:$0xff]  ;;  %6639 = vst [vmem:[#allocation50_spill] sm:$0xff] %v5757_v16 }
  0xa2   :  { %691 = vmatprep.mubr.f32.mxu1 %v6500_v0  ;;  %3899 = vmatprep.subr.bf16.mxu0 %v5642_v27  ;;  %v788_v46 = vld [vmem:[#allocation8 + $0x70] sm:$0xff] }
  0xa3   :  { %579 = vmatmul.mubr.f32.gmra.mrb[26].mxu0 %v5549_v50  ;;  %3931 = vmatprep.subr.bf16.mxu1 %v5646_v30  ;;  %6625 = vst [vmem:[#allocation36_spill] sm:$0xff] %v5670_v57 }
  0xa4   :  { %692 = vmatmul.mubr.f32.gmra.mrb[26].mxu1 %v5549_v50  ;;  %3901 = vmatpush1.bf16.msra.mxu0 %v5650_v34  ;;  %v768_v50 = vld [vmem:[#allocation7 + $0x1d0] sm:$0xff] }
  0xa5   :  { %3933 = vmatpush1.bf16.msra.mxu1 %v5654_v40  ;;  %584 = vmatprep.mubr.f32.mxu0 %v6500_v0  ;;  %v5686_v13 = vpack.c.bf16 %v772_v63, %v768_v50  ;;  %v5725_v50 = vpack.c.bf16 %v788_v46, %v784_v36  ;;  %v5727_v63 = vpack.c.bf16 %v795_v51, %v791_v47  ;;  %v802_v36 = vld [vmem:[#allocation8 + $0xe0] sm:$0xff]  ;;  %v800_v46 = vld [vmem:[#allocation8 + $0xd0] sm:$0xff] }
  0xa6   :  { %697 = vmatprep.mubr.f32.mxu1 %v6500_v0  ;;  %3903 = vmatprep.subr.bf16.mxu0 %v5658_v44  ;;  %v5747_v47 = vpack.c.bf16 %v805_v20, %v801_v19  ;;  %v804_v51 = vld [vmem:[#allocation8 + $0xf0] sm:$0xff]  ;;  %v810_v19 = vld [vmem:[#allocation8 + $0x120] sm:$0xff] }
  0xa7   :  { %585 = vmatmul.mubr.f32.gmra.mrb[28].mxu0 %v5555_v1  ;;  %3935 = vmatprep.subr.bf16.mxu1 %v5662_v48  ;;  %6629 = vst [vmem:[#allocation40_spill] sm:$0xff] %v5686_v13  ;;  %6632 = vst [vmem:[#allocation43_spill] sm:$0xff] %v5727_v63  ;;  %v808_v20 = vld [vmem:[#allocation8 + $0x110] sm:$0xff] }
  0xa8   :  { %698 = vmatmul.mubr.f32.gmra.mrb[28].mxu1 %v5555_v1  ;;  %3905 = vmatpush1.bf16.msra.mxu0 %v5666_v53  ;;  %v5690_v1 = vpack.c.bf16 %v779_v6, %v775_v4  ;;  %v790_v4 = vld [vmem:[#allocation8 + $0x80] sm:$0xff]  ;;  %6637 = vst [vmem:[#allocation48_spill] sm:$0xff] %v5747_v47 }
  0xa9   :  { %3937 = vmatpush1.bf16.msra.mxu1 %v5670_v57  ;;  %590 = vmatprep.mubr.f32.mxu0 %v6500_v0  ;;  %v794_v6 = vld [vmem:[#allocation8 + $0xa0] sm:$0xff] }
  0xaa   :  { %703 = vmatprep.mubr.f32.mxu1 %v6500_v0  ;;  %3907 = vmatprep.subr.bf16.mxu0 %v5674_v60  ;;  %6630 = vst [vmem:[#allocation41_spill] sm:$0xff] %v5690_v1  ;;  %v5736_v24 = vpack.c.bf16 %v794_v6, %v790_v4  ;;  %v813_v4 = vld [vmem:[#allocation8 + $0x138] sm:$0xff]  ;;  %v5750_v6 = vpack.c.bf16 %v802_v36, %v798_v43  ;;  %v812_v43 = vld [vmem:[#allocation8 + $0x130] sm:$0xff]  ;;  %v815_v36 = vld [vmem:[#allocation8 + $0x148] sm:$0xff] }
  0xab   :  { %591 = vmatmul.mubr.f32.gmra.mrb[30].mxu0 %v5561_v15  ;;  %3939 = vmatprep.subr.bf16.mxu1 %v5678_v3  ;;  %v5769_v56 = vpack.c.bf16 %v812_v43, %v808_v20  ;;  %v824_v43 = vld [vmem:[#allocation8 + $0x190] sm:$0xff] }
  0xac   :  { %704 = vmatmul.mubr.f32.gmra.mrb[30].mxu1 %v5561_v15  ;;  %3909 = vmatpush1.bf16.msra.mxu0 %v5682_v7  ;;  %v5714_v15 = vpack.c.bf16 %v789_v31, %v785_v28  ;;  %6634 = vst [vmem:[#allocation45_spill] sm:$0xff] %v5736_v24  ;;  %v3698_v28 = vsel %vm1019_vm1, 1.0, %v6500_v0  ;;  %v5741_v31 = vpack.c.bf16 %v796_v10, %v792_v9  ;;  %6638 = vst [vmem:[#allocation49_spill] sm:$0xff] %v5750_v6 }
  0xad   :  { %3941 = vmatpush1.bf16.msra.mxu1 %v5686_v13  ;;  %905 = vmatprep.mubr.f32.mxu0 %v6500_v0  ;;  %v3710_v9 = vsel %vm1565_vm2, 1.0, %v6500_v0  ;;  %v5755_v10 = vpack.c.bf16 %v804_v51, %v800_v46  ;;  %v5764_v46 = vpack.c.bf16 %v810_v19, %v806_v17  ;;  %v6642_v51 = vmov 0.0   ;;  %6643 = vst [vmem:[#allocation53_spill] sm:$0xff] %v5769_v56  ;;  %v823_v17 = vld [vmem:[#allocation8 + $0x188] sm:$0xff] }
  0xae   :  { %976 = vmatprep.mubr.f32.mxu1 %v6500_v0  ;;  %3943 = vmatprep.subr.bf16.mxu0 %v5690_v1  ;;  %6635 = vst [vmem:[#allocation46_spill] sm:$0xff] %v5741_v31  ;;  %v3718_v54 = vsel %vm1929_vm3, 1.0, %v6642_v51  ;;  %v827_v19 = vld [vmem:[#allocation8 + $0x1a8] sm:$0xff] }
  0xaf   :  { %906 = vmatmul.mubr.f32.vlgmr.msra.gmra.mrb[0].mxu0 %v6500_v0  ;;  %3975 = vmatprep.subr.bf16.mxu1 %v5699_v23  ;;  %6641 = vst [vmem:[#allocation52_spill] sm:$0xff] %v5764_v46  ;;  %v5783_v20 = vpack.c.bf16 %v827_v19, %v823_v17  ;;  %v830_v17 = vld [vmem:[#allocation8 + $0x1c0] sm:$0xff]  ;;  %v832_v19 = vld [vmem:[#allocation8 + $0x1d0] sm:$0xff] }
  0xb0   :  { %977 = vmatmul.mubr.f32.vlgmr.msra.gmra.mrb[0].mxu1 %v6500_v0  ;;  %3945 = vmatpush1.bf16.msra.mxu0 %v5703_v33 }
  0xb1   :  { %3977 = vmatpush1.bf16.msra.mxu1 %v5707_v37  ;;  %3947 = vmatprep.subr.bf16.mxu0 %v5709_v38 }
  0xb2   :  { %3979 = vmatprep.subr.bf16.mxu1 %v5714_v15  ;;  %1086 = vmatprep.mubr.f32.mxu0 %v6500_v0 }
  0xb3   :  { %1157 = vmatprep.mubr.f32.mxu1 %v6500_v0  ;;  %1013 = vperm.xlu0 %5045, %v3694_v61   ;;  %v809_v61 = vld [vmem:[#allocation8 + $0x118] sm:$0xff]  ;;  %v819_v0 = vld [vmem:[#allocation8 + $0x168] sm:$0xff] }
  0xb4   :  { %3949 = vmatpush1.bf16.msra.mxu0 %v5720_v59 }
  0xb5   :  { %3981 = vmatpush1.bf16.msra.mxu1 %v5725_v50  ;;  %3951 = vmatprep.subr.bf16.mxu0 %v5727_v63  ;;  %v829_v63 = vld [vmem:[#allocation8 + $0x1b8] sm:$0xff] }
  0xb6   :  { %3983 = vmatprep.subr.bf16.mxu1 %v5731_v11  ;;  %v825_v11 = vld [vmem:[#allocation8 + $0x198] sm:$0xff] }
  0xb7   :  { %1194 = vperm.xlu0 %5045, %v3698_v28   ;;  %v5761_v28 = vpack.c.bf16 %v813_v4, %v809_v61  ;;  %v5771_v61 = vpack.c.bf16 %v819_v0, %v815_v36  ;;  %v814_v4 = vld [vmem:[#allocation8 + $0x140] sm:$0xff]  ;;  %v5786_v36 = vpack.c.bf16 %v829_v63, %v825_v11 }
  0xb8   :  { %3953 = vmatpush1.bf16.msra.mxu0 %v5736_v24  ;;  %v817_v24 = vld [vmem:[#allocation8 + $0x158] sm:$0xff]  ;;  %v834_v63 = vld [vmem:[#allocation8 + $0x1e0] sm:$0xff] }
  0xb9   :  { %3985 = vmatpush1.bf16.msra.mxu1 %v5741_v31  ;;  %3955 = vmatprep.subr.bf16.mxu0 %v5743_v41  ;;  %6640 = vst [vmem:[#allocation51_spill] sm:$0xff] %v5761_v28  ;;  %v821_v31 = vld [vmem:[#allocation8 + $0x178] sm:$0xff]  ;;  %v816_v41 = vld [vmem:[#allocation8 + $0x150] sm:$0xff] }
  0xba   :  { %3987 = vmatprep.subr.bf16.mxu1 %v5747_v47  ;;  %v818_v47 = vld [vmem:[#allocation8 + $0x160] sm:$0xff] }
  0xbb   :  { %1740 = vperm.xlu0 %5045, %v3710_v9   ;;  %v5774_v9 = vpack.c.bf16 %v821_v31, %v817_v24  ;;  %v822_v24 = vld [vmem:[#allocation8 + $0x180] sm:$0xff] }
  0xbc   :  { %3957 = vmatpush1.bf16.msra.mxu0 %v5750_v6  ;;  %v820_v6 = vld [vmem:[#allocation8 + $0x170] sm:$0xff]  ;;  %v826_v31 = vld [vmem:[#allocation8 + $0x1a0] sm:$0xff] }
  0xbd   :  { %3989 = vmatpush1.bf16.msra.mxu1 %v5755_v10  ;;  %3959 = vmatprep.subr.bf16.mxu0 %v5757_v16  ;;  %6644 = vst [vmem:[#allocation54_spill] sm:$0xff] %v5774_v9  ;;  %v5777_v16 = vpack.c.bf16 %v818_v47, %v814_v4  ;;  %v5781_v0 = vpack.c.bf16 %v820_v6, %v816_v41  ;;  %v833_v47 = vld [vmem:[#allocation8 + $0x1d8] sm:$0xff] }
  0xbe   :  { %3991 = vmatprep.subr.bf16.mxu1 %v5761_v28  ;;  %v831_v28 = vld [vmem:[#allocation8 + $0x1c8] sm:$0xff]  ;;  %v837_v4 = vld [vmem:[#allocation8 + $0x1f8] sm:$0xff] }
  0xbf   :  { %2104 = vperm.xlu0 %5045, %v3718_v54   ;;  %v828_v54 = vld [vmem:[#allocation8 + $0x1b0] sm:$0xff]  ;;  %v5798_v11 = vpack.c.bf16 %v837_v4, %v833_v47 }
  0xc0   :  { %3961 = vmatpush1.bf16.msra.mxu0 %v5764_v46  ;;  %v835_v46 = vld [vmem:[#allocation8 + $0x1e8] sm:$0xff]  ;;  %v5793_v41 = vpack.c.bf16 %v828_v54, %v824_v43  ;;  %v3722_v43 = vsel %vm2111_vm7, 1.0, %v6642_v51  ;;  %v218_v54 = vlaneseq }
  0xc1   :  { %3993 = vmatpush1.bf16.msra.mxu1 %v5769_v56  ;;  %3963 = vmatprep.subr.bf16.mxu0 %v5771_v61  ;;  %v5789_v56 = vpack.c.bf16 %v826_v31, %v822_v24  ;;  %v5795_v6 = vpack.c.bf16 %v835_v46, %v831_v28  ;;  %v5801_v24 = vpack.c.bf16 %v834_v63, %v830_v17  ;;  %v3702_v28 = vsel %vm1201_vm4, 1.0, %v6642_v51  ;;  %v216_v17 = vld [vmem:[%s6496_s3] sm:$0xff]  ;;  %s5433_s3 = smov [#allocation10]  }
  0xc2   :  { %3995 = vmatprep.subr.bf16.mxu1 %v5774_v9  ;;  %v836_v9 = vld [vmem:[#allocation8 + $0x1f0] sm:$0xff]  ;;  %1376 = vperm.xlu1 %5046, %v3702_v28   ;;  %v3706_v46 = vsel %vm1383_vm5, 1.0, %v6642_v51  ;;  %v219_v47 = vshrl.u32 %v218_v54, 7  ;;  %s3680_s25 = sshll.u32 %s5433_s3, 4  ;;  %s3681_s25 = int_to_ptr.vmem [resolvable:$true] %s3680_s25 }
  0xc3   :  { %v5805_v31 = vpack.c.bf16 %v836_v9, %v832_v19  ;;  %v3714_v9 = vsel %vm1747_vm6, 1.0, %v6642_v51  ;;  %s5391_s26 = scalar_lea.vmem %s3681_s25, 2048  ;;  %p5396_p5 = scmp.lt.s32.totalorder %s3681_s25, %s3681_s25 }
  0xc4   :  { %3965 = vmatpush1.bf16.msra.mxu0 %v5777_v16  ;;  %v220_v4 = vsub.s32 0, %v219_v47  ;;  %v224_v63 = vsub.s32 1, %v219_v47  ;;  %p5392_p4 = scmp.ne.s32.totalorder %s3681_s25, %s5391_s26  ;;  %p5397_p6 = scmp.lt.s32.totalorder %s5391_s26, %s5391_s26 }
  0xc5   :  { %3997 = vmatpush1.bf16.msra.mxu1 %v5781_v0  ;;  %3967 = vmatprep.subr.bf16.mxu0 %v5783_v20 }
  0xc6   :  { %3999 = vmatprep.subr.bf16.mxu1 %v5786_v36  ;;  %1558 = vperm.xlu1 %5046, %v3706_v46   ;;  %v5859_v19 = vrot.slane %v216_v17, %v220_v4  ;;  %v5861_v28 = vrot.slane %v216_v17, %v224_v63  ;;  %p5398_p7 = por %p5397_p6, %p5396_p5 }
  0xc8   :  { %3969 = vmatpush1.bf16.msra.mxu0 %v5789_v56  ;;  %6645 = vst [vmem:[#allocation55_spill] sm:$0xff] %v5859_v19  ;;  %6646 = vst [vmem:[#allocation56_spill] sm:$0xff] %v5861_v28  ;;  %p5399_p8 = pnand %p5398_p7, %p5392_p4 }
  0xc9   :  { %4001 = vmatpush1.bf16.msra.mxu1 %v5793_v41  ;;  %3971 = vmatprep.subr.bf16.mxu0 %v5795_v6 }
  0xca   :  { %4003 = vmatprep.subr.bf16.mxu1 %v5798_v11  ;;  %1922 = vperm.xlu1 %5046, %v3714_v9  }
  0xcc   :  { %3973 = vmatpush1.bf16.msra.mxu0 %v5801_v24 }
  0xcd   :  { %4005 = vmatpush1.bf16.msra.mxu1 %v5805_v31  ;;  %4007 = vmatprep.subr.bf16.mxu0 %v5565_v22 }
  0xce   :  { %4039 = vmatprep.subr.bf16.mxu1 %v5568_v26  ;;  %2286 = vperm.xlu1 %5046, %v3722_v43  }
  0xcf   :  { %1087 = vmatmul.mubr.f32.vlgmr.msra.gmra.mrb[30].mxu0 %v6642_v51 }
  0xd0   :  { %1158 = vmatmul.mubr.f32.vlgmr.msra.gmra.mrb[30].mxu1 %v6642_v51  ;;  %4009 = vmatpush1.bf16.msra.mxu0 %v5571_v29 }
  0xd1   :  { %4041 = vmatpush1.bf16.msra.mxu1 %v5574_v32  ;;  %4011 = vmatprep.subr.bf16.mxu0 %v5578_v35 }
  0xd2   :  { %4043 = vmatprep.subr.bf16.mxu1 %v5582_v39  ;;  %1268 = vmatprep.mubr.f32.mxu0 %v6642_v51 }
  0xd3   :  { %1339 = vmatprep.mubr.f32.mxu1 %v6642_v51 }
  0xd4   :  { %4013 = vmatpush1.bf16.msra.mxu0 %v5586_v42 }
  0xd5   :  { %4045 = vmatpush1.bf16.msra.mxu1 %v5590_v45  ;;  %4015 = vmatprep.subr.bf16.mxu0 %v5594_v49 }
  0xd6   :  { %4047 = vmatprep.subr.bf16.mxu1 %v5598_v52 }
  0xd8   :  { %4017 = vmatpush1.bf16.msra.mxu0 %v5602_v55 }
  0xd9   :  { %4049 = vmatpush1.bf16.msra.mxu1 %v5606_v58  ;;  %4019 = vmatprep.subr.bf16.mxu0 %v5610_v62 }
  0xda   :  { %4051 = vmatprep.subr.bf16.mxu1 %v5614_v2 }
  0xdc   :  { %4021 = vmatpush1.bf16.msra.mxu0 %v5618_v5 }
  0xdd   :  { %4053 = vmatpush1.bf16.msra.mxu1 %v5622_v8  ;;  %4023 = vmatprep.subr.bf16.mxu0 %v5626_v12 }
  0xde   :  { %4055 = vmatprep.subr.bf16.mxu1 %v5630_v14 }
  0xe0   :  { %4025 = vmatpush1.bf16.msra.mxu0 %v5634_v18 }
  0xe1   :  { %4057 = vmatpush1.bf16.msra.mxu1 %v5638_v21  ;;  %4027 = vmatprep.subr.bf16.mxu0 %v5642_v27 }
  0xe2   :  { %4059 = vmatprep.subr.bf16.mxu1 %v5646_v30 }
  0xe4   :  { %4029 = vmatpush1.bf16.msra.mxu0 %v5650_v34 }
  0xe5   :  { %4061 = vmatpush1.bf16.msra.mxu1 %v5654_v40  ;;  %4031 = vmatprep.subr.bf16.mxu0 %v5658_v44 }
  0xe6   :  { %4063 = vmatprep.subr.bf16.mxu1 %v5662_v48 }
  0xe8   :  { %4033 = vmatpush1.bf16.msra.mxu0 %v5666_v53 }
  0xe9   :  { %4065 = vmatpush1.bf16.msra.mxu1 %v5670_v57  ;;  %4035 = vmatprep.subr.bf16.mxu0 %v5674_v60  ;;  %v228_v60 = vsub.s32 2, %v219_v47 }
  0xea   :  { %4067 = vmatprep.subr.bf16.mxu1 %v5678_v3 }
  0xeb   :  { %v5868_v63 = vrot.slane %v216_v17, %v228_v60 }
  0xec   :  { %4037 = vmatpush1.bf16.msra.mxu0 %v5682_v7 }
  0xed   :  { %4069 = vmatpush1.bf16.msra.mxu1 %v5686_v13  ;;  %4071 = vmatprep.subr.bf16.mxu0 %v5690_v1  ;;  %6648 = vst [vmem:[#allocation58_spill] sm:$0xff] %v5868_v63 }
  0xee   :  { %4103 = vmatprep.subr.bf16.mxu1 %v5699_v23  ;;  %v232_v23 = vsub.s32 3, %v219_v47 }
  0xf0   :  { %v5865_v3 = vrot.slane %v216_v17, %v232_v23  ;;  %v236_v23 = vsub.s32 4, %v219_v47 }
  0xf2   :  { %6647 = vst [vmem:[#allocation57_spill] sm:$0xff] %v5865_v3  ;;  %v5871_v60 = vrot.slane %v216_v17, %v236_v23 }
  0xf4   :  { %6649 = vst [vmem:[#allocation59_spill] sm:$0xff] %v5871_v60 }
 0x182   :  { %v907_v46 = vpop.f32.mrb[0].mxu0 }
 0x183   :  { %v4902_v25 = vadd.f32 %v907_v46, %v5859_v19  ;;  %v978_v9 = vpop.f32.mrb[0].mxu1  ;;  %v909_v1 = vpop.f32.mrb[1].mxu0 }
 0x184   :  { %v4903_v43 = vadd.f32 %v909_v1, %v5861_v28  ;;  %v980_v13 = vpop.f32.mrb[1].mxu1  ;;  %v4918_v53 = vadd.f32 %v978_v9, %v5868_v63 }
 0x185   :  { %v3695_v54 = vmul.f32 -1.442695, %v4902_v25  ;;  %v4919_v4 = vadd.f32 %v980_v13, %v5865_v3 }
 0x186   :  { %v3696_v7 = vmul.f32 -1.442695, %v4903_v43  ;;  %v240_v43 = vsub.s32 5, %v219_v47 }
 0x187   :  { %5047 = vpow2.f32 %v3695_v54  ;;  %v3697_v57 = vmul.f32 -1.442695, %v4919_v4 }
 0x188   :  { %5049 = vpow2.f32 %v3696_v7  ;;  %v5873_v3 = vrot.slane %v216_v17, %v240_v43 }
 0x189   :  { %5051 = vpow2.f32 %v3697_v57 }
 0x18a   :  { %5053 = vtanh.f32 %v4918_v53  ;;  %6650 = vst [vmem:[#allocation60_spill] sm:$0xff] %v5873_v3 }
 0x191   :  { %v5048_v46 = vpop.eup %5047 }
 0x192   :  { %v5050_v19 = vpop.eup %5049  ;;  %v990_v48 = vadd.f32 1.0, %v5048_v46  ;;  %v248_v46 = vsub.s32 7, %v219_v47 }
 0x193   :  { %v996_v1 = vadd.f32 1.0, %v5050_v19  ;;  %v5052_v25 = vpop.eup %5051 }
 0x194   :  { %5055 = vrcp.f32 %v990_v48  ;;  %v5054_v54 = vpop.eup %5053  ;;  %v1003_v13 = vadd.f32 1.0, %v5052_v25 }
 0x195   :  { %5057 = vrcp.f32 %v996_v1 }
 0x196   :  { %5059 = vrcp.f32 %v1003_v13 }
 0x19e   :  { %v5056_v7 = vpop.eup %5055 }
 0x19f   :  { %v5058_v28 = vpop.eup %5057  ;;  %v1007_v4 = vmul.f32 %v5056_v7, %v5054_v54  ;;  %v5880_v54 = vrot.slane %v216_v17, %v248_v46 }
 0x1a0   :  { %v1006_v9 = vmul.f32 0.0, %v5058_v28  ;;  %v244_v28 = vsub.s32 6, %v219_v47  ;;  %v5060_v13 = vpop.eup %5059 }
 0x1a2   :  { %v1088_v63 = vpop.f32.mrb[30].mxu0  ;;  %v5875_v57 = vadd.f32 %v1007_v4, %v1006_v9  ;;  %v5883_v7 = vrot.slane %v216_v17, %v244_v28  ;;  %v6653_v17 = vld [vmem:[#allocation44_spill] sm:$0xff]  ;;  %v6656_v28 = vld [vmem:[#allocation47_spill] sm:$0xff] }
 0x1a3   :  { %v4948_v48 = vadd.f32 %v1088_v63, %v5871_v60  ;;  %v1159_v53 = vpop.f32.mrb[30].mxu1  ;;  %v1090_v19 = vpop.f32.mrb[31].mxu0 }
 0x1a4   :  { %v4949_v1 = vadd.f32 %v1090_v19, %v5873_v3  ;;  %v1161_v44 = vpop.f32.mrb[31].mxu1  ;;  %5061 = vtanh.f32 %v5875_v57  ;;  %v4964_v9 = vadd.f32 %v1159_v53, %v5883_v7  ;;  %v5886_v3 = vpop.permute.xlu0 %1013  ;;  %v6654_v53 = vld [vmem:[#allocation45_spill] sm:$0xff] }
 0x1a5   :  { %v3699_v23 = vmul.f32 -1.442695, %v4948_v48  ;;  %v4965_v43 = vadd.f32 %v1161_v44, %v5880_v54  ;;  %6651 = vst [vmem:[#allocation61_spill] sm:$0xff] %v5886_v3  ;;  %v6652_v44 = vld [vmem:[#allocation43_spill] sm:$0xff] }
 0x1a6   :  { %v3700_v25 = vmul.f32 -1.442695, %v4949_v1 }
 0x1a7   :  { %5063 = vpow2.f32 %v3699_v23  ;;  %v3701_v4 = vmul.f32 -1.442695, %v4965_v43  ;;  %v6655_v23 = vld [vmem:[#allocation46_spill] sm:$0xff]  ;;  %v6657_v43 = vld [vmem:[#allocation48_spill] sm:$0xff] }
 0x1a8   :  { %5065 = vpow2.f32 %v3700_v25 }
 0x1a9   :  { %5067 = vpow2.f32 %v3701_v4 }
 0x1aa   :  { %5069 = vtanh.f32 %v4964_v9 }
 0x1ae   :  { %v5062_v63 = vpop.eup %5061 }
 0x1af   :  { %v1010_v19 = vmul.f32 %v5062_v63, %v5060_v13 }
 0x1b1   :  { %v5064_v60 = vpop.eup %5063  ;;  %v1016_v48 = vmul.f32 %v5886_v3, %v1010_v19 }
 0x1b2   :  { %v5066_v46 = vpop.eup %5065  ;;  %v1171_v1 = vadd.f32 1.0, %v5064_v60 }
 0x1b3   :  { %v1177_v47 = vadd.f32 1.0, %v5066_v46  ;;  %1018 = vst [vmem:[#allocation10] sm:$0xff] %v1016_v48  ;;  %1269 = vmatmul.mubr.f32.vlgmr.msra.gmra.mrb[2].mxu0 %v1016_v48  ;;  %1340 = vmatmul.mubr.f32.vlgmr.msra.gmra.mrb[2].mxu1 %v1016_v48  ;;  %v5068_v60 = vpop.eup %5067  ;;  %v6658_v48 = vld [vmem:[#allocation49_spill] sm:$0xff]  ;;  %v6659_v46 = vld [vmem:[#allocation50_spill] sm:$0xff] }
 0x1b4   :  { %5071 = vrcp.f32 %v1171_v1  ;;  %4073 = vmatpush1.bf16.msra.mxu0 %v5703_v33  ;;  %4105 = vmatpush1.bf16.msra.mxu1 %v5707_v37  ;;  %v5070_v25 = vpop.eup %5069  ;;  %v1184_v4 = vadd.f32 1.0, %v5068_v60  ;;  %v6660_v1 = vld [vmem:[#allocation51_spill] sm:$0xff]  ;;  %v6663_v60 = vld [vmem:[#allocation54_spill] sm:$0xff] }
 0x1b5   :  { %5073 = vrcp.f32 %v1177_v47  ;;  %4075 = vmatprep.subr.bf16.mxu0 %v5709_v38  ;;  %4107 = vmatprep.subr.bf16.mxu1 %v5714_v15 }
 0x1b6   :  { %1450 = vmatprep.mubr.f32.mxu0 %v6642_v51  ;;  %1521 = vmatprep.mubr.f32.mxu1 %v6642_v51  ;;  %5075 = vrcp.f32 %v1184_v4  ;;  %v5922_v4 = vpop.permute.xlu0 %1194 }
 0x1b7   :  { %6664 = vst [vmem:[#allocation43_spill] sm:$0xff] %v5922_v4 }
 0x1b8   :  { %4077 = vmatpush1.bf16.msra.mxu0 %v5720_v59  ;;  %4109 = vmatpush1.bf16.msra.mxu1 %v5725_v50 }
 0x1b9   :  { %4079 = vmatprep.subr.bf16.mxu0 %v6652_v44  ;;  %4111 = vmatprep.subr.bf16.mxu1 %v6653_v17 }
 0x1bc   :  { %4081 = vmatpush1.bf16.msra.mxu0 %v6654_v53  ;;  %4113 = vmatpush1.bf16.msra.mxu1 %v6655_v23 }
 0x1bd   :  { %4083 = vmatprep.subr.bf16.mxu0 %v6656_v28  ;;  %4115 = vmatprep.subr.bf16.mxu1 %v6657_v43  ;;  %v6661_v28 = vld [vmem:[#allocation52_spill] sm:$0xff]  ;;  %v6662_v43 = vld [vmem:[#allocation53_spill] sm:$0xff] }
 0x1be   :  { %v5072_v13 = vpop.eup %5071 }
 0x1bf   :  { %v5074_v63 = vpop.eup %5073  ;;  %v1188_v9 = vmul.f32 %v5072_v13, %v5070_v25 }
 0x1c0   :  { %v1187_v19 = vmul.f32 0.0, %v5074_v63  ;;  %4085 = vmatpush1.bf16.msra.mxu0 %v6658_v48  ;;  %4117 = vmatpush1.bf16.msra.mxu1 %v5755_v10  ;;  %v5076_v25 = vpop.eup %5075 }
 0x1c1   :  { %4087 = vmatprep.subr.bf16.mxu0 %v6659_v46  ;;  %4119 = vmatprep.subr.bf16.mxu1 %v6660_v1 }
 0x1c2   :  { %v5907_v47 = vadd.f32 %v1188_v9, %v1187_v19  ;;  %v6665_v19 = vld [vmem:[#allocation33_spill] sm:$0xff] }
 0x1c4   :  { %5077 = vtanh.f32 %v5907_v47  ;;  %4089 = vmatpush1.bf16.msra.mxu0 %v6661_v28  ;;  %4121 = vmatpush1.bf16.msra.mxu1 %v6662_v43 }
 0x1c5   :  { %4091 = vmatprep.subr.bf16.mxu0 %v5771_v61  ;;  %4123 = vmatprep.subr.bf16.mxu1 %v6663_v60 }
 0x1c8   :  { %4093 = vmatpush1.bf16.msra.mxu0 %v5777_v16  ;;  %4125 = vmatpush1.bf16.msra.mxu1 %v5781_v0 }
 0x1c9   :  { %4095 = vmatprep.subr.bf16.mxu0 %v5783_v20  ;;  %4127 = vmatprep.subr.bf16.mxu1 %v5786_v36 }
 0x1cc   :  { %4097 = vmatpush1.bf16.msra.mxu0 %v5789_v56  ;;  %4129 = vmatpush1.bf16.msra.mxu1 %v5793_v41 }
 0x1cd   :  { %4099 = vmatprep.subr.bf16.mxu0 %v5795_v6  ;;  %4131 = vmatprep.subr.bf16.mxu1 %v5798_v11 }
 0x1ce   :  { %v5078_v13 = vpop.eup %5077 }
 0x1cf   :  { %v1191_v63 = vmul.f32 %v5078_v13, %v5076_v25  ;;  %v6666_v25 = vld [vmem:[#allocation34_spill] sm:$0xff]  ;;  %v6667_v13 = vld [vmem:[#allocation35_spill] sm:$0xff] }
 0x1d0   :  { %4101 = vmatpush1.bf16.msra.mxu0 %v5801_v24  ;;  %4133 = vmatpush1.bf16.msra.mxu1 %v5805_v31 }
 0x1d1   :  { %v1197_v9 = vmul.f32 %v5922_v4, %v1191_v63  ;;  %4135 = vmatprep.subr.bf16.mxu0 %v5565_v22  ;;  %4167 = vmatprep.subr.bf16.mxu1 %v5568_v26  ;;  %v6668_v63 = vld [vmem:[#allocation36_spill] sm:$0xff] }
 0x1d3   :  { %1200 = vst [vmem:[#allocation10 + $0x78] sm:$0xff] %v1197_v9  ;;  %1451 = vmatmul.mubr.f32.vlgmr.msra.gmra.mrb[28].mxu0 %v1197_v9  ;;  %1522 = vmatmul.mubr.f32.vlgmr.msra.gmra.mrb[28].mxu1 %v1197_v9  ;;  %v6669_v9 = vld [vmem:[#allocation37_spill] sm:$0xff] }
 0x1d4   :  { %4137 = vmatpush1.bf16.msra.mxu0 %v5571_v29  ;;  %4169 = vmatpush1.bf16.msra.mxu1 %v5574_v32 }
 0x1d5   :  { %4139 = vmatprep.subr.bf16.mxu0 %v5578_v35  ;;  %4171 = vmatprep.subr.bf16.mxu1 %v5582_v39 }
 0x1d6   :  { %1632 = vmatprep.mubr.f32.mxu0 %v6642_v51  ;;  %1703 = vmatprep.mubr.f32.mxu1 %v6642_v51 }
 0x1d8   :  { %4141 = vmatpush1.bf16.msra.mxu0 %v5586_v42  ;;  %4173 = vmatpush1.bf16.msra.mxu1 %v5590_v45 }
 0x1d9   :  { %4143 = vmatprep.subr.bf16.mxu0 %v5594_v49  ;;  %4175 = vmatprep.subr.bf16.mxu1 %v5598_v52 }
 0x1dc   :  { %4145 = vmatpush1.bf16.msra.mxu0 %v5602_v55  ;;  %4177 = vmatpush1.bf16.msra.mxu1 %v5606_v58 }
 0x1dd   :  { %4147 = vmatprep.subr.bf16.mxu0 %v5610_v62  ;;  %4179 = vmatprep.subr.bf16.mxu1 %v5614_v2 }
 0x1e0   :  { %4149 = vmatpush1.bf16.msra.mxu0 %v5618_v5  ;;  %4181 = vmatpush1.bf16.msra.mxu1 %v5622_v8  ;;  %v6676_v8 = vld [vmem:[#allocation56_spill] sm:$0xff] }
 0x1e1   :  { %4151 = vmatprep.subr.bf16.mxu0 %v5626_v12  ;;  %4183 = vmatprep.subr.bf16.mxu1 %v5630_v14  ;;  %v6675_v14 = vld [vmem:[#allocation55_spill] sm:$0xff] }
 0x1e4   :  { %4153 = vmatpush1.bf16.msra.mxu0 %v5634_v18  ;;  %4185 = vmatpush1.bf16.msra.mxu1 %v5638_v21  ;;  %v6670_v18 = vld [vmem:[#allocation38_spill] sm:$0xff]  ;;  %v6671_v21 = vld [vmem:[#allocation39_spill] sm:$0xff] }
 0x1e5   :  { %4155 = vmatprep.subr.bf16.mxu0 %v5642_v27  ;;  %4187 = vmatprep.subr.bf16.mxu1 %v5646_v30  ;;  %v6672_v27 = vld [vmem:[#allocation40_spill] sm:$0xff]  ;;  %v6673_v30 = vld [vmem:[#allocation41_spill] sm:$0xff] }
 0x1e8   :  { %4157 = vmatpush1.bf16.msra.mxu0 %v5650_v34  ;;  %4189 = vmatpush1.bf16.msra.mxu1 %v5654_v40  ;;  %v6674_v34 = vld [vmem:[#allocation42_spill] sm:$0xff] }
 0x1e9   :  { %4159 = vmatprep.subr.bf16.mxu0 %v6665_v19  ;;  %4191 = vmatprep.subr.bf16.mxu1 %v6666_v25 }
 0x1ec   :  { %4161 = vmatpush1.bf16.msra.mxu0 %v6667_v13  ;;  %4193 = vmatpush1.bf16.msra.mxu1 %v6668_v63 }
 0x1ed   :  { %4163 = vmatprep.subr.bf16.mxu0 %v6669_v9  ;;  %4195 = vmatprep.subr.bf16.mxu1 %v6670_v18  ;;  %v6677_v18 = vld [vmem:[#allocation57_spill] sm:$0xff] }
 0x1f0   :  { %4165 = vmatpush1.bf16.msra.mxu0 %v6671_v21  ;;  %4197 = vmatpush1.bf16.msra.mxu1 %v6672_v27  ;;  %v6678_v27 = vld [vmem:[#allocation58_spill] sm:$0xff] }
 0x1f1   :  { %4199 = vmatprep.subr.bf16.mxu0 %v6673_v30  ;;  %4231 = vmatprep.subr.bf16.mxu1 %v6674_v34 }
 0x286   :  { %v1270_v40 = vpop.f32.mrb[2].mxu0  ;;  %v1341_v19 = vpop.f32.mrb[2].mxu1 }
 0x287   :  { %v4904_v25 = vadd.f32 %v1270_v40, %v6675_v14  ;;  %v1272_v12 = vpop.f32.mrb[3].mxu0  ;;  %v1343_v13 = vpop.f32.mrb[3].mxu1  ;;  %v4920_v62 = vadd.f32 %v1341_v19, %v6678_v27 }
 0x288   :  { %v4905_v63 = vadd.f32 %v1272_v12, %v6676_v8  ;;  %v4921_v21 = vadd.f32 %v1343_v13, %v6677_v18 }
 0x289   :  { %v3703_v5 = vmul.f32 -1.442695, %v4904_v25 }
 0x28a   :  { %v3704_v9 = vmul.f32 -1.442695, %v4905_v63  ;;  %v3705_v2 = vmul.f32 -1.442695, %v4921_v21 }
 0x28b   :  { %5079 = vpow2.f32 %v3703_v5  ;;  %v1017_v5 = vmul.f32 %v5886_v3, %v5875_v57 }
 0x28c   :  { %5081 = vpow2.f32 %v3704_v9 }
 0x28d   :  { %5083 = vpow2.f32 %v3705_v2  ;;  %v6679_v2 = vld [vmem:[#allocation59_spill] sm:$0xff] }
 0x28e   :  { %5085 = vtanh.f32 %v4920_v62 }
 0x295   :  { %v5080_v30 = vpop.eup %5079 }
 0x296   :  { %v5082_v58 = vpop.eup %5081  ;;  %v1353_v34 = vadd.f32 1.0, %v5080_v30 }
 0x297   :  { %v1359_v55 = vadd.f32 1.0, %v5082_v58  ;;  %v5084_v40 = vpop.eup %5083 }
 0x298   :  { %5087 = vrcp.f32 %v1353_v34  ;;  %v5086_v14 = vpop.eup %5085  ;;  %v1366_v63 = vadd.f32 1.0, %v5084_v40 }
 0x299   :  { %5089 = vrcp.f32 %v1359_v55  ;;  %v6680_v55 = vld [vmem:[#allocation60_spill] sm:$0xff] }
 0x29a   :  { %5091 = vrcp.f32 %v1366_v63  ;;  %v5976_v63 = vpop.permute.xlu1 %1376 }
 0x29b   :  { %6681 = vst [vmem:[#allocation44_spill] sm:$0xff] %v5976_v63 }
 0x2a2   :  { %v5088_v12 = vpop.eup %5087 }
 0x2a3   :  { %v5090_v25 = vpop.eup %5089  ;;  %v1370_v13 = vmul.f32 %v5088_v12, %v5086_v14 }
 0x2a4   :  { %v1369_v21 = vmul.f32 %v5090_v25, %v1017_v5  ;;  %v5092_v57 = vpop.eup %5091 }
 0x2a6   :  { %v1452_v9 = vpop.f32.mrb[28].mxu0  ;;  %v1523_v19 = vpop.f32.mrb[28].mxu1  ;;  %v5969_v27 = vadd.f32 %v1370_v13, %v1369_v21 }
 0x2a7   :  { %v4946_v62 = vadd.f32 %v1452_v9, %v6679_v2  ;;  %v1454_v58 = vpop.f32.mrb[29].mxu0  ;;  %v1525_v30 = vpop.f32.mrb[29].mxu1  ;;  %v4962_v5 = vadd.f32 %v1523_v19, %v5883_v7  ;;  %v6682_v19 = vld [vmem:[#allocation47_spill] sm:$0xff] }
 0x2a8   :  { %5093 = vtanh.f32 %v5969_v27  ;;  %v4947_v34 = vadd.f32 %v1454_v58, %v6680_v55  ;;  %v4963_v14 = vadd.f32 %v1525_v30, %v5880_v54  ;;  %v1198_v30 = vmul.f32 %v5922_v4, %v5907_v47  ;;  %v6699_v4 = vld [vmem:[#allocation33_spill] sm:$0xff] }
 0x2a9   :  { %v3707_v18 = vmul.f32 -1.442695, %v4946_v62  ;;  %v6683_v62 = vld [vmem:[#allocation48_spill] sm:$0xff] }
 0x2aa   :  { %v3708_v8 = vmul.f32 -1.442695, %v4947_v34  ;;  %v3709_v12 = vmul.f32 -1.442695, %v4963_v14 }
 0x2ab   :  { %5095 = vpow2.f32 %v3707_v18 }
 0x2ac   :  { %5097 = vpow2.f32 %v3708_v8 }
 0x2ad   :  { %5099 = vpow2.f32 %v3709_v12 }
 0x2ae   :  { %5101 = vtanh.f32 %v4962_v5 }
 0x2b2   :  { %v5094_v40 = vpop.eup %5093 }
 0x2b3   :  { %v1373_v25 = vmul.f32 %v5094_v40, %v5092_v57 }
 0x2b5   :  { %v5096_v13 = vpop.eup %5095  ;;  %v1379_v21 = vmul.f32 %v5976_v63, %v1373_v25 }
 0x2b6   :  { %v5098_v9 = vpop.eup %5097  ;;  %v1535_v3 = vadd.f32 1.0, %v5096_v13  ;;  %v6014_v13 = vpop.permute.xlu1 %1558 }
 0x2b7   :  { %1382 = vst [vmem:[#allocation10 + $0x10] sm:$0xff] %v1379_v21  ;;  %v1541_v18 = vadd.f32 1.0, %v5098_v9  ;;  %1633 = vmatmul.mubr.f32.vlgmr.msra.gmra.mrb[4].mxu0 %v1379_v21  ;;  %1704 = vmatmul.mubr.f32.vlgmr.msra.gmra.mrb[4].mxu1 %v1379_v21  ;;  %v5100_v8 = vpop.eup %5099  ;;  %6684 = vst [vmem:[#allocation45_spill] sm:$0xff] %v6014_v13  ;;  %v6685_v9 = vld [vmem:[#allocation19_spill] sm:$0xff] }
 0x2b8   :  { %5103 = vrcp.f32 %v1535_v3  ;;  %4201 = vmatpush1.bf16.msra.mxu0 %v5703_v33  ;;  %4233 = vmatpush1.bf16.msra.mxu1 %v5707_v37  ;;  %v5102_v3 = vpop.eup %5101  ;;  %v1548_v14 = vadd.f32 1.0, %v5100_v8  ;;  %v6687_v8 = vld [vmem:[#allocation21_spill] sm:$0xff] }
 0x2b9   :  { %5105 = vrcp.f32 %v1541_v18  ;;  %4203 = vmatprep.subr.bf16.mxu0 %v5709_v38  ;;  %4235 = vmatprep.subr.bf16.mxu1 %v5714_v15  ;;  %v6686_v18 = vld [vmem:[#allocation20_spill] sm:$0xff] }
 0x2ba   :  { %1814 = vmatprep.mubr.f32.mxu0 %v6642_v51  ;;  %1885 = vmatprep.mubr.f32.mxu1 %v6642_v51  ;;  %5107 = vrcp.f32 %v1548_v14  ;;  %v6692_v14 = vld [vmem:[#allocation26_spill] sm:$0xff] }
 0x2bc   :  { %4205 = vmatpush1.bf16.msra.mxu0 %v5720_v59  ;;  %4237 = vmatpush1.bf16.msra.mxu1 %v5725_v50 }
 0x2bd   :  { %4207 = vmatprep.subr.bf16.mxu0 %v6652_v44  ;;  %4239 = vmatprep.subr.bf16.mxu1 %v6653_v17 }
 0x2c0   :  { %4209 = vmatpush1.bf16.msra.mxu0 %v6654_v53  ;;  %4241 = vmatpush1.bf16.msra.mxu1 %v6655_v23 }
 0x2c1   :  { %4211 = vmatprep.subr.bf16.mxu0 %v6682_v19  ;;  %4243 = vmatprep.subr.bf16.mxu1 %v6683_v62 }
 0x2c2   :  { %v5104_v58 = vpop.eup %5103 }
 0x2c3   :  { %v5106_v34 = vpop.eup %5105  ;;  %v1552_v57 = vmul.f32 %v5104_v58, %v5102_v3  ;;  %v6688_v3 = vld [vmem:[#allocation22_spill] sm:$0xff]  ;;  %v6689_v58 = vld [vmem:[#allocation23_spill] sm:$0xff] }
 0x2c4   :  { %v1551_v40 = vmul.f32 %v5106_v34, %v1198_v30  ;;  %4213 = vmatpush1.bf16.msra.mxu0 %v6658_v48  ;;  %4245 = vmatpush1.bf16.msra.mxu1 %v5755_v10  ;;  %v5108_v47 = vpop.eup %5107  ;;  %v6690_v30 = vld [vmem:[#allocation24_spill] sm:$0xff]  ;;  %v6691_v34 = vld [vmem:[#allocation25_spill] sm:$0xff] }
 0x2c5   :  { %4215 = vmatprep.subr.bf16.mxu0 %v6659_v46  ;;  %4247 = vmatprep.subr.bf16.mxu1 %v6660_v1 }
 0x2c6   :  { %v5999_v12 = vadd.f32 %v1552_v57, %v1551_v40  ;;  %v6693_v57 = vld [vmem:[#allocation27_spill] sm:$0xff]  ;;  %v6694_v40 = vld [vmem:[#allocation28_spill] sm:$0xff] }
 0x2c8   :  { %5109 = vtanh.f32 %v5999_v12  ;;  %4217 = vmatpush1.bf16.msra.mxu0 %v6661_v28  ;;  %4249 = vmatpush1.bf16.msra.mxu1 %v6662_v43 }
 0x2c9   :  { %4219 = vmatprep.subr.bf16.mxu0 %v5771_v61  ;;  %4251 = vmatprep.subr.bf16.mxu1 %v6663_v60 }
 0x2cc   :  { %4221 = vmatpush1.bf16.msra.mxu0 %v5777_v16  ;;  %4253 = vmatpush1.bf16.msra.mxu1 %v5781_v0 }
 0x2cd   :  { %4223 = vmatprep.subr.bf16.mxu0 %v5783_v20  ;;  %4255 = vmatprep.subr.bf16.mxu1 %v5786_v36 }
 0x2d0   :  { %4225 = vmatpush1.bf16.msra.mxu0 %v5789_v56  ;;  %4257 = vmatpush1.bf16.msra.mxu1 %v5793_v41 }
 0x2d1   :  { %4227 = vmatprep.subr.bf16.mxu0 %v5795_v6  ;;  %4259 = vmatprep.subr.bf16.mxu1 %v5798_v11 }
 0x2d2   :  { %v5110_v5 = vpop.eup %5109 }
 0x2d3   :  { %v1555_v25 = vmul.f32 %v5110_v5, %v5108_v47  ;;  %v6695_v47 = vld [vmem:[#allocation29_spill] sm:$0xff]  ;;  %v6696_v5 = vld [vmem:[#allocation30_spill] sm:$0xff] }
 0x2d4   :  { %4229 = vmatpush1.bf16.msra.mxu0 %v5801_v24  ;;  %4261 = vmatpush1.bf16.msra.mxu1 %v5805_v31 }
 0x2d5   :  { %v1561_v21 = vmul.f32 %v6014_v13, %v1555_v25  ;;  %4263 = vmatprep.subr.bf16.mxu0 %v5565_v22  ;;  %4295 = vmatprep.subr.bf16.mxu1 %v5568_v26  ;;  %v6697_v25 = vld [vmem:[#allocation31_spill] sm:$0xff] }
 0x2d7   :  { %1564 = vst [vmem:[#allocation10 + $0x68] sm:$0xff] %v1561_v21  ;;  %1815 = vmatmul.mubr.f32.vlgmr.msra.gmra.mrb[26].mxu0 %v1561_v21  ;;  %1886 = vmatmul.mubr.f32.vlgmr.msra.gmra.mrb[26].mxu1 %v1561_v21  ;;  %v6698_v21 = vld [vmem:[#allocation32_spill] sm:$0xff] }
 0x2d8   :  { %4265 = vmatpush1.bf16.msra.mxu0 %v5571_v29  ;;  %4297 = vmatpush1.bf16.msra.mxu1 %v5574_v32 }
 0x2d9   :  { %4267 = vmatprep.subr.bf16.mxu0 %v5578_v35  ;;  %4299 = vmatprep.subr.bf16.mxu1 %v5582_v39 }
 0x2da   :  { %1996 = vmatprep.mubr.f32.mxu0 %v6642_v51  ;;  %2067 = vmatprep.mubr.f32.mxu1 %v6642_v51 }
 0x2dc   :  { %4269 = vmatpush1.bf16.msra.mxu0 %v5586_v42  ;;  %4301 = vmatpush1.bf16.msra.mxu1 %v5590_v45 }
 0x2dd   :  { %4271 = vmatprep.subr.bf16.mxu0 %v5594_v49  ;;  %4303 = vmatprep.subr.bf16.mxu1 %v5598_v52 }
 0x2e0   :  { %4273 = vmatpush1.bf16.msra.mxu0 %v6685_v9  ;;  %4305 = vmatpush1.bf16.msra.mxu1 %v6686_v18  ;;  %v6710_v18 = vld [vmem:[#allocation56_spill] sm:$0xff] }
 0x2e1   :  { %4275 = vmatprep.subr.bf16.mxu0 %v6687_v8  ;;  %4307 = vmatprep.subr.bf16.mxu1 %v6688_v3  ;;  %v6709_v3 = vld [vmem:[#allocation55_spill] sm:$0xff] }
 0x2e4   :  { %4277 = vmatpush1.bf16.msra.mxu0 %v6689_v58  ;;  %4309 = vmatpush1.bf16.msra.mxu1 %v6690_v30  ;;  %v6700_v58 = vld [vmem:[#allocation34_spill] sm:$0xff]  ;;  %v6701_v30 = vld [vmem:[#allocation35_spill] sm:$0xff] }
 0x2e5   :  { %4279 = vmatprep.subr.bf16.mxu0 %v6691_v34  ;;  %4311 = vmatprep.subr.bf16.mxu1 %v6692_v14  ;;  %v6702_v34 = vld [vmem:[#allocation36_spill] sm:$0xff]  ;;  %v6703_v14 = vld [vmem:[#allocation37_spill] sm:$0xff] }
 0x2e8   :  { %4281 = vmatpush1.bf16.msra.mxu0 %v6693_v57  ;;  %4313 = vmatpush1.bf16.msra.mxu1 %v6694_v40  ;;  %v6704_v57 = vld [vmem:[#allocation38_spill] sm:$0xff]  ;;  %v6705_v40 = vld [vmem:[#allocation39_spill] sm:$0xff] }
 0x2e9   :  { %4283 = vmatprep.subr.bf16.mxu0 %v6695_v47  ;;  %4315 = vmatprep.subr.bf16.mxu1 %v6696_v5  ;;  %v6706_v47 = vld [vmem:[#allocation40_spill] sm:$0xff]  ;;  %v6707_v5 = vld [vmem:[#allocation41_spill] sm:$0xff] }
 0x2ec   :  { %4285 = vmatpush1.bf16.msra.mxu0 %v6697_v25  ;;  %4317 = vmatpush1.bf16.msra.mxu1 %v6698_v21  ;;  %v6708_v25 = vld [vmem:[#allocation42_spill] sm:$0xff] }
 0x2ed   :  { %4287 = vmatprep.subr.bf16.mxu0 %v6699_v4  ;;  %4319 = vmatprep.subr.bf16.mxu1 %v6700_v58 }
 0x2f0   :  { %4289 = vmatpush1.bf16.msra.mxu0 %v6701_v30  ;;  %4321 = vmatpush1.bf16.msra.mxu1 %v6702_v34 }
 0x2f1   :  { %4291 = vmatprep.subr.bf16.mxu0 %v6703_v14  ;;  %4323 = vmatprep.subr.bf16.mxu1 %v6704_v57  ;;  %v6711_v57 = vld [vmem:[#allocation57_spill] sm:$0xff] }
 0x2f4   :  { %4293 = vmatpush1.bf16.msra.mxu0 %v6705_v40  ;;  %4325 = vmatpush1.bf16.msra.mxu1 %v6706_v47  ;;  %v6712_v47 = vld [vmem:[#allocation58_spill] sm:$0xff] }
 0x2f5   :  { %4327 = vmatprep.subr.bf16.mxu0 %v6707_v5  ;;  %4359 = vmatprep.subr.bf16.mxu1 %v6708_v25 }
 0x38a   :  { %v1634_v21 = vpop.f32.mrb[4].mxu0  ;;  %v1705_v4 = vpop.f32.mrb[4].mxu1 }
 0x38b   :  { %v4906_v58 = vadd.f32 %v1634_v21, %v6709_v3  ;;  %v1636_v8 = vpop.f32.mrb[5].mxu0  ;;  %v1707_v30 = vpop.f32.mrb[5].mxu1  ;;  %v4922_v49 = vadd.f32 %v1705_v4, %v6712_v47 }
 0x38c   :  { %v4907_v34 = vadd.f32 %v1636_v8, %v6710_v18  ;;  %v4923_v40 = vadd.f32 %v1707_v30, %v6711_v57 }
 0x38d   :  { %v3711_v9 = vmul.f32 -1.442695, %v4906_v58 }
 0x38e   :  { %v3712_v14 = vmul.f32 -1.442695, %v4907_v34  ;;  %v3713_v52 = vmul.f32 -1.442695, %v4923_v40 }
 0x38f   :  { %5111 = vpow2.f32 %v3711_v9  ;;  %v1380_v9 = vmul.f32 %v5976_v63, %v5969_v27 }
 0x390   :  { %5113 = vpow2.f32 %v3712_v14 }
 0x391   :  { %5115 = vpow2.f32 %v3713_v52 }
 0x392   :  { %5117 = vtanh.f32 %v4922_v49 }
 0x399   :  { %v5112_v5 = vpop.eup %5111 }
 0x39a   :  { %v5114_v45 = vpop.eup %5113  ;;  %v1717_v25 = vadd.f32 1.0, %v5112_v5 }
 0x39b   :  { %v1723_v42 = vadd.f32 1.0, %v5114_v45  ;;  %v5116_v21 = vpop.eup %5115 }
 0x39c   :  { %5119 = vrcp.f32 %v1717_v25  ;;  %v5118_v3 = vpop.eup %5117  ;;  %v1730_v30 = vadd.f32 1.0, %v5116_v21 }
 0x39d   :  { %5121 = vrcp.f32 %v1723_v42 }
 0x39e   :  { %5123 = vrcp.f32 %v1730_v30 }
 0x3a6   :  { %v5120_v8 = vpop.eup %5119 }
 0x3a7   :  { %v5122_v58 = vpop.eup %5121  ;;  %v1734_v34 = vmul.f32 %v5120_v8, %v5118_v3 }
 0x3a8   :  { %v1733_v14 = vmul.f32 %v5122_v58, %v1380_v9  ;;  %v5124_v3 = vpop.eup %5123 }
 0x3aa   :  { %v6061_v40 = vadd.f32 %v1734_v34, %v1733_v14  ;;  %v1816_v4 = vpop.f32.mrb[26].mxu0  ;;  %v1887_v47 = vpop.f32.mrb[26].mxu1 }
 0x3ab   :  { %v4944_v49 = vadd.f32 %v1816_v4, %v6679_v2  ;;  %v1818_v45 = vpop.f32.mrb[27].mxu0  ;;  %v1889_v52 = vpop.f32.mrb[27].mxu1  ;;  %v4960_v9 = vadd.f32 %v1887_v47, %v5883_v7 }
 0x3ac   :  { %5125 = vtanh.f32 %v6061_v40  ;;  %v4945_v42 = vadd.f32 %v1818_v45, %v6680_v55  ;;  %v4961_v27 = vadd.f32 %v1889_v52, %v5880_v54  ;;  %v6068_v34 = vpop.permute.xlu0 %1740  ;;  %v1562_v52 = vmul.f32 %v6014_v13, %v5999_v12  ;;  %v6731_v13 = vld [vmem:[#allocation31_spill] sm:$0xff] }
 0x3ad   :  { %v3715_v5 = vmul.f32 -1.442695, %v4944_v49  ;;  %6713 = vst [vmem:[#allocation46_spill] sm:$0xff] %v6068_v34 }
 0x3ae   :  { %v3716_v25 = vmul.f32 -1.442695, %v4945_v42  ;;  %v3717_v8 = vmul.f32 -1.442695, %v4961_v27 }
 0x3af   :  { %5127 = vpow2.f32 %v3715_v5 }
 0x3b0   :  { %5129 = vpow2.f32 %v3716_v25 }
 0x3b1   :  { %5131 = vpow2.f32 %v3717_v8 }
 0x3b2   :  { %5133 = vtanh.f32 %v4960_v9  ;;  %v6106_v9 = vpop.permute.xlu1 %1922 }
 0x3b3   :  { %6714 = vst [vmem:[#allocation49_spill] sm:$0xff] %v6106_v9 }
 0x3b6   :  { %v5126_v21 = vpop.eup %5125 }
 0x3b7   :  { %v1737_v58 = vmul.f32 %v5126_v21, %v5124_v3 }
 0x3b9   :  { %v5128_v30 = vpop.eup %5127  ;;  %v1743_v14 = vmul.f32 %v6068_v34, %v1737_v58 }
 0x3ba   :  { %v5130_v4 = vpop.eup %5129  ;;  %v1899_v63 = vadd.f32 1.0, %v5128_v30  ;;  %v6715_v30 = vld [vmem:[#allocation15_spill] sm:$0xff] }
 0x3bb   :  { %v1905_v49 = vadd.f32 1.0, %v5130_v4  ;;  %1746 = vst [vmem:[#allocation10 + $0x20] sm:$0xff] %v1743_v14  ;;  %1997 = vmatmul.mubr.f32.vlgmr.msra.gmra.mrb[6].mxu0 %v1743_v14  ;;  %2068 = vmatmul.mubr.f32.vlgmr.msra.gmra.mrb[6].mxu1 %v1743_v14  ;;  %v6716_v14 = vld [vmem:[#allocation16_spill] sm:$0xff]  ;;  %v6717_v4 = vld [vmem:[#allocation17_spill] sm:$0xff] }
 0x3bc   :  { %5135 = vrcp.f32 %v1899_v63  ;;  %4329 = vmatpush1.bf16.msra.mxu0 %v5703_v33  ;;  %4361 = vmatpush1.bf16.msra.mxu1 %v5707_v37  ;;  %v5132_v63 = vpop.eup %5131 }
 0x3bd   :  { %5137 = vrcp.f32 %v1905_v49  ;;  %4331 = vmatprep.subr.bf16.mxu0 %v5709_v38  ;;  %4363 = vmatprep.subr.bf16.mxu1 %v5714_v15  ;;  %v5134_v47 = vpop.eup %5133  ;;  %v1912_v25 = vadd.f32 1.0, %v5132_v63  ;;  %v6718_v49 = vld [vmem:[#allocation18_spill] sm:$0xff]  ;;  %v6719_v63 = vld [vmem:[#allocation19_spill] sm:$0xff] }
 0x3be   :  { %2178 = vmatprep.mubr.f32.mxu0 %v6642_v51  ;;  %2249 = vmatprep.mubr.f32.mxu1 %v6642_v51 }
 0x3bf   :  { %5139 = vrcp.f32 %v1912_v25  ;;  %v6725_v25 = vld [vmem:[#allocation25_spill] sm:$0xff] }
 0x3c0   :  { %4333 = vmatpush1.bf16.msra.mxu0 %v5720_v59  ;;  %4365 = vmatpush1.bf16.msra.mxu1 %v5725_v50 }
 0x3c1   :  { %4335 = vmatprep.subr.bf16.mxu0 %v6652_v44  ;;  %4367 = vmatprep.subr.bf16.mxu1 %v6653_v17 }
 0x3c4   :  { %4337 = vmatpush1.bf16.msra.mxu0 %v6654_v53  ;;  %4369 = vmatpush1.bf16.msra.mxu1 %v6655_v23 }
 0x3c5   :  { %4339 = vmatprep.subr.bf16.mxu0 %v6682_v19  ;;  %4371 = vmatprep.subr.bf16.mxu1 %v6683_v62 }
 0x3c6   :  { %v5136_v45 = vpop.eup %5135 }
 0x3c7   :  { %v5138_v42 = vpop.eup %5137  ;;  %v1916_v5 = vmul.f32 %v5136_v45, %v5134_v47  ;;  %v6720_v47 = vld [vmem:[#allocation20_spill] sm:$0xff]  ;;  %v6721_v45 = vld [vmem:[#allocation21_spill] sm:$0xff] }
 0x3c8   :  { %v1915_v27 = vmul.f32 %v5138_v42, %v1562_v52  ;;  %4341 = vmatpush1.bf16.msra.mxu0 %v6658_v48  ;;  %4373 = vmatpush1.bf16.msra.mxu1 %v5755_v10  ;;  %v6722_v52 = vld [vmem:[#allocation22_spill] sm:$0xff]  ;;  %v6723_v42 = vld [vmem:[#allocation23_spill] sm:$0xff] }
 0x3c9   :  { %4343 = vmatprep.subr.bf16.mxu0 %v6659_v46  ;;  %4375 = vmatprep.subr.bf16.mxu1 %v6660_v1  ;;  %v5140_v12 = vpop.eup %5139 }
 0x3ca   :  { %v6091_v3 = vadd.f32 %v1916_v5, %v1915_v27  ;;  %v6724_v5 = vld [vmem:[#allocation24_spill] sm:$0xff]  ;;  %v6726_v27 = vld [vmem:[#allocation26_spill] sm:$0xff] }
 0x3cc   :  { %5141 = vtanh.f32 %v6091_v3  ;;  %4345 = vmatpush1.bf16.msra.mxu0 %v6661_v28  ;;  %4377 = vmatpush1.bf16.msra.mxu1 %v6662_v43 }
 0x3cd   :  { %4347 = vmatprep.subr.bf16.mxu0 %v5771_v61  ;;  %4379 = vmatprep.subr.bf16.mxu1 %v6663_v60 }
 0x3d0   :  { %4349 = vmatpush1.bf16.msra.mxu0 %v5777_v16  ;;  %4381 = vmatpush1.bf16.msra.mxu1 %v5781_v0 }
 0x3d1   :  { %4351 = vmatprep.subr.bf16.mxu0 %v5783_v20  ;;  %4383 = vmatprep.subr.bf16.mxu1 %v5786_v36 }
 0x3d4   :  { %4353 = vmatpush1.bf16.msra.mxu0 %v5789_v56  ;;  %4385 = vmatpush1.bf16.msra.mxu1 %v5793_v41 }
 0x3d5   :  { %4355 = vmatprep.subr.bf16.mxu0 %v5795_v6  ;;  %4387 = vmatprep.subr.bf16.mxu1 %v5798_v11 }
 0x3d6   :  { %v5142_v21 = vpop.eup %5141 }
 0x3d7   :  { %v1919_v8 = vmul.f32 %v5142_v21, %v5140_v12  ;;  %v6727_v12 = vld [vmem:[#allocation27_spill] sm:$0xff]  ;;  %v6728_v21 = vld [vmem:[#allocation28_spill] sm:$0xff] }
 0x3d8   :  { %4357 = vmatpush1.bf16.msra.mxu0 %v5801_v24  ;;  %4389 = vmatpush1.bf16.msra.mxu1 %v5805_v31 }
 0x3d9   :  { %v1925_v58 = vmul.f32 %v6106_v9, %v1919_v8  ;;  %4391 = vmatprep.subr.bf16.mxu0 %v5565_v22  ;;  %4423 = vmatprep.subr.bf16.mxu1 %v5568_v26  ;;  %v6729_v8 = vld [vmem:[#allocation29_spill] sm:$0xff] }
 0x3db   :  { %1928 = vst [vmem:[#allocation10 + $0x58] sm:$0xff] %v1925_v58  ;;  %2179 = vmatmul.mubr.f32.vlgmr.msra.gmra.mrb[24].mxu0 %v1925_v58  ;;  %2250 = vmatmul.mubr.f32.vlgmr.msra.gmra.mrb[24].mxu1 %v1925_v58  ;;  %v6730_v58 = vld [vmem:[#allocation30_spill] sm:$0xff] }
 0x3dc   :  { %4393 = vmatpush1.bf16.msra.mxu0 %v5571_v29  ;;  %4425 = vmatpush1.bf16.msra.mxu1 %v5574_v32 }
 0x3dd   :  { %4395 = vmatprep.subr.bf16.mxu0 %v5578_v35  ;;  %4427 = vmatprep.subr.bf16.mxu1 %v5582_v39 }
 0x3de   :  { %2357 = vmatprep.mubr.f32.mxu0 %v6642_v51  ;;  %2428 = vmatprep.mubr.f32.mxu1 %v6642_v51 }
 0x3e0   :  { %4397 = vmatpush1.bf16.msra.mxu0 %v6715_v30  ;;  %4429 = vmatpush1.bf16.msra.mxu1 %v6716_v14 }
 0x3e1   :  { %4399 = vmatprep.subr.bf16.mxu0 %v6717_v4  ;;  %4431 = vmatprep.subr.bf16.mxu1 %v6718_v49 }
 0x3e4   :  { %4401 = vmatpush1.bf16.msra.mxu0 %v6719_v63  ;;  %4433 = vmatpush1.bf16.msra.mxu1 %v6720_v47  ;;  %v6743_v47 = vld [vmem:[#allocation55_spill] sm:$0xff] }
 0x3e5   :  { %4403 = vmatprep.subr.bf16.mxu0 %v6721_v45  ;;  %4435 = vmatprep.subr.bf16.mxu1 %v6722_v52  ;;  %v6732_v45 = vld [vmem:[#allocation32_spill] sm:$0xff]  ;;  %v6733_v52 = vld [vmem:[#allocation33_spill] sm:$0xff] }
 0x3e8   :  { %4405 = vmatpush1.bf16.msra.mxu0 %v6723_v42  ;;  %4437 = vmatpush1.bf16.msra.mxu1 %v6724_v5  ;;  %v6734_v42 = vld [vmem:[#allocation34_spill] sm:$0xff]  ;;  %v6735_v5 = vld [vmem:[#allocation35_spill] sm:$0xff] }
 0x3e9   :  { %4407 = vmatprep.subr.bf16.mxu0 %v6725_v25  ;;  %4439 = vmatprep.subr.bf16.mxu1 %v6726_v27  ;;  %v6736_v25 = vld [vmem:[#allocation36_spill] sm:$0xff]  ;;  %v6737_v27 = vld [vmem:[#allocation37_spill] sm:$0xff] }
 0x3ec   :  { %4409 = vmatpush1.bf16.msra.mxu0 %v6727_v12  ;;  %4441 = vmatpush1.bf16.msra.mxu1 %v6728_v21  ;;  %v6738_v12 = vld [vmem:[#allocation38_spill] sm:$0xff]  ;;  %v6739_v21 = vld [vmem:[#allocation39_spill] sm:$0xff] }
 0x3ed   :  { %4411 = vmatprep.subr.bf16.mxu0 %v6729_v8  ;;  %4443 = vmatprep.subr.bf16.mxu1 %v6730_v58  ;;  %v6740_v8 = vld [vmem:[#allocation40_spill] sm:$0xff]  ;;  %v6741_v58 = vld [vmem:[#allocation41_spill] sm:$0xff] }
 0x3f0   :  { %4413 = vmatpush1.bf16.msra.mxu0 %v6731_v13  ;;  %4445 = vmatpush1.bf16.msra.mxu1 %v6732_v45  ;;  %v6742_v13 = vld [vmem:[#allocation42_spill] sm:$0xff] }
 0x3f1   :  { %4415 = vmatprep.subr.bf16.mxu0 %v6733_v52  ;;  %4447 = vmatprep.subr.bf16.mxu1 %v6734_v42 }
 0x3f4   :  { %4417 = vmatpush1.bf16.msra.mxu0 %v6735_v5  ;;  %4449 = vmatpush1.bf16.msra.mxu1 %v6736_v25 }
 0x3f5   :  { %4419 = vmatprep.subr.bf16.mxu0 %v6737_v27  ;;  %4451 = vmatprep.subr.bf16.mxu1 %v6738_v12 }
 0x3f8   :  { %4421 = vmatpush1.bf16.msra.mxu0 %v6739_v21  ;;  %4453 = vmatpush1.bf16.msra.mxu1 %v6740_v8  ;;  %v6744_v8 = vld [vmem:[#allocation58_spill] sm:$0xff] }
 0x3f9   :  { %4455 = vmatprep.subr.bf16.mxu0 %v6741_v58  ;;  %4487 = vmatprep.subr.bf16.mxu1 %v6742_v13 }
 0x48e   :  { %v1998_v45 = vpop.f32.mrb[6].mxu0  ;;  %v2069_v52 = vpop.f32.mrb[6].mxu1 }
 0x48f   :  { %v4908_v42 = vadd.f32 %v1998_v45, %v6743_v47  ;;  %v2000_v63 = vpop.f32.mrb[7].mxu0  ;;  %v2071_v5 = vpop.f32.mrb[7].mxu1  ;;  %v4924_v4 = vadd.f32 %v2069_v52, %v6744_v8 }
 0x490   :  { %v4909_v25 = vadd.f32 %v2000_v63, %v6710_v18  ;;  %v4925_v21 = vadd.f32 %v2071_v5, %v6711_v57 }
 0x491   :  { %v3719_v49 = vmul.f32 -1.442695, %v4908_v42 }
 0x492   :  { %v3720_v27 = vmul.f32 -1.442695, %v4909_v25  ;;  %v3721_v12 = vmul.f32 -1.442695, %v4925_v21 }
 0x493   :  { %5143 = vpow2.f32 %v3719_v49  ;;  %v1744_v49 = vmul.f32 %v6068_v34, %v6061_v40 }
 0x494   :  { %5145 = vpow2.f32 %v3720_v27 }
 0x495   :  { %5147 = vpow2.f32 %v3721_v12 }
 0x496   :  { %5149 = vtanh.f32 %v4924_v4 }
 0x49d   :  { %v5144_v58 = vpop.eup %5143 }
 0x49e   :  { %v5146_v14 = vpop.eup %5145  ;;  %v2081_v13 = vadd.f32 1.0, %v5144_v58 }
 0x49f   :  { %v2087_v30 = vadd.f32 1.0, %v5146_v14  ;;  %v5148_v45 = vpop.eup %5147 }
 0x4a0   :  { %5151 = vrcp.f32 %v2081_v13  ;;  %v5150_v47 = vpop.eup %5149  ;;  %v2094_v5 = vadd.f32 1.0, %v5148_v45 }
 0x4a1   :  { %5153 = vrcp.f32 %v2087_v30 }
 0x4a2   :  { %5155 = vrcp.f32 %v2094_v5 }
 0x4aa   :  { %v5152_v63 = vpop.eup %5151 }
 0x4ab   :  { %v5154_v42 = vpop.eup %5153  ;;  %v2098_v25 = vmul.f32 %v5152_v63, %v5150_v47 }
 0x4ac   :  { %v2097_v27 = vmul.f32 %v5154_v42, %v1744_v49  ;;  %v5156_v47 = vpop.eup %5155 }
 0x4ae   :  { %v6153_v21 = vadd.f32 %v2098_v25, %v2097_v27  ;;  %v2180_v52 = vpop.f32.mrb[24].mxu0  ;;  %v2251_v8 = vpop.f32.mrb[24].mxu1 }
 0x4af   :  { %v4942_v4 = vadd.f32 %v2180_v52, %v6679_v2  ;;  %v2182_v14 = vpop.f32.mrb[25].mxu0  ;;  %v2253_v13 = vpop.f32.mrb[25].mxu1  ;;  %v4958_v49 = vadd.f32 %v2251_v8, %v5883_v7 }
 0x4b0   :  { %5157 = vtanh.f32 %v6153_v21  ;;  %v4943_v30 = vadd.f32 %v2182_v14, %v6680_v55  ;;  %v4959_v40 = vadd.f32 %v2253_v13, %v5880_v54  ;;  %v6160_v25 = vpop.permute.xlu0 %2104  ;;  %v1926_v13 = vmul.f32 %v6106_v9, %v6091_v3  ;;  %v6761_v9 = vld [vmem:[#allocation31_spill] sm:$0xff] }
 0x4b1   :  { %v3723_v12 = vmul.f32 -1.442695, %v4942_v4 }
 0x4b2   :  { %v3724_v58 = vmul.f32 -1.442695, %v4943_v30  ;;  %v3725_v63 = vmul.f32 -1.442695, %v4959_v40 }
 0x4b3   :  { %5159 = vpow2.f32 %v3723_v12 }
 0x4b4   :  { %5161 = vpow2.f32 %v3724_v58 }
 0x4b5   :  { %5163 = vpow2.f32 %v3725_v63 }
 0x4b6   :  { %5165 = vtanh.f32 %v4958_v49  ;;  %v6198_v49 = vpop.permute.xlu1 %2286 }
 0x4ba   :  { %v5158_v45 = vpop.eup %5157 }
 0x4bb   :  { %v2101_v42 = vmul.f32 %v5158_v45, %v5156_v47 }
 0x4bd   :  { %v5160_v5 = vpop.eup %5159  ;;  %v2107_v27 = vmul.f32 %v6160_v25, %v2101_v42 }
 0x4be   :  { %v5162_v52 = vpop.eup %5161  ;;  %v2263_v34 = vadd.f32 1.0, %v5160_v5  ;;  %v6745_v5 = vld [vmem:[#allocation15_spill] sm:$0xff] }
 0x4bf   :  { %v2269_v4 = vadd.f32 1.0, %v5162_v52  ;;  %2110 = vst [vmem:[#allocation10 + $0x30] sm:$0xff] %v2107_v27  ;;  %2358 = vmatmul.mubr.f32.vlgmr.msra.gmra.mrb[8].mxu0 %v2107_v27  ;;  %2429 = vmatmul.mubr.f32.vlgmr.msra.gmra.mrb[8].mxu1 %v2107_v27  ;;  %v6746_v27 = vld [vmem:[#allocation16_spill] sm:$0xff]  ;;  %v6747_v52 = vld [vmem:[#allocation17_spill] sm:$0xff] }
 0x4c0   :  { %5167 = vrcp.f32 %v2263_v34  ;;  %4457 = vmatpush1.bf16.msra.mxu0 %v5703_v33  ;;  %4489 = vmatpush1.bf16.msra.mxu1 %v5707_v37  ;;  %v5164_v34 = vpop.eup %5163 }
 0x4c1   :  { %5169 = vrcp.f32 %v2269_v4  ;;  %4459 = vmatprep.subr.bf16.mxu0 %v5709_v38  ;;  %4491 = vmatprep.subr.bf16.mxu1 %v5714_v15  ;;  %v5166_v8 = vpop.eup %5165  ;;  %v2276_v58 = vadd.f32 1.0, %v5164_v34  ;;  %v6748_v4 = vld [vmem:[#allocation18_spill] sm:$0xff]  ;;  %v6749_v34 = vld [vmem:[#allocation19_spill] sm:$0xff] }
 0x4c2   :  { %2530 = vmatprep.mubr.f32.mxu0 %v6642_v51  ;;  %2601 = vmatprep.mubr.f32.mxu1 %v6642_v51 }
 0x4c3   :  { %5171 = vrcp.f32 %v2276_v58  ;;  %v6755_v58 = vld [vmem:[#allocation25_spill] sm:$0xff] }
 0x4c4   :  { %4461 = vmatpush1.bf16.msra.mxu0 %v5720_v59  ;;  %4493 = vmatpush1.bf16.msra.mxu1 %v5725_v50 }
 0x4c5   :  { %4463 = vmatprep.subr.bf16.mxu0 %v6652_v44  ;;  %4495 = vmatprep.subr.bf16.mxu1 %v6653_v17 }
 0x4c8   :  { %4465 = vmatpush1.bf16.msra.mxu0 %v6654_v53  ;;  %4497 = vmatpush1.bf16.msra.mxu1 %v6655_v23 }
 0x4c9   :  { %4467 = vmatprep.subr.bf16.mxu0 %v6682_v19  ;;  %4499 = vmatprep.subr.bf16.mxu1 %v6683_v62 }
 0x4ca   :  { %v5168_v14 = vpop.eup %5167 }
 0x4cb   :  { %v5170_v30 = vpop.eup %5169  ;;  %v2280_v12 = vmul.f32 %v5168_v14, %v5166_v8  ;;  %v6750_v8 = vld [vmem:[#allocation20_spill] sm:$0xff]  ;;  %v6751_v14 = vld [vmem:[#allocation21_spill] sm:$0xff] }
 0x4cc   :  { %v2279_v40 = vmul.f32 %v5170_v30, %v1926_v13  ;;  %4469 = vmatpush1.bf16.msra.mxu0 %v6658_v48  ;;  %4501 = vmatpush1.bf16.msra.mxu1 %v5755_v10  ;;  %v6752_v13 = vld [vmem:[#allocation22_spill] sm:$0xff]  ;;  %v6753_v30 = vld [vmem:[#allocation23_spill] sm:$0xff] }
 0x4cd   :  { %4471 = vmatprep.subr.bf16.mxu0 %v6659_v46  ;;  %4503 = vmatprep.subr.bf16.mxu1 %v6660_v1  ;;  %v5172_v3 = vpop.eup %5171 }
 0x4ce   :  { %v6183_v47 = vadd.f32 %v2280_v12, %v2279_v40  ;;  %v6754_v12 = vld [vmem:[#allocation24_spill] sm:$0xff]  ;;  %v6756_v40 = vld [vmem:[#allocation26_spill] sm:$0xff] }
 0x4d0   :  { %5173 = vtanh.f32 %v6183_v47  ;;  %4473 = vmatpush1.bf16.msra.mxu0 %v6661_v28  ;;  %4505 = vmatpush1.bf16.msra.mxu1 %v6662_v43 }
 0x4d1   :  { %4475 = vmatprep.subr.bf16.mxu0 %v5771_v61  ;;  %4507 = vmatprep.subr.bf16.mxu1 %v6663_v60 }
 0x4d4   :  { %4477 = vmatpush1.bf16.msra.mxu0 %v5777_v16  ;;  %4509 = vmatpush1.bf16.msra.mxu1 %v5781_v0 }
 0x4d5   :  { %4479 = vmatprep.subr.bf16.mxu0 %v5783_v20  ;;  %4511 = vmatprep.subr.bf16.mxu1 %v5786_v36 }
 0x4d8   :  { %4481 = vmatpush1.bf16.msra.mxu0 %v5789_v56  ;;  %4513 = vmatpush1.bf16.msra.mxu1 %v5793_v41 }
 0x4d9   :  { %4483 = vmatprep.subr.bf16.mxu0 %v5795_v6  ;;  %4515 = vmatprep.subr.bf16.mxu1 %v5798_v11 }
 0x4da   :  { %v5174_v45 = vpop.eup %5173 }
 0x4db   :  { %v2283_v63 = vmul.f32 %v5174_v45, %v5172_v3  ;;  %v6757_v3 = vld [vmem:[#allocation27_spill] sm:$0xff]  ;;  %v6758_v45 = vld [vmem:[#allocation28_spill] sm:$0xff] }
 0x4dc   :  { %4485 = vmatpush1.bf16.msra.mxu0 %v5801_v24  ;;  %4517 = vmatpush1.bf16.msra.mxu1 %v5805_v31 }
 0x4dd   :  { %v2289_v42 = vmul.f32 %v6198_v49, %v2283_v63  ;;  %4519 = vmatprep.subr.bf16.mxu0 %v5565_v22  ;;  %4551 = vmatprep.subr.bf16.mxu1 %v5568_v26  ;;  %v6759_v63 = vld [vmem:[#allocation29_spill] sm:$0xff] }
 0x4df   :  { %2292 = vst [vmem:[#allocation10 + $0x48] sm:$0xff] %v2289_v42  ;;  %2531 = vmatmul.mubr.f32.vlgmr.msra.gmra.mrb[22].mxu0 %v2289_v42  ;;  %2602 = vmatmul.mubr.f32.vlgmr.msra.gmra.mrb[22].mxu1 %v2289_v42  ;;  %v6760_v42 = vld [vmem:[#allocation30_spill] sm:$0xff] }
 0x4e0   :  { %4521 = vmatpush1.bf16.msra.mxu0 %v5571_v29  ;;  %4553 = vmatpush1.bf16.msra.mxu1 %v5574_v32 }
 0x4e1   :  { %4523 = vmatprep.subr.bf16.mxu0 %v5578_v35  ;;  %4555 = vmatprep.subr.bf16.mxu1 %v5582_v39 }
 0x4e2   :  { %2703 = vmatprep.mubr.f32.mxu0 %v6642_v51  ;;  %2774 = vmatprep.mubr.f32.mxu1 %v6642_v51 }
 0x4e4   :  { %4525 = vmatpush1.bf16.msra.mxu0 %v6745_v5  ;;  %4557 = vmatpush1.bf16.msra.mxu1 %v6746_v27 }
 0x4e5   :  { %4527 = vmatprep.subr.bf16.mxu0 %v6747_v52  ;;  %4559 = vmatprep.subr.bf16.mxu1 %v6748_v4 }
 0x4e8   :  { %4529 = vmatpush1.bf16.msra.mxu0 %v6749_v34  ;;  %4561 = vmatpush1.bf16.msra.mxu1 %v6750_v8  ;;  %v6773_v8 = vld [vmem:[#allocation55_spill] sm:$0xff] }
 0x4e9   :  { %4531 = vmatprep.subr.bf16.mxu0 %v6751_v14  ;;  %4563 = vmatprep.subr.bf16.mxu1 %v6752_v13  ;;  %v6762_v14 = vld [vmem:[#allocation32_spill] sm:$0xff]  ;;  %v6763_v13 = vld [vmem:[#allocation33_spill] sm:$0xff] }
 0x4ec   :  { %4533 = vmatpush1.bf16.msra.mxu0 %v6753_v30  ;;  %4565 = vmatpush1.bf16.msra.mxu1 %v6754_v12  ;;  %v6764_v30 = vld [vmem:[#allocation34_spill] sm:$0xff]  ;;  %v6765_v12 = vld [vmem:[#allocation35_spill] sm:$0xff] }
 0x4ed   :  { %4535 = vmatprep.subr.bf16.mxu0 %v6755_v58  ;;  %4567 = vmatprep.subr.bf16.mxu1 %v6756_v40  ;;  %v6766_v58 = vld [vmem:[#allocation36_spill] sm:$0xff]  ;;  %v6767_v40 = vld [vmem:[#allocation37_spill] sm:$0xff] }
 0x4f0   :  { %4537 = vmatpush1.bf16.msra.mxu0 %v6757_v3  ;;  %4569 = vmatpush1.bf16.msra.mxu1 %v6758_v45  ;;  %v6768_v3 = vld [vmem:[#allocation38_spill] sm:$0xff]  ;;  %v6769_v45 = vld [vmem:[#allocation39_spill] sm:$0xff] }
 0x4f1   :  { %4539 = vmatprep.subr.bf16.mxu0 %v6759_v63  ;;  %4571 = vmatprep.subr.bf16.mxu1 %v6760_v42  ;;  %v6770_v63 = vld [vmem:[#allocation40_spill] sm:$0xff]  ;;  %v6771_v42 = vld [vmem:[#allocation41_spill] sm:$0xff] }
 0x4f4   :  { %4541 = vmatpush1.bf16.msra.mxu0 %v6761_v9  ;;  %4573 = vmatpush1.bf16.msra.mxu1 %v6762_v14  ;;  %v6772_v9 = vld [vmem:[#allocation42_spill] sm:$0xff] }
 0x4f5   :  { %4543 = vmatprep.subr.bf16.mxu0 %v6763_v13  ;;  %4575 = vmatprep.subr.bf16.mxu1 %v6764_v30 }
 0x4f8   :  { %4545 = vmatpush1.bf16.msra.mxu0 %v6765_v12  ;;  %4577 = vmatpush1.bf16.msra.mxu1 %v6766_v58 }
 0x4f9   :  { %4547 = vmatprep.subr.bf16.mxu0 %v6767_v40  ;;  %4579 = vmatprep.subr.bf16.mxu1 %v6768_v3 }
 0x4fc   :  { %4549 = vmatpush1.bf16.msra.mxu0 %v6769_v45  ;;  %4581 = vmatpush1.bf16.msra.mxu1 %v6770_v63  ;;  %v6774_v63 = vld [vmem:[#allocation58_spill] sm:$0xff] }
 0x4fd   :  { %4583 = vmatprep.subr.bf16.mxu0 %v6771_v42  ;;  %4615 = vmatprep.subr.bf16.mxu1 %v6772_v9 }
 0x592   :  { %v2359_v14 = vpop.f32.mrb[8].mxu0  ;;  %v2430_v13 = vpop.f32.mrb[8].mxu1 }
 0x593   :  { %v4910_v30 = vadd.f32 %v2359_v14, %v6773_v8  ;;  %v2361_v34 = vpop.f32.mrb[9].mxu0  ;;  %v2432_v12 = vpop.f32.mrb[9].mxu1  ;;  %v4926_v52 = vadd.f32 %v2430_v13, %v6774_v63 }
 0x594   :  { %v4911_v58 = vadd.f32 %v2361_v34, %v6710_v18  ;;  %v4927_v45 = vadd.f32 %v2432_v12, %v6711_v57 }
 0x595   :  { %v3726_v4 = vmul.f32 -1.442695, %v4910_v30 }
 0x596   :  { %v3727_v40 = vmul.f32 -1.442695, %v4911_v58  ;;  %v3728_v3 = vmul.f32 -1.442695, %v4927_v45 }
 0x597   :  { %5175 = vpow2.f32 %v3726_v4  ;;  %v2108_v4 = vmul.f32 %v6160_v25, %v6153_v21 }
 0x598   :  { %5177 = vpow2.f32 %v3727_v40 }
 0x599   :  { %5179 = vpow2.f32 %v3728_v3 }
 0x59a   :  { %5181 = vtanh.f32 %v4926_v52 }
 0x5a1   :  { %v5176_v42 = vpop.eup %5175 }
 0x5a2   :  { %v5178_v27 = vpop.eup %5177  ;;  %v2442_v9 = vadd.f32 1.0, %v5176_v42 }
 0x5a3   :  { %v2448_v5 = vadd.f32 1.0, %v5178_v27  ;;  %v5180_v14 = vpop.eup %5179 }
 0x5a4   :  { %5183 = vrcp.f32 %v2442_v9  ;;  %v5182_v8 = vpop.eup %5181  ;;  %v2455_v12 = vadd.f32 1.0, %v5180_v14 }
 0x5a5   :  { %5185 = vrcp.f32 %v2448_v5 }
 0x5a6   :  { %5187 = vrcp.f32 %v2455_v12 }
 0x5ae   :  { %v5184_v34 = vpop.eup %5183 }
 0x5af   :  { %v5186_v30 = vpop.eup %5185  ;;  %v2459_v58 = vmul.f32 %v5184_v34, %v5182_v8 }
 0x5b0   :  { %v2458_v40 = vmul.f32 %v5186_v30, %v2108_v4  ;;  %v5188_v8 = vpop.eup %5187 }
 0x5b2   :  { %v6245_v45 = vadd.f32 %v2459_v58, %v2458_v40  ;;  %v2532_v13 = vpop.f32.mrb[22].mxu0  ;;  %v2603_v63 = vpop.f32.mrb[22].mxu1 }
 0x5b3   :  { %v4940_v52 = vadd.f32 %v2532_v13, %v6679_v2  ;;  %v2534_v27 = vpop.f32.mrb[23].mxu0  ;;  %v2605_v9 = vpop.f32.mrb[23].mxu1  ;;  %v4956_v4 = vadd.f32 %v2603_v63, %v5883_v7 }
 0x5b4   :  { %5189 = vtanh.f32 %v6245_v45  ;;  %v4941_v5 = vadd.f32 %v2534_v27, %v6680_v55  ;;  %v4957_v21 = vadd.f32 %v2605_v9, %v5880_v54 }
 0x5b5   :  { %v3729_v3 = vmul.f32 -1.442695, %v4940_v52 }
 0x5b6   :  { %v3730_v42 = vmul.f32 -1.442695, %v4941_v5  ;;  %v3731_v34 = vmul.f32 -1.442695, %v4957_v21  ;;  %v2290_v5 = vmul.f32 %v6198_v49, %v6183_v47 }
 0x5b7   :  { %5191 = vpow2.f32 %v3729_v3 }
 0x5b8   :  { %5193 = vpow2.f32 %v3730_v42 }
 0x5b9   :  { %5195 = vpow2.f32 %v3731_v34 }
 0x5ba   :  { %5197 = vtanh.f32 %v4956_v4 }
 0x5be   :  { %v5190_v14 = vpop.eup %5189 }
 0x5bf   :  { %v2462_v30 = vmul.f32 %v5190_v14, %v5188_v8 }
 0x5c1   :  { %v5192_v58 = vpop.eup %5191  ;;  %v2463_v12 = vmul.f32 %v2462_v30, %v6198_v49 }
 0x5c2   :  { %v5194_v40 = vpop.eup %5193  ;;  %v2615_v13 = vadd.f32 1.0, %v5192_v58  ;;  %v6775_v58 = vld [vmem:[#allocation15_spill] sm:$0xff] }
 0x5c3   :  { %v2621_v27 = vadd.f32 1.0, %v5194_v40  ;;  %2465 = vst [vmem:[#allocation10 + $0x40] sm:$0xff] %v2463_v12  ;;  %2704 = vmatmul.mubr.f32.vlgmr.msra.gmra.mrb[10].mxu0 %v2463_v12  ;;  %2775 = vmatmul.mubr.f32.vlgmr.msra.gmra.mrb[10].mxu1 %v2463_v12  ;;  %v5196_v63 = vpop.eup %5195  ;;  %v6776_v12 = vld [vmem:[#allocation16_spill] sm:$0xff]  ;;  %v6777_v40 = vld [vmem:[#allocation17_spill] sm:$0xff] }
 0x5c4   :  { %5199 = vrcp.f32 %v2615_v13  ;;  %4585 = vmatpush1.bf16.msra.mxu0 %v5703_v33  ;;  %4617 = vmatpush1.bf16.msra.mxu1 %v5707_v37  ;;  %v5198_v52 = vpop.eup %5197  ;;  %v2628_v21 = vadd.f32 1.0, %v5196_v63  ;;  %v6778_v13 = vld [vmem:[#allocation18_spill] sm:$0xff]  ;;  %v6780_v63 = vld [vmem:[#allocation20_spill] sm:$0xff] }
 0x5c5   :  { %5201 = vrcp.f32 %v2621_v27  ;;  %4587 = vmatprep.subr.bf16.mxu0 %v5709_v38  ;;  %4619 = vmatprep.subr.bf16.mxu1 %v5714_v15  ;;  %v6779_v27 = vld [vmem:[#allocation19_spill] sm:$0xff] }
 0x5c6   :  { %2876 = vmatprep.mubr.f32.mxu0 %v6642_v51  ;;  %2947 = vmatprep.mubr.f32.mxu1 %v6642_v51  ;;  %5203 = vrcp.f32 %v2628_v21  ;;  %v6786_v21 = vld [vmem:[#allocation26_spill] sm:$0xff] }
 0x5c8   :  { %4589 = vmatpush1.bf16.msra.mxu0 %v5720_v59  ;;  %4621 = vmatpush1.bf16.msra.mxu1 %v5725_v50 }
 0x5c9   :  { %4591 = vmatprep.subr.bf16.mxu0 %v6652_v44  ;;  %4623 = vmatprep.subr.bf16.mxu1 %v6653_v17 }
 0x5cc   :  { %4593 = vmatpush1.bf16.msra.mxu0 %v6654_v53  ;;  %4625 = vmatpush1.bf16.msra.mxu1 %v6655_v23 }
 0x5cd   :  { %4595 = vmatprep.subr.bf16.mxu0 %v6682_v19  ;;  %4627 = vmatprep.subr.bf16.mxu1 %v6683_v62 }
 0x5ce   :  { %v5200_v9 = vpop.eup %5199 }
 0x5cf   :  { %v5202_v3 = vpop.eup %5201  ;;  %v2632_v42 = vmul.f32 %v5200_v9, %v5198_v52  ;;  %v6781_v52 = vld [vmem:[#allocation21_spill] sm:$0xff]  ;;  %v6782_v9 = vld [vmem:[#allocation22_spill] sm:$0xff] }
 0x5d0   :  { %v2631_v8 = vmul.f32 %v5202_v3, %v2290_v5  ;;  %4597 = vmatpush1.bf16.msra.mxu0 %v6658_v48  ;;  %4629 = vmatpush1.bf16.msra.mxu1 %v5755_v10  ;;  %v5204_v47 = vpop.eup %5203  ;;  %v6783_v5 = vld [vmem:[#allocation23_spill] sm:$0xff]  ;;  %v6784_v3 = vld [vmem:[#allocation24_spill] sm:$0xff] }
 0x5d1   :  { %4599 = vmatprep.subr.bf16.mxu0 %v6659_v46  ;;  %4631 = vmatprep.subr.bf16.mxu1 %v6660_v1 }
 0x5d2   :  { %v6273_v14 = vadd.f32 %v2632_v42, %v2631_v8  ;;  %v6785_v42 = vld [vmem:[#allocation25_spill] sm:$0xff]  ;;  %v6787_v8 = vld [vmem:[#allocation27_spill] sm:$0xff] }
 0x5d4   :  { %5205 = vtanh.f32 %v6273_v14  ;;  %4601 = vmatpush1.bf16.msra.mxu0 %v6661_v28  ;;  %4633 = vmatpush1.bf16.msra.mxu1 %v6662_v43 }
 0x5d5   :  { %4603 = vmatprep.subr.bf16.mxu0 %v5771_v61  ;;  %4635 = vmatprep.subr.bf16.mxu1 %v6663_v60 }
 0x5d8   :  { %4605 = vmatpush1.bf16.msra.mxu0 %v5777_v16  ;;  %4637 = vmatpush1.bf16.msra.mxu1 %v5781_v0 }
 0x5d9   :  { %4607 = vmatprep.subr.bf16.mxu0 %v5783_v20  ;;  %4639 = vmatprep.subr.bf16.mxu1 %v5786_v36 }
 0x5dc   :  { %4609 = vmatpush1.bf16.msra.mxu0 %v5789_v56  ;;  %4641 = vmatpush1.bf16.msra.mxu1 %v5793_v41 }
 0x5dd   :  { %4611 = vmatprep.subr.bf16.mxu0 %v5795_v6  ;;  %4643 = vmatprep.subr.bf16.mxu1 %v5798_v11 }
 0x5de   :  { %v5206_v34 = vpop.eup %5205 }
 0x5df   :  { %v2635_v4 = vmul.f32 %v5206_v34, %v5204_v47  ;;  %v6788_v47 = vld [vmem:[#allocation28_spill] sm:$0xff]  ;;  %v6789_v34 = vld [vmem:[#allocation29_spill] sm:$0xff] }
 0x5e0   :  { %4613 = vmatpush1.bf16.msra.mxu0 %v5801_v24  ;;  %4645 = vmatpush1.bf16.msra.mxu1 %v5805_v31 }
 0x5e1   :  { %v2636_v30 = vmul.f32 %v2635_v4, %v6160_v25  ;;  %4647 = vmatprep.subr.bf16.mxu0 %v5565_v22  ;;  %4679 = vmatprep.subr.bf16.mxu1 %v5568_v26  ;;  %v6790_v4 = vld [vmem:[#allocation30_spill] sm:$0xff] }
 0x5e3   :  { %2638 = vst [vmem:[#allocation10 + $0x38] sm:$0xff] %v2636_v30  ;;  %2877 = vmatmul.mubr.f32.vlgmr.msra.gmra.mrb[20].mxu0 %v2636_v30  ;;  %2948 = vmatmul.mubr.f32.vlgmr.msra.gmra.mrb[20].mxu1 %v2636_v30  ;;  %v6791_v30 = vld [vmem:[#allocation31_spill] sm:$0xff] }
 0x5e4   :  { %4649 = vmatpush1.bf16.msra.mxu0 %v5571_v29  ;;  %4681 = vmatpush1.bf16.msra.mxu1 %v5574_v32 }
 0x5e5   :  { %4651 = vmatprep.subr.bf16.mxu0 %v5578_v35  ;;  %4683 = vmatprep.subr.bf16.mxu1 %v5582_v39 }
 0x5e6   :  { %3049 = vmatprep.mubr.f32.mxu0 %v6642_v51  ;;  %3120 = vmatprep.mubr.f32.mxu1 %v6642_v51 }
 0x5e8   :  { %4653 = vmatpush1.bf16.msra.mxu0 %v6775_v58  ;;  %4685 = vmatpush1.bf16.msra.mxu1 %v6776_v12 }
 0x5e9   :  { %4655 = vmatprep.subr.bf16.mxu0 %v6777_v40  ;;  %4687 = vmatprep.subr.bf16.mxu1 %v6778_v13 }
 0x5ec   :  { %4657 = vmatpush1.bf16.msra.mxu0 %v6779_v27  ;;  %4689 = vmatpush1.bf16.msra.mxu1 %v6780_v63  ;;  %v6803_v63 = vld [vmem:[#allocation55_spill] sm:$0xff] }
 0x5ed   :  { %4659 = vmatprep.subr.bf16.mxu0 %v6781_v52  ;;  %4691 = vmatprep.subr.bf16.mxu1 %v6782_v9  ;;  %v6792_v52 = vld [vmem:[#allocation32_spill] sm:$0xff]  ;;  %v6793_v9 = vld [vmem:[#allocation33_spill] sm:$0xff] }
 0x5f0   :  { %4661 = vmatpush1.bf16.msra.mxu0 %v6783_v5  ;;  %4693 = vmatpush1.bf16.msra.mxu1 %v6784_v3  ;;  %v6794_v5 = vld [vmem:[#allocation34_spill] sm:$0xff]  ;;  %v6795_v3 = vld [vmem:[#allocation35_spill] sm:$0xff] }
 0x5f1   :  { %4663 = vmatprep.subr.bf16.mxu0 %v6785_v42  ;;  %4695 = vmatprep.subr.bf16.mxu1 %v6786_v21  ;;  %v6796_v42 = vld [vmem:[#allocation36_spill] sm:$0xff]  ;;  %v6797_v21 = vld [vmem:[#allocation37_spill] sm:$0xff] }
 0x5f4   :  { %4665 = vmatpush1.bf16.msra.mxu0 %v6787_v8  ;;  %4697 = vmatpush1.bf16.msra.mxu1 %v6788_v47  ;;  %v6798_v8 = vld [vmem:[#allocation38_spill] sm:$0xff]  ;;  %v6799_v47 = vld [vmem:[#allocation39_spill] sm:$0xff] }
 0x5f5   :  { %4667 = vmatprep.subr.bf16.mxu0 %v6789_v34  ;;  %4699 = vmatprep.subr.bf16.mxu1 %v6790_v4  ;;  %v6800_v34 = vld [vmem:[#allocation40_spill] sm:$0xff]  ;;  %v6801_v4 = vld [vmem:[#allocation41_spill] sm:$0xff] }
 0x5f8   :  { %4669 = vmatpush1.bf16.msra.mxu0 %v6791_v30  ;;  %4701 = vmatpush1.bf16.msra.mxu1 %v6792_v52  ;;  %v6802_v30 = vld [vmem:[#allocation42_spill] sm:$0xff] }
 0x5f9   :  { %4671 = vmatprep.subr.bf16.mxu0 %v6793_v9  ;;  %4703 = vmatprep.subr.bf16.mxu1 %v6794_v5 }
 0x5fc   :  { %4673 = vmatpush1.bf16.msra.mxu0 %v6795_v3  ;;  %4705 = vmatpush1.bf16.msra.mxu1 %v6796_v42 }
 0x5fd   :  { %4675 = vmatprep.subr.bf16.mxu0 %v6797_v21  ;;  %4707 = vmatprep.subr.bf16.mxu1 %v6798_v8 }
 0x600   :  { %4677 = vmatpush1.bf16.msra.mxu0 %v6799_v47  ;;  %4709 = vmatpush1.bf16.msra.mxu1 %v6800_v34  ;;  %v6804_v34 = vld [vmem:[#allocation58_spill] sm:$0xff] }
 0x601   :  { %4711 = vmatprep.subr.bf16.mxu0 %v6801_v4  ;;  %4743 = vmatprep.subr.bf16.mxu1 %v6802_v30 }
 0x696   :  { %v2705_v52 = vpop.f32.mrb[10].mxu0  ;;  %v2776_v9 = vpop.f32.mrb[10].mxu1 }
 0x697   :  { %v4912_v5 = vadd.f32 %v2705_v52, %v6803_v63  ;;  %v2707_v27 = vpop.f32.mrb[11].mxu0  ;;  %v2778_v3 = vpop.f32.mrb[11].mxu1  ;;  %v4928_v40 = vadd.f32 %v2776_v9, %v6804_v34 }
 0x698   :  { %v4913_v42 = vadd.f32 %v2707_v27, %v6710_v18  ;;  %v4929_v47 = vadd.f32 %v2778_v3, %v6711_v57 }
 0x699   :  { %v3732_v13 = vmul.f32 -1.442695, %v4912_v5 }
 0x69a   :  { %v3733_v21 = vmul.f32 -1.442695, %v4913_v42  ;;  %v3734_v8 = vmul.f32 -1.442695, %v4929_v47 }
 0x69b   :  { %5207 = vpow2.f32 %v3732_v13  ;;  %v2464_v13 = vmul.f32 %v6245_v45, %v6198_v49 }
 0x69c   :  { %5209 = vpow2.f32 %v3733_v21 }
 0x69d   :  { %5211 = vpow2.f32 %v3734_v8 }
 0x69e   :  { %5213 = vtanh.f32 %v4928_v40 }
 0x6a5   :  { %v5208_v4 = vpop.eup %5207 }
 0x6a6   :  { %v5210_v12 = vpop.eup %5209  ;;  %v2788_v30 = vadd.f32 1.0, %v5208_v4 }
 0x6a7   :  { %v2794_v58 = vadd.f32 1.0, %v5210_v12  ;;  %v5212_v52 = vpop.eup %5211 }
 0x6a8   :  { %5215 = vrcp.f32 %v2788_v30  ;;  %v5214_v63 = vpop.eup %5213  ;;  %v2801_v3 = vadd.f32 1.0, %v5212_v52 }
 0x6a9   :  { %5217 = vrcp.f32 %v2794_v58 }
 0x6aa   :  { %5219 = vrcp.f32 %v2801_v3 }
 0x6b2   :  { %v5216_v27 = vpop.eup %5215 }
 0x6b3   :  { %v5218_v5 = vpop.eup %5217  ;;  %v2805_v42 = vmul.f32 %v5216_v27, %v5214_v63 }
 0x6b4   :  { %v2804_v21 = vmul.f32 %v5218_v5, %v2464_v13  ;;  %v5220_v45 = vpop.eup %5219 }
 0x6b6   :  { %v6333_v47 = vadd.f32 %v2805_v42, %v2804_v21  ;;  %v2878_v9 = vpop.f32.mrb[20].mxu0  ;;  %v2949_v34 = vpop.f32.mrb[20].mxu1  ;;  %v6805_v42 = vld [vmem:[#allocation49_spill] sm:$0xff] }
 0x6b7   :  { %v4938_v40 = vadd.f32 %v2878_v9, %v6679_v2  ;;  %v2880_v12 = vpop.f32.mrb[21].mxu0  ;;  %v2951_v8 = vpop.f32.mrb[21].mxu1  ;;  %v4954_v27 = vadd.f32 %v2949_v34, %v5883_v7 }
 0x6b8   :  { %5221 = vtanh.f32 %v6333_v47  ;;  %v4939_v58 = vadd.f32 %v2880_v12, %v6680_v55  ;;  %v4955_v49 = vadd.f32 %v2951_v8, %v5880_v54 }
 0x6b9   :  { %v3735_v4 = vmul.f32 -1.442695, %v4938_v40 }
 0x6ba   :  { %v3736_v30 = vmul.f32 -1.442695, %v4939_v58  ;;  %v3737_v52 = vmul.f32 -1.442695, %v4955_v49  ;;  %v2637_v58 = vmul.f32 %v6273_v14, %v6160_v25 }
 0x6bb   :  { %5223 = vpow2.f32 %v3735_v4 }
 0x6bc   :  { %5225 = vpow2.f32 %v3736_v30 }
 0x6bd   :  { %5227 = vpow2.f32 %v3737_v52 }
 0x6be   :  { %5229 = vtanh.f32 %v4954_v27  ;;  %v6806_v27 = vld [vmem:[#allocation46_spill] sm:$0xff] }
 0x6c2   :  { %v5222_v63 = vpop.eup %5221 }
 0x6c3   :  { %v2808_v13 = vmul.f32 %v5222_v63, %v5220_v45 }
 0x6c5   :  { %v5224_v5 = vpop.eup %5223  ;;  %v2809_v3 = vmul.f32 %v2808_v13, %v6805_v42 }
 0x6c6   :  { %v5226_v21 = vpop.eup %5225  ;;  %v2961_v9 = vadd.f32 1.0, %v5224_v5  ;;  %v6807_v5 = vld [vmem:[#allocation15_spill] sm:$0xff] }
 0x6c7   :  { %v2967_v12 = vadd.f32 1.0, %v5226_v21  ;;  %2811 = vst [vmem:[#allocation10 + $0x50] sm:$0xff] %v2809_v3  ;;  %3050 = vmatmul.mubr.f32.vlgmr.msra.gmra.mrb[12].mxu0 %v2809_v3  ;;  %3121 = vmatmul.mubr.f32.vlgmr.msra.gmra.mrb[12].mxu1 %v2809_v3  ;;  %v5228_v34 = vpop.eup %5227  ;;  %v6810_v3 = vld [vmem:[#allocation18_spill] sm:$0xff]  ;;  %v6811_v21 = vld [vmem:[#allocation19_spill] sm:$0xff] }
 0x6c8   :  { %5231 = vrcp.f32 %v2961_v9  ;;  %4713 = vmatpush1.bf16.msra.mxu0 %v5703_v33  ;;  %4745 = vmatpush1.bf16.msra.mxu1 %v5707_v37  ;;  %v5230_v40 = vpop.eup %5229  ;;  %v2974_v49 = vadd.f32 1.0, %v5228_v34  ;;  %v6816_v9 = vld [vmem:[#allocation24_spill] sm:$0xff]  ;;  %v6818_v34 = vld [vmem:[#allocation26_spill] sm:$0xff] }
 0x6c9   :  { %5233 = vrcp.f32 %v2967_v12  ;;  %4715 = vmatprep.subr.bf16.mxu0 %v5709_v38  ;;  %4747 = vmatprep.subr.bf16.mxu1 %v5714_v15  ;;  %v6817_v12 = vld [vmem:[#allocation25_spill] sm:$0xff] }
 0x6ca   :  { %3222 = vmatprep.mubr.f32.mxu0 %v6642_v51  ;;  %3293 = vmatprep.mubr.f32.mxu1 %v6642_v51  ;;  %5235 = vrcp.f32 %v2974_v49  ;;  %v6824_v49 = vld [vmem:[#allocation32_spill] sm:$0xff] }
 0x6cc   :  { %4717 = vmatpush1.bf16.msra.mxu0 %v5720_v59  ;;  %4749 = vmatpush1.bf16.msra.mxu1 %v5725_v50 }
 0x6cd   :  { %4719 = vmatprep.subr.bf16.mxu0 %v6652_v44  ;;  %4751 = vmatprep.subr.bf16.mxu1 %v6653_v17 }
 0x6d0   :  { %4721 = vmatpush1.bf16.msra.mxu0 %v6654_v53  ;;  %4753 = vmatpush1.bf16.msra.mxu1 %v6655_v23 }
 0x6d1   :  { %4723 = vmatprep.subr.bf16.mxu0 %v6682_v19  ;;  %4755 = vmatprep.subr.bf16.mxu1 %v6683_v62 }
 0x6d2   :  { %v5232_v8 = vpop.eup %5231 }
 0x6d3   :  { %v5234_v4 = vpop.eup %5233  ;;  %v2978_v30 = vmul.f32 %v5232_v8, %v5230_v40  ;;  %v6819_v40 = vld [vmem:[#allocation27_spill] sm:$0xff]  ;;  %v6820_v8 = vld [vmem:[#allocation28_spill] sm:$0xff] }
 0x6d4   :  { %v2977_v45 = vmul.f32 %v5234_v4, %v2637_v58  ;;  %4725 = vmatpush1.bf16.msra.mxu0 %v6658_v48  ;;  %4757 = vmatpush1.bf16.msra.mxu1 %v5755_v10  ;;  %v5236_v25 = vpop.eup %5235  ;;  %v6821_v58 = vld [vmem:[#allocation29_spill] sm:$0xff]  ;;  %v6822_v4 = vld [vmem:[#allocation30_spill] sm:$0xff] }
 0x6d5   :  { %4727 = vmatprep.subr.bf16.mxu0 %v6659_v46  ;;  %4759 = vmatprep.subr.bf16.mxu1 %v6660_v1 }
 0x6d6   :  { %v6361_v63 = vadd.f32 %v2978_v30, %v2977_v45  ;;  %v6823_v30 = vld [vmem:[#allocation31_spill] sm:$0xff]  ;;  %v6825_v45 = vld [vmem:[#allocation33_spill] sm:$0xff] }
 0x6d8   :  { %5237 = vtanh.f32 %v6361_v63  ;;  %4729 = vmatpush1.bf16.msra.mxu0 %v6661_v28  ;;  %4761 = vmatpush1.bf16.msra.mxu1 %v6662_v43 }
 0x6d9   :  { %4731 = vmatprep.subr.bf16.mxu0 %v5771_v61  ;;  %4763 = vmatprep.subr.bf16.mxu1 %v6663_v60 }
 0x6dc   :  { %4733 = vmatpush1.bf16.msra.mxu0 %v5777_v16  ;;  %4765 = vmatpush1.bf16.msra.mxu1 %v5781_v0 }
 0x6dd   :  { %4735 = vmatprep.subr.bf16.mxu0 %v5783_v20  ;;  %4767 = vmatprep.subr.bf16.mxu1 %v5786_v36 }
 0x6e0   :  { %4737 = vmatpush1.bf16.msra.mxu0 %v5789_v56  ;;  %4769 = vmatpush1.bf16.msra.mxu1 %v5793_v41 }
 0x6e1   :  { %4739 = vmatprep.subr.bf16.mxu0 %v5795_v6  ;;  %4771 = vmatprep.subr.bf16.mxu1 %v5798_v11 }
 0x6e2   :  { %v5238_v14 = vpop.eup %5237 }
 0x6e3   :  { %v2981_v52 = vmul.f32 %v5238_v14, %v5236_v25  ;;  %v6826_v25 = vld [vmem:[#allocation34_spill] sm:$0xff]  ;;  %v6827_v14 = vld [vmem:[#allocation35_spill] sm:$0xff] }
 0x6e4   :  { %4741 = vmatpush1.bf16.msra.mxu0 %v5801_v24  ;;  %4773 = vmatpush1.bf16.msra.mxu1 %v5805_v31 }
 0x6e5   :  { %v2982_v13 = vmul.f32 %v2981_v52, %v6806_v27  ;;  %4775 = vmatprep.subr.bf16.mxu0 %v5565_v22  ;;  %4807 = vmatprep.subr.bf16.mxu1 %v5568_v26  ;;  %v6808_v22 = vld [vmem:[#allocation16_spill] sm:$0xff]  ;;  %v6809_v26 = vld [vmem:[#allocation17_spill] sm:$0xff] }
 0x6e6   :  { %v6828_v52 = vld [vmem:[#allocation36_spill] sm:$0xff] }
 0x6e7   :  { %2984 = vst [vmem:[#allocation10 + $0x28] sm:$0xff] %v2982_v13  ;;  %3223 = vmatmul.mubr.f32.vlgmr.msra.gmra.mrb[18].mxu0 %v2982_v13  ;;  %3294 = vmatmul.mubr.f32.vlgmr.msra.gmra.mrb[18].mxu1 %v2982_v13  ;;  %v6829_v13 = vld [vmem:[#allocation37_spill] sm:$0xff] }
 0x6e8   :  { %4777 = vmatpush1.bf16.msra.mxu0 %v5571_v29  ;;  %4809 = vmatpush1.bf16.msra.mxu1 %v5574_v32  ;;  %v6812_v29 = vld [vmem:[#allocation20_spill] sm:$0xff]  ;;  %v6813_v32 = vld [vmem:[#allocation21_spill] sm:$0xff] }
 0x6e9   :  { %4779 = vmatprep.subr.bf16.mxu0 %v5578_v35  ;;  %4811 = vmatprep.subr.bf16.mxu1 %v5582_v39  ;;  %v6814_v35 = vld [vmem:[#allocation22_spill] sm:$0xff]  ;;  %v6815_v39 = vld [vmem:[#allocation23_spill] sm:$0xff] }
 0x6ea   :  { %3395 = vmatprep.mubr.f32.mxu0 %v6642_v51  ;;  %3466 = vmatprep.mubr.f32.mxu1 %v6642_v51 }
 0x6ec   :  { %4781 = vmatpush1.bf16.msra.mxu0 %v6807_v5  ;;  %4813 = vmatpush1.bf16.msra.mxu1 %v6808_v22  ;;  %v6830_v5 = vld [vmem:[#allocation38_spill] sm:$0xff]  ;;  %v6831_v22 = vld [vmem:[#allocation39_spill] sm:$0xff] }
 0x6ed   :  { %4783 = vmatprep.subr.bf16.mxu0 %v6809_v26  ;;  %4815 = vmatprep.subr.bf16.mxu1 %v6810_v3  ;;  %v6832_v26 = vld [vmem:[#allocation40_spill] sm:$0xff]  ;;  %v6833_v3 = vld [vmem:[#allocation41_spill] sm:$0xff] }
 0x6f0   :  { %4785 = vmatpush1.bf16.msra.mxu0 %v6811_v21  ;;  %4817 = vmatpush1.bf16.msra.mxu1 %v6812_v29  ;;  %v6834_v21 = vld [vmem:[#allocation42_spill] sm:$0xff] }
 0x6f1   :  { %4787 = vmatprep.subr.bf16.mxu0 %v6813_v32  ;;  %4819 = vmatprep.subr.bf16.mxu1 %v6814_v35  ;;  %v6835_v35 = vld [vmem:[#allocation55_spill] sm:$0xff] }
 0x6f4   :  { %4789 = vmatpush1.bf16.msra.mxu0 %v6815_v39  ;;  %4821 = vmatpush1.bf16.msra.mxu1 %v6816_v9 }
 0x6f5   :  { %4791 = vmatprep.subr.bf16.mxu0 %v6817_v12  ;;  %4823 = vmatprep.subr.bf16.mxu1 %v6818_v34 }
 0x6f8   :  { %4793 = vmatpush1.bf16.msra.mxu0 %v6819_v40  ;;  %4825 = vmatpush1.bf16.msra.mxu1 %v6820_v8 }
 0x6f9   :  { %4795 = vmatprep.subr.bf16.mxu0 %v6821_v58  ;;  %4827 = vmatprep.subr.bf16.mxu1 %v6822_v4 }
 0x6fc   :  { %4797 = vmatpush1.bf16.msra.mxu0 %v6823_v30  ;;  %4829 = vmatpush1.bf16.msra.mxu1 %v6824_v49  ;;  %v6836_v30 = vld [vmem:[#allocation58_spill] sm:$0xff] }
 0x6fd   :  { %4799 = vmatprep.subr.bf16.mxu0 %v6825_v45  ;;  %4831 = vmatprep.subr.bf16.mxu1 %v6826_v25 }
 0x700   :  { %4801 = vmatpush1.bf16.msra.mxu0 %v6827_v14  ;;  %4833 = vmatpush1.bf16.msra.mxu1 %v6828_v52 }
 0x701   :  { %4803 = vmatprep.subr.bf16.mxu0 %v6829_v13  ;;  %4835 = vmatprep.subr.bf16.mxu1 %v6830_v5 }
 0x704   :  { %4805 = vmatpush1.bf16.msra.mxu0 %v6831_v22  ;;  %4837 = vmatpush1.bf16.msra.mxu1 %v6832_v26  ;;  %v2810_v26 = vmul.f32 %v6333_v47, %v6805_v42 }
 0x705   :  { %4839 = vmatprep.subr.bf16.mxu0 %v6833_v3  ;;  %4871 = vmatprep.subr.bf16.mxu1 %v6834_v21 }
 0x79a   :  { %v3051_v29 = vpop.f32.mrb[12].mxu0  ;;  %v3122_v32 = vpop.f32.mrb[12].mxu1 }
 0x79b   :  { %v4914_v39 = vadd.f32 %v3051_v29, %v6835_v35  ;;  %v3053_v9 = vpop.f32.mrb[13].mxu0  ;;  %v3124_v12 = vpop.f32.mrb[13].mxu1  ;;  %v4930_v49 = vadd.f32 %v3122_v32, %v6836_v30 }
 0x79c   :  { %v4915_v34 = vadd.f32 %v3053_v9, %v6710_v18  ;;  %v4931_v58 = vadd.f32 %v3124_v12, %v6711_v57 }
 0x79d   :  { %v3738_v40 = vmul.f32 -1.442695, %v4914_v39 }
 0x79e   :  { %v3739_v8 = vmul.f32 -1.442695, %v4915_v34  ;;  %v3740_v4 = vmul.f32 -1.442695, %v4931_v58 }
 0x79f   :  { %5239 = vpow2.f32 %v3738_v40 }
 0x7a0   :  { %5241 = vpow2.f32 %v3739_v8 }
 0x7a1   :  { %5243 = vpow2.f32 %v3740_v4 }
 0x7a2   :  { %5245 = vtanh.f32 %v4930_v49 }
 0x7a9   :  { %v5240_v45 = vpop.eup %5239 }
 0x7aa   :  { %v5242_v25 = vpop.eup %5241  ;;  %v3134_v14 = vadd.f32 1.0, %v5240_v45 }
 0x7ab   :  { %v3140_v52 = vadd.f32 1.0, %v5242_v25  ;;  %v5244_v13 = vpop.eup %5243 }
 0x7ac   :  { %5247 = vrcp.f32 %v3134_v14  ;;  %v5246_v5 = vpop.eup %5245  ;;  %v3147_v29 = vadd.f32 1.0, %v5244_v13 }
 0x7ad   :  { %5249 = vrcp.f32 %v3140_v52 }
 0x7ae   :  { %5251 = vrcp.f32 %v3147_v29 }
 0x7b6   :  { %v5248_v22 = vpop.eup %5247 }
 0x7b7   :  { %v5250_v3 = vpop.eup %5249  ;;  %v3151_v21 = vmul.f32 %v5248_v22, %v5246_v5  ;;  %v6837_v5 = vld [vmem:[#allocation45_spill] sm:$0xff] }
 0x7b8   :  { %v3150_v39 = vmul.f32 %v5250_v3, %v2810_v26  ;;  %v5252_v42 = vpop.eup %5251 }
 0x7ba   :  { %v6421_v9 = vadd.f32 %v3151_v21, %v3150_v39  ;;  %v3224_v32 = vpop.f32.mrb[18].mxu0  ;;  %v3295_v12 = vpop.f32.mrb[18].mxu1 }
 0x7bb   :  { %v4936_v34 = vadd.f32 %v3224_v32, %v6679_v2  ;;  %v3226_v40 = vpop.f32.mrb[19].mxu0  ;;  %v3297_v8 = vpop.f32.mrb[19].mxu1  ;;  %v4952_v14 = vadd.f32 %v3295_v12, %v5883_v7 }
 0x7bc   :  { %5253 = vtanh.f32 %v6421_v9  ;;  %v4937_v58 = vadd.f32 %v3226_v40, %v6680_v55  ;;  %v4953_v47 = vadd.f32 %v3297_v8, %v5880_v54 }
 0x7bd   :  { %v3741_v4 = vmul.f32 -1.442695, %v4936_v34 }
 0x7be   :  { %v3742_v49 = vmul.f32 -1.442695, %v4937_v58  ;;  %v3743_v25 = vmul.f32 -1.442695, %v4953_v47 }
 0x7bf   :  { %5255 = vpow2.f32 %v3741_v4 }
 0x7c0   :  { %5257 = vpow2.f32 %v3742_v49 }
 0x7c1   :  { %5259 = vpow2.f32 %v3743_v25 }
 0x7c2   :  { %5261 = vtanh.f32 %v4952_v14 }
 0x7c6   :  { %v5254_v45 = vpop.eup %5253 }
 0x7c7   :  { %v3154_v52 = vmul.f32 %v5254_v45, %v5252_v42 }
 0x7c9   :  { %v5256_v13 = vpop.eup %5255  ;;  %v3155_v22 = vmul.f32 %v3154_v52, %v6837_v5  ;;  %v6839_v52 = vld [vmem:[#allocation43_spill] sm:$0xff] }
 0x7ca   :  { %v5258_v26 = vpop.eup %5257  ;;  %v3307_v3 = vadd.f32 1.0, %v5256_v13 }
 0x7cb   :  { %v3313_v21 = vadd.f32 1.0, %v5258_v26  ;;  %3157 = vst [vmem:[#allocation10 + $0x60] sm:$0xff] %v3155_v22  ;;  %3396 = vmatmul.mubr.f32.vlgmr.msra.gmra.mrb[14].mxu0 %v3155_v22  ;;  %3467 = vmatmul.mubr.f32.vlgmr.msra.gmra.mrb[14].mxu1 %v3155_v22 }
 0x7cc   :  { %5263 = vrcp.f32 %v3307_v3  ;;  %4841 = vmatpush1.bf16.msra.mxu0 %v5703_v33  ;;  %4873 = vmatpush1.bf16.msra.mxu1 %v5707_v37  ;;  %v5260_v33 = vpop.eup %5259 }
 0x7cd   :  { %5265 = vrcp.f32 %v3313_v21  ;;  %4843 = vmatprep.subr.bf16.mxu0 %v5709_v38  ;;  %4875 = vmatprep.subr.bf16.mxu1 %v5714_v15  ;;  %v5262_v37 = vpop.eup %5261  ;;  %v2983_v15 = vmul.f32 %v6361_v63, %v6806_v27  ;;  %v3156_v63 = vmul.f32 %v6421_v9, %v6837_v5 }
 0x7ce   :  { %3567 = vmatprep.mubr.f32.mxu0 %v6642_v51  ;;  %3638 = vmatprep.mubr.f32.mxu1 %v6642_v51  ;;  %v3320_v51 = vadd.f32 1.0, %v5260_v33 }
 0x7d0   :  { %4845 = vmatpush1.bf16.msra.mxu0 %v5720_v59  ;;  %4877 = vmatpush1.bf16.msra.mxu1 %v5725_v50  ;;  %5267 = vrcp.f32 %v3320_v51  ;;  %v6840_v51 = vld [vmem:[#allocation61_spill] sm:$0xff] }
 0x7d1   :  { %4847 = vmatprep.subr.bf16.mxu0 %v6652_v44  ;;  %4879 = vmatprep.subr.bf16.mxu1 %v6653_v17 }
 0x7d4   :  { %4849 = vmatpush1.bf16.msra.mxu0 %v6654_v53  ;;  %4881 = vmatpush1.bf16.msra.mxu1 %v6655_v23 }
 0x7d5   :  { %4851 = vmatprep.subr.bf16.mxu0 %v6682_v19  ;;  %4883 = vmatprep.subr.bf16.mxu1 %v6683_v62 }
 0x7d6   :  { %v5264_v38 = vpop.eup %5263 }
 0x7d7   :  { %v5266_v59 = vpop.eup %5265  ;;  %v3324_v50 = vmul.f32 %v5264_v38, %v5262_v37 }
 0x7d8   :  { %v3323_v44 = vmul.f32 %v5266_v59, %v2983_v15  ;;  %4853 = vmatpush1.bf16.msra.mxu0 %v6658_v48  ;;  %4885 = vmatpush1.bf16.msra.mxu1 %v5755_v10 }
 0x7d9   :  { %4855 = vmatprep.subr.bf16.mxu0 %v6659_v46  ;;  %4887 = vmatprep.subr.bf16.mxu1 %v6660_v1 }
 0x7da   :  { %v6449_v17 = vadd.f32 %v3324_v50, %v3323_v44  ;;  %v5268_v10 = vpop.eup %5267 }
 0x7dc   :  { %5269 = vtanh.f32 %v6449_v17  ;;  %4857 = vmatpush1.bf16.msra.mxu0 %v6661_v28  ;;  %4889 = vmatpush1.bf16.msra.mxu1 %v6662_v43 }
 0x7dd   :  { %4859 = vmatprep.subr.bf16.mxu0 %v5771_v61  ;;  %4891 = vmatprep.subr.bf16.mxu1 %v6663_v60 }
 0x7e0   :  { %4861 = vmatpush1.bf16.msra.mxu0 %v5777_v16  ;;  %4893 = vmatpush1.bf16.msra.mxu1 %v5781_v0  ;;  %v6838_v16 = vld [vmem:[#allocation44_spill] sm:$0xff] }
 0x7e1   :  { %4863 = vmatprep.subr.bf16.mxu0 %v5783_v20  ;;  %4895 = vmatprep.subr.bf16.mxu1 %v5786_v36  ;;  %v3329_v3 = vmul.f32 %v6449_v17, %v6838_v16 }
 0x7e4   :  { %4865 = vmatpush1.bf16.msra.mxu0 %v5789_v56  ;;  %4897 = vmatpush1.bf16.msra.mxu1 %v5793_v41 }
 0x7e5   :  { %4867 = vmatprep.subr.bf16.mxu0 %v5795_v6  ;;  %4899 = vmatprep.subr.bf16.mxu1 %v5798_v11 }
 0x7e6   :  { %v5270_v61 = vpop.eup %5269 }
 0x7e7   :  { %v3327_v53 = vmul.f32 %v5270_v61, %v5268_v10 }
 0x7e8   :  { %4869 = vmatpush1.bf16.msra.mxu0 %v5801_v24  ;;  %4901 = vmatpush1.bf16.msra.mxu1 %v5805_v31 }
 0x7e9   :  { %v3328_v0 = vmul.f32 %v3327_v53, %v6838_v16 }
 0x7eb   :  { %3330 = vst [vmem:[#allocation10 + $0x18] sm:$0xff] %v3328_v0  ;;  %3568 = vmatmul.mubr.f32.vlgmr.msra.gmra.mrb[16].mxu0 %v3328_v0  ;;  %3639 = vmatmul.mubr.f32.vlgmr.msra.gmra.mrb[16].mxu1 %v3328_v0 }
 0x89e   :  { %v3397_v20 = vpop.f32.mrb[14].mxu0  ;;  %v3468_v56 = vpop.f32.mrb[14].mxu1 }
 0x89f   :  { %v4916_v36 = vadd.f32 %v3397_v20, %v6835_v35  ;;  %v3399_v41 = vpop.f32.mrb[15].mxu0  ;;  %v3470_v23 = vpop.f32.mrb[15].mxu1  ;;  %v4932_v43 = vadd.f32 %v3468_v56, %v6836_v30 }
 0x8a0   :  { %v4917_v6 = vadd.f32 %v3399_v41, %v6710_v18  ;;  %v4933_v24 = vadd.f32 %v3470_v23, %v6711_v57 }
 0x8a1   :  { %v3744_v11 = vmul.f32 -1.442695, %v4916_v36 }
 0x8a2   :  { %v3745_v28 = vmul.f32 -1.442695, %v4917_v6  ;;  %v3746_v31 = vmul.f32 -1.442695, %v4933_v24 }
 0x8a3   :  { %5271 = vpow2.f32 %v3744_v11 }
 0x8a4   :  { %5273 = vpow2.f32 %v3745_v28 }
 0x8a5   :  { %5275 = vpow2.f32 %v3746_v31 }
 0x8a6   :  { %5277 = vtanh.f32 %v4932_v43 }
 0x8ad   :  { %v5272_v48 = vpop.eup %5271 }
 0x8ae   :  { %v5274_v46 = vpop.eup %5273  ;;  %v3480_v1 = vadd.f32 1.0, %v5272_v48 }
 0x8af   :  { %v3486_v60 = vadd.f32 1.0, %v5274_v46  ;;  %v5276_v19 = vpop.eup %5275 }
 0x8b0   :  { %5279 = vrcp.f32 %v3480_v1  ;;  %v5278_v62 = vpop.eup %5277  ;;  %v3493_v57 = vadd.f32 1.0, %v5276_v19 }
 0x8b1   :  { %5281 = vrcp.f32 %v3486_v60 }
 0x8b2   :  { %5283 = vrcp.f32 %v3493_v57 }
 0x8ba   :  { %v5280_v18 = vpop.eup %5279 }
 0x8bb   :  { %v5282_v27 = vpop.eup %5281  ;;  %v3497_v35 = vmul.f32 %v5280_v18, %v5278_v62 }
 0x8bc   :  { %v3496_v29 = vmul.f32 %v5282_v27, %v3156_v63  ;;  %v5284_v49 = vpop.eup %5283 }
 0x8be   :  { %v3498_v39 = vadd.f32 %v3497_v35, %v3496_v29  ;;  %v3569_v30 = vpop.f32.mrb[16].mxu0  ;;  %v3640_v32 = vpop.f32.mrb[16].mxu1 }
 0x8bf   :  { %v4934_v12 = vadd.f32 %v3569_v30, %v6679_v2  ;;  %v3571_v34 = vpop.f32.mrb[17].mxu0  ;;  %v3642_v40 = vpop.f32.mrb[17].mxu1  ;;  %v4950_v25 = vadd.f32 %v3640_v32, %v5883_v7 }
 0x8c0   :  { %5285 = vtanh.f32 %v3498_v39  ;;  %v4935_v8 = vadd.f32 %v3571_v34, %v6680_v55  ;;  %v4951_v9 = vadd.f32 %v3642_v40, %v5880_v54 }
 0x8c1   :  { %v3747_v58 = vmul.f32 -1.442695, %v4934_v12 }
 0x8c2   :  { %v3748_v4 = vmul.f32 -1.442695, %v4935_v8  ;;  %v3749_v42 = vmul.f32 -1.442695, %v4951_v9 }
 0x8c3   :  { %5287 = vpow2.f32 %v3747_v58 }
 0x8c4   :  { %5289 = vpow2.f32 %v3748_v4 }
 0x8c5   :  { %5291 = vpow2.f32 %v3749_v42 }
 0x8c6   :  { %5293 = vtanh.f32 %v4950_v25 }
 0x8ca   :  { %v5286_v47 = vpop.eup %5285 }
 0x8cb   :  { %v3500_v45 = vmul.f32 %v5286_v47, %v5284_v49 }
 0x8cd   :  { %v5288_v14 = vpop.eup %5287  ;;  %v3501_v2 = vmul.f32 %v3500_v45, %v6839_v52 }
 0x8ce   :  { %v5290_v13 = vpop.eup %5289  ;;  %v3652_v5 = vadd.f32 1.0, %v5288_v14 }
 0x8cf   :  { %3502 = vst [vmem:[#allocation10 + $0x70] sm:$0xff] %v3501_v2  ;;  %v3658_v55 = vadd.f32 1.0, %v5290_v13  ;;  %v5292_v22 = vpop.eup %5291 }
 0x8d0   :  { %5295 = vrcp.f32 %v3652_v5  ;;  %v5294_v26 = vpop.eup %5293  ;;  %v3665_v7 = vadd.f32 1.0, %v5292_v22 }
 0x8d1   :  { %5297 = vrcp.f32 %v3658_v55 }
 0x8d2   :  { %5299 = vrcp.f32 %v3665_v7 }
 0x8da   :  { %v5296_v54 = vpop.eup %5295 }
 0x8db   :  { %v5298_v21 = vpop.eup %5297  ;;  %v3669_v33 = vmul.f32 %v5296_v54, %v5294_v26 }
 0x8dc   :  { %v3668_v37 = vmul.f32 %v5298_v21, %v3329_v3  ;;  %v5300_v15 = vpop.eup %5299 }
 0x8de   :  { %v3670_v38 = vadd.f32 %v3669_v33, %v3668_v37 }
 0x8e0   :  { %5301 = vtanh.f32 %v3670_v38 }
 0x8ea   :  { %v5302_v59 = vpop.eup %5301 }
 0x8eb   :  { %v3672_v50 = vmul.f32 %v5302_v59, %v5300_v15 }
 0x8ed   :  { %v3673_v44 = vmul.f32 %v3672_v50, %v6840_v51 }
 0x8ef   :  { %3674 = vst [vmem:[#allocation10 + $0x8] sm:$0xff] %v3673_v44 }
 0x8f0   :  { %5402 = shalt.err (!%p5399_p8)
}
 0x8f1   :  { %s5403_s29 = scalar_lea.hbm %s6499_s6, 2048 }
 0x8f2   :  { %p5404_p9 = scmp.ne.s32.totalorder %s6499_s6, %s5403_s29  ;;  %p5407_p10 = scmp.lt.u32.totalorder %s5403_s29, %s6499_s6 }
 0x8f4   :  { %p5409_p11 = pnand %p5407_p10, %p5404_p9 }
 0x8f6   :  { %5412 = shalt.err (!%p5409_p11)
}
 0x8f7   :  { %s5434_s0 = smov 256   ;;  %s5435_s10 = smov 16  }
 0x8f8   :  { %3686 = dma.vmem_to_hbm [thread:$0]  %s3681_s25, 2048, %s6499_s6, [#allocation4], %s5434_s0, %s5434_s0, %s5435_s10  }
 0x8f9   :  { %5419 = dma.done.wait [#allocation4], 2048  }
 0x8fa   :  { %5420 = vsyncadd [#allocation4], 4294965248 }
 0x8fb   :  { %3690 = vsyncpa [#allocation3], 1 }
 0x8fc   :  { %3691 = vsyncpa [#allocation6], 1 }
 0x8fd   :  { %3692 = vsyncpa [#allocation9], 1 }
 0x8fe   :  { %3693 = vsyncpa [#allocation4], 1 }

</bundles_post_ra>
